<compile_context>
chip_gen: v5e
topology: v5e:2x2
jax: 0.10.0
libtpu: 0.0.40
codegen_flags: <defaults>
</compile_context>

<pallas_src>
import math
from functools import partial

import jax
import jax.numpy as jnp
from jax import lax
from jax.experimental import pallas as pl
from jax.experimental.pallas import tpu as pltpu

D_STATE = 16
K_DIRS = 4
CHUNK = 8           # scan step blocking: 8 rows == one f32 sublane tile


# --------------------------- Pallas kernels ---------------------------

def _front_kernel(eps, x_ref, lnw_ref, lnb_ref, mw_ref, mb_ref, pw_ref,
                  loc_ref, xin_ref):
    # Fused: ln_1 -> {MSC local attention (1x1 conv * x), in_proj x-chunk}; bf16 outputs.
    x = x_ref[...]
    mu = jnp.mean(x, axis=-1, keepdims=True)
    var = jnp.mean((x - mu) ** 2, axis=-1, keepdims=True)
    xn = (x - mu) * lax.rsqrt(var + eps) * lnw_ref[...] + lnb_ref[...]
    xn_b = xn.astype(jnp.bfloat16)
    conv = jnp.dot(xn_b, mw_ref[...], preferred_element_type=jnp.float32) + mb_ref[...]
    loc_ref[...] = (conv * xn).astype(loc_ref.dtype)
    xin_ref[...] = jnp.dot(xn_b, pw_ref[...],
                           preferred_element_type=jnp.float32).astype(xin_ref.dtype)


def _dwconv_silu_kernel(x_ref, w_ref, b_ref, o_ref):
    # Depthwise 3x3 conv (input pre-padded by 1, bf16) + SiLU, row-block tiled, bf16 output.
    # x_ref: (1, H+2, W+2, C) full padded image (fetched once per batch element),
    # o_ref: (1, TR, W, C) one row tile.  Taps index the ref directly (no xs materialization).
    TR = o_ref.shape[1]
    W = o_ref.shape[2]
    r0 = pl.program_id(1) * TR
    if TR % 8 == 0:
        r0 = pl.multiple_of(r0, 8)
    acc = jnp.zeros(o_ref.shape[1:], jnp.float32)
    for kh in range(3):
        for kw in range(3):
            tap = x_ref[0, pl.ds(r0 + kh, TR), pl.ds(kw, W), :].astype(jnp.float32)
            acc = acc + tap * w_ref[kh * 3 + kw]
    acc = acc + b_ref[0]
    o_ref[0] = (acc * (1.0 / (1.0 + jnp.exp(-acc)))).astype(o_ref.dtype)


def _scan_kernel(u_ref, wdt_ref, wbc_ref, bias_ref, at_ref, dk_ref, y_ref,
                 da_scr, dbu_scr, hs_scr):
    # Fused per-(batch, base) selective scan: both the forward direction and the reverse
    # direction of this base are processed here; the reverse pass accumulates into y_ref.
    # u_ref:   (1, 1, Lp, d_inner) bf16       (base sequence, zero-padded to Lp)
    # wdt_ref: (1, 2, d_inner, d_inner) bf16  (folded dt projection, [fwd, rev])
    # wbc_ref: (1, 2, d_inner, 2*d_state) bf16
    # bias_ref/dk_ref: (1, 2, 1, d_inner) f32 ; at_ref: (1, 2, d_state, d_inner) f32
    # y_ref:   (1, 1, Lp, d_inner) f32        (sum of both directions)
    # scratch: (CHUNK, d_state, d_inner) f32  x3   (dA, dBu, per-step h)
    Lp = u_ref.shape[2]
    d_inner = u_ref.shape[3]
    d_state = at_ref.shape[2]
    n_chunks = Lp // CHUNK

    def run_direction(dir_idx, reverse, accumulate):
        wdt = wdt_ref[0, dir_idx]            # (d_inner, d_inner) bf16
        wbc = wbc_ref[0, dir_idx]            # (d_inner, 2*d_state) bf16
        bias = bias_ref[0, dir_idx]          # (1, d_inner) f32
        at = at_ref[0, dir_idx]              # (d_state, d_inner) f32
        dd = dk_ref[0, dir_idx]              # (1, d_inner) f32

        def chunk_body(c, h):
            cc = (n_chunks - 1 - c) if reverse else c
            base = pl.multiple_of(cc * CHUNK, CHUNK)
            u_bf = u_ref[0, 0, pl.ds(base, CHUNK), :]            # (8, d_inner) bf16
            u_f = u_bf.astype(jnp.float32)
            # fused direction projection (MXU) -- overlaps the serial recurrence
            dt_raw = jnp.dot(u_bf, wdt, preferred_element_type=jnp.float32) + bias
            delta = jnp.maximum(dt_raw, 0.0) + jnp.log(1.0 + jnp.exp(-jnp.abs(dt_raw)))
            bc = jnp.dot(u_bf, wbc, preferred_element_type=jnp.float32)  # (8, 2*d_state)
            b_m = bc[:, :d_state]                                 # (8, d_state)
            c_m = bc[:, d_state:]                                 # (8, d_state)
            # chunk-level precompute (EUP exp / broadcasts off the serial path, VMEM scratch)
            da_scr[...] = jnp.exp(delta[:, None, :] * at[None, :, :])
            dbu_scr[...] = b_m[:, :, None] * (delta * u_f)[:, None, :]
            # serial recurrence: pure VALU FMA per step
            steps = range(CHUNK - 1, -1, -1) if reverse else range(CHUNK)
            for t in steps:
                h = da_scr[t] * h + dbu_scr[t]
                hs_scr[t] = h
            # batched C.h contraction + D*u for the whole chunk
            y_chunk = jnp.sum(c_m[:, :, None] * hs_scr[...], axis=1) + dd * u_f
            if accumulate:
                prev = y_ref[0, 0, pl.ds(base, CHUNK), :]
                y_ref[0, 0, pl.ds(base, CHUNK), :] = prev + y_chunk
            else:
                y_ref[0, 0, pl.ds(base, CHUNK), :] = y_chunk
            return h

        h0 = jnp.zeros((d_state, d_inner), jnp.float32)
        lax.fori_loop(0, n_chunks, chunk_body, h0)

    run_direction(0, reverse=False, accumulate=False)
    run_direction(1, reverse=True, accumulate=True)


def _final_kernel(eps, ya_ref, yb_ref, loc_ref, xres_ref, onw_ref, onb_ref,
                  w1_ref, wout_ref, o_ref):
    # Fused: out_norm(y_a + y_b) * SiLU(in_proj1(local_T)) -> out_proj -> + residual.
    y = ya_ref[...] + yb_ref[...]
    mu = jnp.mean(y, axis=-1, keepdims=True)
    var = jnp.mean((y - mu) ** 2, axis=-1, keepdims=True)
    yn = (y - mu) * lax.rsqrt(var + eps) * onw_ref[...] + onb_ref[...]
    lp = jnp.dot(loc_ref[...], w1_ref[...], preferred_element_type=jnp.float32)
    loc_silu = lp * (1.0 / (1.0 + jnp.exp(-lp)))
    ym = (yn * loc_silu).astype(jnp.bfloat16)
    o_ref[...] = xres_ref[...] + jnp.dot(ym, wout_ref[...],
                                         preferred_element_type=jnp.float32)


# --------------------------- kernel wrappers ---------------------------

def front_block(x2d, lnw, lnb, msc_w_bf16, msc_b, inproj_w_bf16, eps):
    rows, C = x2d.shape
    d_in = inproj_w_bf16.shape[1]
    tm = min(512, rows)
    return pl.pallas_call(
        partial(_front_kernel, eps),
        out_shape=(jax.ShapeDtypeStruct((rows, C), jnp.bfloat16),
                   jax.ShapeDtypeStruct((rows, d_in), jnp.bfloat16)),
        grid=(pl.cdiv(rows, tm),),
        in_specs=[pl.BlockSpec((tm, C), lambda i: (i, 0)),
                  pl.BlockSpec((1, C), lambda i: (0, 0)),
                  pl.BlockSpec((1, C), lambda i: (0, 0)),
                  pl.BlockSpec((C, C), lambda i: (0, 0)),
                  pl.BlockSpec((1, C), lambda i: (0, 0)),
                  pl.BlockSpec((C, d_in), lambda i: (0, 0))],
        out_specs=(pl.BlockSpec((tm, C), lambda i: (i, 0)),
                   pl.BlockSpec((tm, d_in), lambda i: (i, 0))),
        compiler_params=pltpu.CompilerParams(dimension_semantics=("parallel",)),
    )(x2d, lnw, lnb, msc_w_bf16, msc_b, inproj_w_bf16)


def dwconv_silu(xp_pad, w, b, H, W):
    Bb, Hp, Wp, Cc = xp_pad.shape
    TR = 16 if H % 16 == 0 else (8 if H % 8 == 0 else H)
    return pl.pallas_call(
        _dwconv_silu_kernel,
        out_shape=jax.ShapeDtypeStruct((Bb, H, W, Cc), jnp.bfloat16),
        grid=(Bb, H // TR),
        in_specs=[pl.BlockSpec((1, Hp, Wp, Cc), lambda i, r: (i, 0, 0, 0)),
                  pl.BlockSpec((9, 1, Cc), lambda i, r: (0, 0, 0)),
                  pl.BlockSpec((1, 1, Cc), lambda i, r: (0, 0, 0))],
        out_specs=pl.BlockSpec((1, TR, W, Cc), lambda i, r: (i, r, 0, 0)),
        compiler_params=pltpu.CompilerParams(
            dimension_semantics=("parallel", "parallel"),
            vmem_limit_bytes=48 * 1024 * 1024),
    )(xp_pad, w, b)


def fused_scan(bases, wdt, wbc, bias, At, Dd):
    # bases: (2, B, Lp, d_inner) bf16; weights arranged (base, [fwd, rev], ...).
    _, Bb, Lp, d_inner = bases.shape
    d_state = At.shape[2]
    c2 = wbc.shape[3]
    return pl.pallas_call(
        _scan_kernel,
        out_shape=jax.ShapeDtypeStruct((Bb, 2, Lp, d_inner), jnp.float32),
        grid=(Bb, 2),
        in_specs=[
            pl.BlockSpec((1, 1, Lp, d_inner), lambda b, m: (m, b, 0, 0)),
            pl.BlockSpec((1, 2, d_inner, d_inner), lambda b, m: (m, 0, 0, 0)),
            pl.BlockSpec((1, 2, d_inner, c2), lambda b, m: (m, 0, 0, 0)),
            pl.BlockSpec((1, 2, 1, d_inner), lambda b, m: (m, 0, 0, 0)),
            pl.BlockSpec((1, 2, d_state, d_inner), lambda b, m: (m, 0, 0, 0)),
            pl.BlockSpec((1, 2, 1, d_inner), lambda b, m: (m, 0, 0, 0)),
        ],
        out_specs=pl.BlockSpec((1, 1, Lp, d_inner), lambda b, m: (b, m, 0, 0)),
        scratch_shapes=[pltpu.VMEM((CHUNK, d_state, d_inner), jnp.float32),
                        pltpu.VMEM((CHUNK, d_state, d_inner), jnp.float32),
                        pltpu.VMEM((CHUNK, d_state, d_inner), jnp.float32)],
        compiler_params=pltpu.CompilerParams(
            dimension_semantics=("parallel", "parallel"),
            vmem_limit_bytes=48 * 1024 * 1024),
    )(bases, wdt, wbc, bias, At, Dd)


def final_block(ya, yb, loc_t, xres, onw, onb, w1_bf16, wout_bf16, eps):
    rows, d = ya.shape
    C = wout_bf16.shape[1]
    tm = min(512, rows)
    return pl.pallas_call(
        partial(_final_kernel, eps),
        out_shape=jax.ShapeDtypeStruct((rows, C), jnp.float32),
        grid=(pl.cdiv(rows, tm),),
        in_specs=[pl.BlockSpec((tm, d), lambda i: (i, 0)),
                  pl.BlockSpec((tm, d), lambda i: (i, 0)),
                  pl.BlockSpec((tm, C), lambda i: (i, 0)),
                  pl.BlockSpec((tm, C), lambda i: (i, 0)),
                  pl.BlockSpec((1, d), lambda i: (0, 0)),
                  pl.BlockSpec((1, d), lambda i: (0, 0)),
                  pl.BlockSpec((C, d), lambda i: (0, 0)),
                  pl.BlockSpec((d, C), lambda i: (0, 0))],
        out_specs=pl.BlockSpec((tm, C), lambda i: (i, 0)),
        compiler_params=pltpu.CompilerParams(dimension_semantics=("parallel",)),
    )(ya, yb, loc_t, xres, onw, onb, w1_bf16, wout_bf16)


# --------------------------- parameters ---------------------------

def init_params(key, C, d_state=D_STATE):
    d_inner = 2 * C
    dt_rank = max(1, math.ceil(C / 16))
    K = K_DIRS
    keys = jax.random.split(key, 12)

    def nrm(k, shape, scale=0.1):
        return scale * jax.random.normal(k, shape, dtype=jnp.float32)

    p = {}
    p['ln1_w'] = jnp.ones((1, C), jnp.float32)
    p['ln1_b'] = jnp.zeros((1, C), jnp.float32)
    p['msc_w'] = nrm(keys[0], (C, C))                        # 1x1 conv, stored (in, out)
    p['msc_b'] = nrm(keys[1], (1, C))
    p['in_proj1_w'] = nrm(keys[2], (C, 2 * C))               # bias=False, stored (in, out)
    p['in_proj_w'] = nrm(keys[3], (C, 2 * d_inner))          # z chunk is dead code
    p['out_proj_w'] = nrm(keys[4], (d_inner, C))
    p['conv2d_w'] = nrm(keys[5], (9, 1, d_inner))            # depthwise 3x3 (kh*3+kw, 1, C)
    p['conv2d_b'] = nrm(keys[6], (1, 1, d_inner))
    p['x_proj_w'] = nrm(keys[7], (K, dt_rank + 2 * d_state, d_inner))
    p['dt_projs_w'] = nrm(keys[8], (K, d_inner, dt_rank), scale=dt_rank ** -0.5)
    dt = jnp.exp(jax.random.uniform(keys[9], (K, d_inner), dtype=jnp.float32)
                 * (math.log(0.1) - math.log(0.001)) + math.log(0.001))
    dt = jnp.maximum(dt, 1e-4)
    p['dt_projs_bias'] = dt + jnp.log(-jnp.expm1(-dt))
    A = jnp.tile(jnp.arange(1, d_state + 1, dtype=jnp.float32)[None, :], (K * d_inner, 1))
    p['A_logs'] = jnp.log(A)
    p['Ds'] = jnp.ones((K * d_inner,), jnp.float32)
    p['out_norm_w'] = jnp.ones((1, d_inner), jnp.float32)
    p['out_norm_b'] = jnp.zeros((1, d_inner), jnp.float32)
    return p


# --------------------------- forward pass ---------------------------

def _reorder_dirs(a):
    # (K=4, ...) -> (2 bases, 2 [fwd, rev], ...); dirs 0,2 use base0; dirs 1,3 use base1.
    return jnp.stack([jnp.stack([a[0], a[2]], axis=0),
                      jnp.stack([a[1], a[3]], axis=0)], axis=0)


def vss_block_forward(x, p, d_state=D_STATE):
    B, H, W, C = x.shape
    assert H == W, "module multiplies (B,H,W,.) by (B,W,H,.) -> requires H == W"
    d_inner = 2 * C
    dt_rank = max(1, math.ceil(C / 16))
    K = K_DIRS
    L = H * W
    rows = B * H * W

    x2d = x.reshape(rows, C)

    # bf16 copies of the MXU weights
    msc_w = p['msc_w'].astype(jnp.bfloat16)
    inproj_w = p['in_proj_w'][:, :d_inner].astype(jnp.bfloat16)   # z chunk unused
    inproj1_w = p['in_proj1_w'].astype(jnp.bfloat16)
    outproj_w = p['out_proj_w'].astype(jnp.bfloat16)

    # 1) fused ln_1 -> {MSC local attention, in_proj x-chunk}  (bf16 intermediates)
    local_att, x_in = front_block(x2d, p['ln1_w'], p['ln1_b'], msc_w, p['msc_b'],
                                  inproj_w, eps=1e-6)

    # 2) local branch: permute(0,3,2,1) of NCHW == spatial transpose (in_proj1 fused later)
    loc_t = jnp.transpose(local_att.reshape(B, H, W, C), (0, 2, 1, 3)).reshape(rows, C)

    # 3) depthwise 3x3 conv + SiLU (bf16 in/out)
    # TODO(synk): fold the explicit halo pad + whole-image fetch into a per-row-slab DMA.
    xp_pad = jnp.pad(x_in.reshape(B, H, W, d_inner), ((0, 0), (1, 1), (1, 1), (0, 0)))
    x_conv = dwconv_silu(xp_pad, p['conv2d_w'], p['conv2d_b'], H, W)   # (B,H,W,d_inner) bf16

    # 4) scan bases (reversed directions handled inside the scan kernel -> no jnp.flip)
    base0 = x_conv.reshape(B, L, d_inner)                                # (h,w) order
    base1 = jnp.transpose(x_conv, (0, 2, 1, 3)).reshape(B, L, d_inner)   # (w,h) order
    bases = jnp.stack([base0, base1], axis=0)                            # (2,B,L,d) bf16

    # 5) weight prep: dt_rank matmul folded into x_proj (exact algebra); group dirs per base
    wdt_k = jnp.einsum('kdr,krc->kcd', p['dt_projs_w'],
                       p['x_proj_w'][:, :dt_rank, :])                    # (K,d_inner,d_inner)
    wbc_k = jnp.transpose(p['x_proj_w'][:, dt_rank:, :], (0, 2, 1))      # (K,d_inner,2n)
    At_k = jnp.transpose((-jnp.exp(p['A_logs'])).reshape(K, d_inner, d_state), (0, 2, 1))
    bias_k = p['dt_projs_bias'].reshape(K, 1, d_inner)
    D_k = p['Ds'].reshape(K, 1, d_inner)

    wdt = _reorder_dirs(wdt_k).astype(jnp.bfloat16)      # (2,2,d_inner,d_inner)
    wbc = _reorder_dirs(wbc_k).astype(jnp.bfloat16)      # (2,2,d_inner,2*d_state)
    At = _reorder_dirs(At_k)                             # (2,2,d_state,d_inner)
    bias = _reorder_dirs(bias_k)                         # (2,2,1,d_inner)
    Dd = _reorder_dirs(D_k)                              # (2,2,1,d_inner)

    # pad L to a CHUNK multiple (exact: padded u=0 -> B-term=0 -> state untouched)
    Lp = pl.cdiv(L, CHUNK) * CHUNK
    if Lp != L:
        bases = jnp.pad(bases, ((0, 0), (0, 0), (0, Lp - L), (0, 0)))

    # 6) fused selective scan: projection + fwd and rev scans per (batch, base), summed
    y = fused_scan(bases, wdt, wbc, bias, At, Dd)        # (B, 2, Lp, d_inner) f32

    # 7) merge directions exactly as in forward_core (reverse dirs already unflipped)
    y_a = y[:, 0, :L].reshape(rows, d_inner)
    y_b = jnp.transpose(y[:, 1, :L].reshape(B, W, H, d_inner),
                        (0, 2, 1, 3)).reshape(rows, d_inner)

    # 8) fused out_norm(y_a+y_b) * SiLU(in_proj1(local_T)) -> out_proj -> + residual
    out = final_block(y_a, y_b, loc_t, x2d, p['out_norm_w'], p['out_norm_b'],
                      inproj1_w, outproj_w, eps=1e-5)
    return out.reshape(B, H, W, C)


# --------------------------- main ---------------------------

if __name__ == "__main__":
    key = jax.random.PRNGKey(0)
    kx, kp = jax.random.split(key)
    # hidden_dim = 64 -> d_inner = 128 (lane-dense scan / conv / LN tiles), d_state = 16
    B, H, W, C = 2, 8, 8, 64
    x = jax.random.normal(kx, (B, H, W, C), dtype=jnp.float32)
    params = init_params(kp, C)

    fwd = jax.jit(vss_block_forward)
    out = fwd(x, params)
    jax.block_until_ready(out)

    assert out.shape == (B, H, W, C)
    assert bool(jnp.all(jnp.isfinite(out)))
    print("KERNEL_OK")
</pallas_src>

<mosaic_0001>
module attributes {stable_mosaic.version = 11 : i64} {
  func.func @_front_kernel(%arg0: i32, %arg1: memref<128x64xf32, #tpu.memory_space<vmem>>, %arg2: memref<1x64xf32, #tpu.memory_space<vmem>>, %arg3: memref<1x64xf32, #tpu.memory_space<vmem>>, %arg4: memref<64x64xbf16, #tpu.memory_space<vmem>>, %arg5: memref<1x64xf32, #tpu.memory_space<vmem>>, %arg6: memref<64x128xbf16, #tpu.memory_space<vmem>>, %arg7: memref<128x64xbf16, #tpu.memory_space<vmem>>, %arg8: memref<128x128xbf16, #tpu.memory_space<vmem>>) attributes {dimension_semantics = [#tpu.dimension_semantics<parallel>], iteration_bounds = array<i64: 1>, scalar_prefetch = 0 : i64, scratch_operands = 0 : i64, tpu.core_type = #tpu.core_type<tc>, window_params = [{transform_indices = @transform_0, window_bounds = array<i64: 128, 64>}, {pipeline_mode = #tpu.pipeline_mode<synchronous>, transform_indices = @transform_1, window_bounds = array<i64: 1, 64>}, {pipeline_mode = #tpu.pipeline_mode<synchronous>, transform_indices = @transform_2, window_bounds = array<i64: 1, 64>}, {pipeline_mode = #tpu.pipeline_mode<synchronous>, transform_indices = @transform_3, window_bounds = array<i64: 64, 64>}, {pipeline_mode = #tpu.pipeline_mode<synchronous>, transform_indices = @transform_4, window_bounds = array<i64: 1, 64>}, {pipeline_mode = #tpu.pipeline_mode<synchronous>, transform_indices = @transform_5, window_bounds = array<i64: 64, 128>}, {transform_indices = @transform_6, window_bounds = array<i64: 128, 64>}, {transform_indices = @transform_7, window_bounds = array<i64: 128, 128>}]} {
    %c0 = arith.constant 0 : index
    %c0_0 = arith.constant 0 : index
    %0 = vector.load %arg1[%c0, %c0_0] : memref<128x64xf32, #tpu.memory_space<vmem>>, vector<128x64xf32>
    %cst = arith.constant dense<0.000000e+00> : vector<128xf32>
    %1 = vector.multi_reduction <add>, %0, %cst [1] : vector<128x64xf32> to vector<128xf32>
    %2 = vector.shape_cast %1 : vector<128xf32> to vector<128x1xf32>
    %cst_1 = arith.constant 6.400000e+01 : f32
    %3 = vector.broadcast %cst_1 : f32 to vector<128x1xf32>
    %4 = arith.divf %2, %3 : vector<128x1xf32>
    %5 = vector.broadcast %4 : vector<128x1xf32> to vector<128x64xf32>
    %6 = arith.subf %0, %5 : vector<128x64xf32>
    %7 = arith.mulf %6, %6 : vector<128x64xf32>
    %cst_2 = arith.constant dense<0.000000e+00> : vector<128xf32>
    %8 = vector.multi_reduction <add>, %7, %cst_2 [1] : vector<128x64xf32> to vector<128xf32>
    %9 = vector.shape_cast %8 : vector<128xf32> to vector<128x1xf32>
    %cst_3 = arith.constant 6.400000e+01 : f32
    %10 = vector.broadcast %cst_3 : f32 to vector<128x1xf32>
    %11 = arith.divf %9, %10 : vector<128x1xf32>
    %12 = vector.broadcast %4 : vector<128x1xf32> to vector<128x64xf32>
    %13 = arith.subf %0, %12 : vector<128x64xf32>
    %cst_4 = arith.constant 9.99999997E-7 : f32
    %14 = vector.broadcast %cst_4 : f32 to vector<128x1xf32>
    %15 = arith.addf %11, %14 : vector<128x1xf32>
    %16 = math.rsqrt %15 : vector<128x1xf32>
    %17 = vector.broadcast %16 : vector<128x1xf32> to vector<128x64xf32>
    %18 = arith.mulf %13, %17 : vector<128x64xf32>
    %c0_5 = arith.constant 0 : index
    %c0_6 = arith.constant 0 : index
    %19 = vector.load %arg2[%c0_5, %c0_6] : memref<1x64xf32, #tpu.memory_space<vmem>>, vector<1x64xf32>
    %20 = vector.broadcast %19 : vector<1x64xf32> to vector<128x64xf32>
    %21 = arith.mulf %18, %20 : vector<128x64xf32>
    %c0_7 = arith.constant 0 : index
    %c0_8 = arith.constant 0 : index
    %22 = vector.load %arg3[%c0_7, %c0_8] : memref<1x64xf32, #tpu.memory_space<vmem>>, vector<1x64xf32>
    %23 = vector.broadcast %22 : vector<1x64xf32> to vector<128x64xf32>
    %24 = arith.addf %21, %23 : vector<128x64xf32>
    %25 = arith.truncf %24 : vector<128x64xf32> to vector<128x64xbf16>
    %c0_9 = arith.constant 0 : index
    %c0_10 = arith.constant 0 : index
    %26 = vector.load %arg4[%c0_9, %c0_10] : memref<64x64xbf16, #tpu.memory_space<vmem>>, vector<64x64xbf16>
    %cst_11 = arith.constant dense<0.000000e+00> : vector<128x64xf32>
    %27 = tpu.matmul %25, %26, %cst_11 {dimension_numbers = #tpu.dot_dimension_numbers<[1], [0], [0], [1], [0, 0, 1, 1], [], []>} : vector<128x64xbf16>, vector<64x64xbf16>, vector<128x64xf32> -> vector<128x64xf32>
    %c0_12 = arith.constant 0 : index
    %c0_13 = arith.constant 0 : index
    %28 = vector.load %arg5[%c0_12, %c0_13] : memref<1x64xf32, #tpu.memory_space<vmem>>, vector<1x64xf32>
    %29 = vector.broadcast %28 : vector<1x64xf32> to vector<128x64xf32>
    %30 = arith.addf %27, %29 : vector<128x64xf32>
    %31 = arith.mulf %30, %24 : vector<128x64xf32>
    %32 = arith.truncf %31 : vector<128x64xf32> to vector<128x64xbf16>
    %c0_14 = arith.constant 0 : index
    %c0_15 = arith.constant 0 : index
    %33 = vector.load %arg7[%c0_14, %c0_15] : memref<128x64xbf16, #tpu.memory_space<vmem>>, vector<128x64xbf16>
    tpu.vector_store %arg7[%c0_14, %c0_15], %32 {strides = array<i32>} : memref<128x64xbf16, #tpu.memory_space<vmem>>, vector<128x64xbf16>,
    %c0_16 = arith.constant 0 : index
    %c0_17 = arith.constant 0 : index
    %34 = vector.load %arg6[%c0_16, %c0_17] : memref<64x128xbf16, #tpu.memory_space<vmem>>, vector<64x128xbf16>
    %cst_18 = arith.constant dense<0.000000e+00> : vector<128x128xf32>
    %35 = tpu.matmul %25, %34, %cst_18 {dimension_numbers = #tpu.dot_dimension_numbers<[1], [0], [0], [1], [0, 0, 1, 1], [], []>} : vector<128x64xbf16>, vector<64x128xbf16>, vector<128x128xf32> -> vector<128x128xf32>
    %36 = arith.truncf %35 : vector<128x128xf32> to vector<128x128xbf16>
    %c0_19 = arith.constant 0 : index
    %c0_20 = arith.constant 0 : index
    %37 = vector.load %arg8[%c0_19, %c0_20] : memref<128x128xbf16, #tpu.memory_space<vmem>>, vector<128x128xbf16>
    tpu.vector_store %arg8[%c0_19, %c0_20], %36 {strides = array<i32>} : memref<128x128xbf16, #tpu.memory_space<vmem>>, vector<128x128xbf16>,
    return
  }
  func.func @transform_0(%arg0: i32) -> (i32, i32) {
    %c0_i32 = arith.constant 0 : i32
    %c0_i32_0 = arith.constant 0 : i32
    return %arg0, %c0_i32 : i32, i32
  }
  func.func @transform_1(%arg0: i32) -> (i32, i32) {
    %c0_i32 = arith.constant 0 : i32
    %c0_i32_0 = arith.constant 0 : i32
    %c0_i32_1 = arith.constant 0 : i32
    return %c0_i32, %c0_i32_0 : i32, i32
  }
  func.func @transform_2(%arg0: i32) -> (i32, i32) {
    %c0_i32 = arith.constant 0 : i32
    %c0_i32_0 = arith.constant 0 : i32
    %c0_i32_1 = arith.constant 0 : i32
    return %c0_i32, %c0_i32_0 : i32, i32
  }
  func.func @transform_3(%arg0: i32) -> (i32, i32) {
    %c0_i32 = arith.constant 0 : i32
    %c0_i32_0 = arith.constant 0 : i32
    %c0_i32_1 = arith.constant 0 : i32
    return %c0_i32, %c0_i32_0 : i32, i32
  }
  func.func @transform_4(%arg0: i32) -> (i32, i32) {
    %c0_i32 = arith.constant 0 : i32
    %c0_i32_0 = arith.constant 0 : i32
    %c0_i32_1 = arith.constant 0 : i32
    return %c0_i32, %c0_i32_0 : i32, i32
  }
  func.func @transform_5(%arg0: i32) -> (i32, i32) {
    %c0_i32 = arith.constant 0 : i32
    %c0_i32_0 = arith.constant 0 : i32
    %c0_i32_1 = arith.constant 0 : i32
    return %c0_i32, %c0_i32_0 : i32, i32
  }
  func.func @transform_6(%arg0: i32) -> (i32, i32) {
    %c0_i32 = arith.constant 0 : i32
    %c0_i32_0 = arith.constant 0 : i32
    return %arg0, %c0_i32 : i32, i32
  }
  func.func @transform_7(%arg0: i32) -> (i32, i32) {
    %c0_i32 = arith.constant 0 : i32
    %c0_i32_0 = arith.constant 0 : i32
    return %arg0, %c0_i32 : i32, i32
  }
}

module attributes {stable_mosaic.version = 11 : i64} {
  func.func @_dwconv_silu_kernel(%arg0: i32, %arg1: i32, %arg2: memref<1x10x10x128xbf16, #tpu.memory_space<vmem>>, %arg3: memref<9x1x128xf32, #tpu.memory_space<vmem>>, %arg4: memref<1x1x128xf32, #tpu.memory_space<vmem>>, %arg5: memref<1x8x8x128xbf16, #tpu.memory_space<vmem>>) attributes {dimension_semantics = [#tpu.dimension_semantics<parallel>, #tpu.dimension_semantics<parallel>], iteration_bounds = array<i64: 2, 1>, scalar_prefetch = 0 : i64, scratch_operands = 0 : i64, tpu.core_type = #tpu.core_type<tc>, window_params = [{transform_indices = @transform_0, window_bounds = array<i64: 1, 10, 10, 128>}, {pipeline_mode = #tpu.pipeline_mode<synchronous>, transform_indices = @transform_1, window_bounds = array<i64: 9, 1, 128>}, {pipeline_mode = #tpu.pipeline_mode<synchronous>, transform_indices = @transform_2, window_bounds = array<i64: 1, 1, 128>}, {transform_indices = @transform_3, window_bounds = array<i64: 1, 8, 8, 128>}]} {
    %c8_i32 = arith.constant 8 : i32
    %0 = arith.muli %arg1, %c8_i32 : i32
    %1 = tpu.assume_multiple %0, 8 : i32
    %cst = arith.constant 0.000000e+00 : f32
    %2 = vector.broadcast %cst : f32 to vector<8x8x128xf32>
    %c0_i32 = arith.constant 0 : i32
    %3 = arith.addi %1, %c0_i32 : i32
    %c0 = arith.constant 0 : index
    %4 = arith.index_cast %3 : i32 to index
    %c0_0 = arith.constant 0 : index
    %c0_1 = arith.constant 0 : index
    %5 = vector.load %arg2[%c0, %4, %c0_0, %c0_1] : memref<1x10x10x128xbf16, #tpu.memory_space<vmem>>, vector<1x8x8x128xbf16>
    %6 = vector.shape_cast %5 : vector<1x8x8x128xbf16> to vector<8x8x128xbf16>
    %7 = arith.extf %6 : vector<8x8x128xbf16> to vector<8x8x128xf32>
    %c0_2 = arith.constant 0 : index
    %c0_3 = arith.constant 0 : index
    %c0_4 = arith.constant 0 : index
    %8 = vector.load %arg3[%c0_2, %c0_3, %c0_4] : memref<9x1x128xf32, #tpu.memory_space<vmem>>, vector<1x1x128xf32>
    %9 = vector.shape_cast %8 : vector<1x1x128xf32> to vector<1x128xf32>
    %10 = vector.shape_cast %9 : vector<1x128xf32> to vector<1x1x128xf32>
    %11 = vector.broadcast %10 : vector<1x1x128xf32> to vector<8x8x128xf32>
    %12 = arith.mulf %7, %11 : vector<8x8x128xf32>
    %13 = arith.addf %2, %12 : vector<8x8x128xf32>
    %c0_i32_5 = arith.constant 0 : i32
    %14 = arith.addi %1, %c0_i32_5 : i32
    %c0_6 = arith.constant 0 : index
    %15 = arith.index_cast %14 : i32 to index
    %c1 = arith.constant 1 : index
    %c0_7 = arith.constant 0 : index
    %16 = vector.load %arg2[%c0_6, %15, %c1, %c0_7] : memref<1x10x10x128xbf16, #tpu.memory_space<vmem>>, vector<1x8x8x128xbf16>
    %17 = vector.shape_cast %16 : vector<1x8x8x128xbf16> to vector<8x8x128xbf16>
    %18 = arith.extf %17 : vector<8x8x128xbf16> to vector<8x8x128xf32>
    %c1_8 = arith.constant 1 : index
    %c0_9 = arith.constant 0 : index
    %c0_10 = arith.constant 0 : index
    %19 = vector.load %arg3[%c1_8, %c0_9, %c0_10] : memref<9x1x128xf32, #tpu.memory_space<vmem>>, vector<1x1x128xf32>
    %20 = vector.shape_cast %19 : vector<1x1x128xf32> to vector<1x128xf32>
    %21 = vector.shape_cast %20 : vector<1x128xf32> to vector<1x1x128xf32>
    %22 = vector.broadcast %21 : vector<1x1x128xf32> to vector<8x8x128xf32>
    %23 = arith.mulf %18, %22 : vector<8x8x128xf32>
    %24 = arith.addf %13, %23 : vector<8x8x128xf32>
    %c0_i32_11 = arith.constant 0 : i32
    %25 = arith.addi %1, %c0_i32_11 : i32
    %c0_12 = arith.constant 0 : index
    %26 = arith.index_cast %25 : i32 to index
    %c2 = arith.constant 2 : index
    %c0_13 = arith.constant 0 : index
    %27 = vector.load %arg2[%c0_12, %26, %c2, %c0_13] : memref<1x10x10x128xbf16, #tpu.memory_space<vmem>>, vector<1x8x8x128xbf16>
    %28 = vector.shape_cast %27 : vector<1x8x8x128xbf16> to vector<8x8x128xbf16>
    %29 = arith.extf %28 : vector<8x8x128xbf16> to vector<8x8x128xf32>
    %c2_14 = arith.constant 2 : index
    %c0_15 = arith.constant 0 : index
    %c0_16 = arith.constant 0 : index
    %30 = vector.load %arg3[%c2_14, %c0_15, %c0_16] : memref<9x1x128xf32, #tpu.memory_space<vmem>>, vector<1x1x128xf32>
    %31 = vector.shape_cast %30 : vector<1x1x128xf32> to vector<1x128xf32>
    %32 = vector.shape_cast %31 : vector<1x128xf32> to vector<1x1x128xf32>
    %33 = vector.broadcast %32 : vector<1x1x128xf32> to vector<8x8x128xf32>
    %34 = arith.mulf %29, %33 : vector<8x8x128xf32>
    %35 = arith.addf %24, %34 : vector<8x8x128xf32>
    %c1_i32 = arith.constant 1 : i32
    %36 = arith.addi %1, %c1_i32 : i32
    %c0_17 = arith.constant 0 : index
    %37 = arith.index_cast %36 : i32 to index
    %c0_18 = arith.constant 0 : index
    %c0_19 = arith.constant 0 : index
    %38 = vector.load %arg2[%c0_17, %37, %c0_18, %c0_19] : memref<1x10x10x128xbf16, #tpu.memory_space<vmem>>, vector<1x8x8x128xbf16>
    %39 = vector.shape_cast %38 : vector<1x8x8x128xbf16> to vector<8x8x128xbf16>
    %40 = arith.extf %39 : vector<8x8x128xbf16> to vector<8x8x128xf32>
    %c3 = arith.constant 3 : index
    %c0_20 = arith.constant 0 : index
    %c0_21 = arith.constant 0 : index
    %41 = vector.load %arg3[%c3, %c0_20, %c0_21] : memref<9x1x128xf32, #tpu.memory_space<vmem>>, vector<1x1x128xf32>
    %42 = vector.shape_cast %41 : vector<1x1x128xf32> to vector<1x128xf32>
    %43 = vector.shape_cast %42 : vector<1x128xf32> to vector<1x1x128xf32>
    %44 = vector.broadcast %43 : vector<1x1x128xf32> to vector<8x8x128xf32>
    %45 = arith.mulf %40, %44 : vector<8x8x128xf32>
    %46 = arith.addf %35, %45 : vector<8x8x128xf32>
    %c1_i32_22 = arith.constant 1 : i32
    %47 = arith.addi %1, %c1_i32_22 : i32
    %c0_23 = arith.constant 0 : index
    %48 = arith.index_cast %47 : i32 to index
    %c1_24 = arith.constant 1 : index
    %c0_25 = arith.constant 0 : index
    %49 = vector.load %arg2[%c0_23, %48, %c1_24, %c0_25] : memref<1x10x10x128xbf16, #tpu.memory_space<vmem>>, vector<1x8x8x128xbf16>
    %50 = vector.shape_cast %49 : vector<1x8x8x128xbf16> to vector<8x8x128xbf16>
    %51 = arith.extf %50 : vector<8x8x128xbf16> to vector<8x8x128xf32>
    %c4 = arith.constant 4 : index
    %c0_26 = arith.constant 0 : index
    %c0_27 = arith.constant 0 : index
    %52 = vector.load %arg3[%c4, %c0_26, %c0_27] : memref<9x1x128xf32, #tpu.memory_space<vmem>>, vector<1x1x128xf32>
    %53 = vector.shape_cast %52 : vector<1x1x128xf32> to vector<1x128xf32>
    %54 = vector.shape_cast %53 : vector<1x128xf32> to vector<1x1x128xf32>
    %55 = vector.broadcast %54 : vector<1x1x128xf32> to vector<8x8x128xf32>
    %56 = arith.mulf %51, %55 : vector<8x8x128xf32>
    %57 = arith.addf %46, %56 : vector<8x8x128xf32>
    %c1_i32_28 = arith.constant 1 : i32
    %58 = arith.addi %1, %c1_i32_28 : i32
    %c0_29 = arith.constant 0 : index
    %59 = arith.index_cast %58 : i32 to index
    %c2_30 = arith.constant 2 : index
    %c0_31 = arith.constant 0 : index
    %60 = vector.load %arg2[%c0_29, %59, %c2_30, %c0_31] : memref<1x10x10x128xbf16, #tpu.memory_space<vmem>>, vector<1x8x8x128xbf16>
    %61 = vector.shape_cast %60 : vector<1x8x8x128xbf16> to vector<8x8x128xbf16>
    %62 = arith.extf %61 : vector<8x8x128xbf16> to vector<8x8x128xf32>
    %c5 = arith.constant 5 : index
    %c0_32 = arith.constant 0 : index
    %c0_33 = arith.constant 0 : index
    %63 = vector.load %arg3[%c5, %c0_32, %c0_33] : memref<9x1x128xf32, #tpu.memory_space<vmem>>, vector<1x1x128xf32>
    %64 = vector.shape_cast %63 : vector<1x1x128xf32> to vector<1x128xf32>
    %65 = vector.shape_cast %64 : vector<1x128xf32> to vector<1x1x128xf32>
    %66 = vector.broadcast %65 : vector<1x1x128xf32> to vector<8x8x128xf32>
    %67 = arith.mulf %62, %66 : vector<8x8x128xf32>
    %68 = arith.addf %57, %67 : vector<8x8x128xf32>
    %c2_i32 = arith.constant 2 : i32
    %69 = arith.addi %1, %c2_i32 : i32
    %c0_34 = arith.constant 0 : index
    %70 = arith.index_cast %69 : i32 to index
    %c0_35 = arith.constant 0 : index
    %c0_36 = arith.constant 0 : index
    %71 = vector.load %arg2[%c0_34, %70, %c0_35, %c0_36] : memref<1x10x10x128xbf16, #tpu.memory_space<vmem>>, vector<1x8x8x128xbf16>
    %72 = vector.shape_cast %71 : vector<1x8x8x128xbf16> to vector<8x8x128xbf16>
    %73 = arith.extf %72 : vector<8x8x128xbf16> to vector<8x8x128xf32>
    %c6 = arith.constant 6 : index
    %c0_37 = arith.constant 0 : index
    %c0_38 = arith.constant 0 : index
    %74 = vector.load %arg3[%c6, %c0_37, %c0_38] : memref<9x1x128xf32, #tpu.memory_space<vmem>>, vector<1x1x128xf32>
    %75 = vector.shape_cast %74 : vector<1x1x128xf32> to vector<1x128xf32>
    %76 = vector.shape_cast %75 : vector<1x128xf32> to vector<1x1x128xf32>
    %77 = vector.broadcast %76 : vector<1x1x128xf32> to vector<8x8x128xf32>
    %78 = arith.mulf %73, %77 : vector<8x8x128xf32>
    %79 = arith.addf %68, %78 : vector<8x8x128xf32>
    %c2_i32_39 = arith.constant 2 : i32
    %80 = arith.addi %1, %c2_i32_39 : i32
    %c0_40 = arith.constant 0 : index
    %81 = arith.index_cast %80 : i32 to index
    %c1_41 = arith.constant 1 : index
    %c0_42 = arith.constant 0 : index
    %82 = vector.load %arg2[%c0_40, %81, %c1_41, %c0_42] : memref<1x10x10x128xbf16, #tpu.memory_space<vmem>>, vector<1x8x8x128xbf16>
    %83 = vector.shape_cast %82 : vector<1x8x8x128xbf16> to vector<8x8x128xbf16>
    %84 = arith.extf %83 : vector<8x8x128xbf16> to vector<8x8x128xf32>
    %c7 = arith.constant 7 : index
    %c0_43 = arith.constant 0 : index
    %c0_44 = arith.constant 0 : index
    %85 = vector.load %arg3[%c7, %c0_43, %c0_44] : memref<9x1x128xf32, #tpu.memory_space<vmem>>, vector<1x1x128xf32>
    %86 = vector.shape_cast %85 : vector<1x1x128xf32> to vector<1x128xf32>
    %87 = vector.shape_cast %86 : vector<1x128xf32> to vector<1x1x128xf32>
    %88 = vector.broadcast %87 : vector<1x1x128xf32> to vector<8x8x128xf32>
    %89 = arith.mulf %84, %88 : vector<8x8x128xf32>
    %90 = arith.addf %79, %89 : vector<8x8x128xf32>
    %c2_i32_45 = arith.constant 2 : i32
    %91 = arith.addi %1, %c2_i32_45 : i32
    %c0_46 = arith.constant 0 : index
    %92 = arith.index_cast %91 : i32 to index
    %c2_47 = arith.constant 2 : index
    %c0_48 = arith.constant 0 : index
    %93 = vector.load %arg2[%c0_46, %92, %c2_47, %c0_48] : memref<1x10x10x128xbf16, #tpu.memory_space<vmem>>, vector<1x8x8x128xbf16>
    %94 = vector.shape_cast %93 : vector<1x8x8x128xbf16> to vector<8x8x128xbf16>
    %95 = arith.extf %94 : vector<8x8x128xbf16> to vector<8x8x128xf32>
    %c8 = arith.constant 8 : index
    %c0_49 = arith.constant 0 : index
    %c0_50 = arith.constant 0 : index
    %96 = vector.load %arg3[%c8, %c0_49, %c0_50] : memref<9x1x128xf32, #tpu.memory_space<vmem>>, vector<1x1x128xf32>
    %97 = vector.shape_cast %96 : vector<1x1x128xf32> to vector<1x128xf32>
    %98 = vector.shape_cast %97 : vector<1x128xf32> to vector<1x1x128xf32>
    %99 = vector.broadcast %98 : vector<1x1x128xf32> to vector<8x8x128xf32>
    %100 = arith.mulf %95, %99 : vector<8x8x128xf32>
    %101 = arith.addf %90, %100 : vector<8x8x128xf32>
    %c0_51 = arith.constant 0 : index
    %c0_52 = arith.constant 0 : index
    %c0_53 = arith.constant 0 : index
    %102 = vector.load %arg4[%c0_51, %c0_52, %c0_53] : memref<1x1x128xf32, #tpu.memory_space<vmem>>, vector<1x1x128xf32>
    %103 = vector.shape_cast %102 : vector<1x1x128xf32> to vector<1x128xf32>
    %104 = vector.shape_cast %103 : vector<1x128xf32> to vector<1x1x128xf32>
    %105 = vector.broadcast %104 : vector<1x1x128xf32> to vector<8x8x128xf32>
    %106 = arith.addf %101, %105 : vector<8x8x128xf32>
    %cst_54 = arith.constant 0.000000e+00 : f32
    %107 = vector.broadcast %cst_54 : f32 to vector<8x8x128xf32>
    %108 = arith.subf %107, %106 : vector<8x8x128xf32>
    %109 = math.exp %108 : vector<8x8x128xf32>
    %cst_55 = arith.constant 1.000000e+00 : f32
    %110 = vector.broadcast %cst_55 : f32 to vector<8x8x128xf32>
    %111 = arith.addf %110, %109 : vector<8x8x128xf32>
    %cst_56 = arith.constant 1.000000e+00 : f32
    %112 = vector.broadcast %cst_56 : f32 to vector<8x8x128xf32>
    %113 = arith.divf %112, %111 : vector<8x8x128xf32>
    %114 = arith.mulf %106, %113 : vector<8x8x128xf32>
    %115 = arith.truncf %114 : vector<8x8x128xf32> to vector<8x8x128xbf16>
    %c0_57 = arith.constant 0 : index
    %c0_58 = arith.constant 0 : index
    %c0_59 = arith.constant 0 : index
    %c0_60 = arith.constant 0 : index
    %116 = vector.load %arg5[%c0_57, %c0_58, %c0_59, %c0_60] : memref<1x8x8x128xbf16, #tpu.memory_space<vmem>>, vector<1x8x8x128xbf16>
    %117 = vector.shape_cast %116 : vector<1x8x8x128xbf16> to vector<8x8x128xbf16>
    %118 = vector.shape_cast %115 : vector<8x8x128xbf16> to vector<1x8x8x128xbf16>
    tpu.vector_store %arg5[%c0_57, %c0_58, %c0_59, %c0_60], %118 {strides = array<i32>} : memref<1x8x8x128xbf16, #tpu.memory_space<vmem>>, vector<1x8x8x128xbf16>,
    return
  }
  func.func @transform_0(%arg0: i32, %arg1: i32) -> (i32, i32, i32, i32) {
    %c0_i32 = arith.constant 0 : i32
    %c0_i32_0 = arith.constant 0 : i32
    %c0_i32_1 = arith.constant 0 : i32
    %c0_i32_2 = arith.constant 0 : i32
    return %arg0, %c0_i32, %c0_i32_0, %c0_i32_1 : i32, i32, i32, i32
  }
  func.func @transform_1(%arg0: i32, %arg1: i32) -> (i32, i32, i32) {
    %c0_i32 = arith.constant 0 : i32
    %c0_i32_0 = arith.constant 0 : i32
    %c0_i32_1 = arith.constant 0 : i32
    %c0_i32_2 = arith.constant 0 : i32
    return %c0_i32, %c0_i32_0, %c0_i32_1 : i32, i32, i32
  }
  func.func @transform_2(%arg0: i32, %arg1: i32) -> (i32, i32, i32) {
    %c0_i32 = arith.constant 0 : i32
    %c0_i32_0 = arith.constant 0 : i32
    %c0_i32_1 = arith.constant 0 : i32
    %c0_i32_2 = arith.constant 0 : i32
    return %c0_i32, %c0_i32_0, %c0_i32_1 : i32, i32, i32
  }
  func.func @transform_3(%arg0: i32, %arg1: i32) -> (i32, i32, i32, i32) {
    %c0_i32 = arith.constant 0 : i32
    %c0_i32_0 = arith.constant 0 : i32
    %c0_i32_1 = arith.constant 0 : i32
    return %arg0, %arg1, %c0_i32, %c0_i32_0 : i32, i32, i32, i32
  }
}

module attributes {stable_mosaic.version = 11 : i64} {
  func.func @_scan_kernel(%arg0: i32, %arg1: i32, %arg2: memref<1x1x64x128xbf16, #tpu.memory_space<vmem>>, %arg3: memref<1x2x128x128xbf16, #tpu.memory_space<vmem>>, %arg4: memref<1x2x128x32xbf16, #tpu.memory_space<vmem>>, %arg5: memref<1x2x1x128xf32, #tpu.memory_space<vmem>>, %arg6: memref<1x2x16x128xf32, #tpu.memory_space<vmem>>, %arg7: memref<1x2x1x128xf32, #tpu.memory_space<vmem>>, %arg8: memref<1x1x64x128xf32, #tpu.memory_space<vmem>>, %arg9: memref<8x16x128xf32, #tpu.memory_space<vmem>>, %arg10: memref<8x16x128xf32, #tpu.memory_space<vmem>>, %arg11: memref<8x16x128xf32, #tpu.memory_space<vmem>>) attributes {dimension_semantics = [#tpu.dimension_semantics<parallel>, #tpu.dimension_semantics<parallel>], iteration_bounds = array<i64: 2, 2>, scalar_prefetch = 0 : i64, scratch_operands = 3 : i64, tpu.core_type = #tpu.core_type<tc>, window_params = [{transform_indices = @transform_0, window_bounds = array<i64: 1, 1, 64, 128>}, {transform_indices = @transform_1, window_bounds = array<i64: 1, 2, 128, 128>}, {transform_indices = @transform_2, window_bounds = array<i64: 1, 2, 128, 32>}, {transform_indices = @transform_3, window_bounds = array<i64: 1, 2, 1, 128>}, {transform_indices = @transform_4, window_bounds = array<i64: 1, 2, 16, 128>}, {transform_indices = @transform_5, window_bounds = array<i64: 1, 2, 1, 128>}, {transform_indices = @transform_6, window_bounds = array<i64: 1, 1, 64, 128>}]} {
    %c0 = arith.constant 0 : index
    %c0_0 = arith.constant 0 : index
    %c0_1 = arith.constant 0 : index
    %c0_2 = arith.constant 0 : index
    %0 = vector.load %arg3[%c0, %c0_0, %c0_1, %c0_2] : memref<1x2x128x128xbf16, #tpu.memory_space<vmem>>, vector<1x1x128x128xbf16>
    %1 = vector.shape_cast %0 : vector<1x1x128x128xbf16> to vector<128x128xbf16>
    %c0_3 = arith.constant 0 : index
    %c0_4 = arith.constant 0 : index
    %c0_5 = arith.constant 0 : index
    %c0_6 = arith.constant 0 : index
    %2 = vector.load %arg4[%c0_3, %c0_4, %c0_5, %c0_6] : memref<1x2x128x32xbf16, #tpu.memory_space<vmem>>, vector<1x1x128x32xbf16>
    %3 = vector.shape_cast %2 : vector<1x1x128x32xbf16> to vector<128x32xbf16>
    %c0_7 = arith.constant 0 : index
    %c0_8 = arith.constant 0 : index
    %c0_9 = arith.constant 0 : index
    %c0_10 = arith.constant 0 : index
    %4 = vector.load %arg5[%c0_7, %c0_8, %c0_9, %c0_10] : memref<1x2x1x128xf32, #tpu.memory_space<vmem>>, vector<1x1x1x128xf32>
    %5 = vector.shape_cast %4 : vector<1x1x1x128xf32> to vector<1x128xf32>
    %c0_11 = arith.constant 0 : index
    %c0_12 = arith.constant 0 : index
    %c0_13 = arith.constant 0 : index
    %c0_14 = arith.constant 0 : index
    %6 = vector.load %arg6[%c0_11, %c0_12, %c0_13, %c0_14] : memref<1x2x16x128xf32, #tpu.memory_space<vmem>>, vector<1x1x16x128xf32>
    %7 = vector.shape_cast %6 : vector<1x1x16x128xf32> to vector<16x128xf32>
    %c0_15 = arith.constant 0 : index
    %c0_16 = arith.constant 0 : index
    %c0_17 = arith.constant 0 : index
    %c0_18 = arith.constant 0 : index
    %8 = vector.load %arg7[%c0_15, %c0_16, %c0_17, %c0_18] : memref<1x2x1x128xf32, #tpu.memory_space<vmem>>, vector<1x1x1x128xf32>
    %9 = vector.shape_cast %8 : vector<1x1x1x128xf32> to vector<1x128xf32>
    %cst = arith.constant 0.000000e+00 : f32
    %10 = vector.broadcast %cst : f32 to vector<16x128xf32>
    %c0_i32 = arith.constant 0 : i32
    %c8_i32 = arith.constant 8 : i32
    %11 = arith.addi %c0_i32, %c8_i32 : i32
    %c1_i32 = arith.constant 1 : i32
    %12 = scf.for %arg12 = %c0_i32 to %11 step %c1_i32 iter_args(%arg13 = %10) -> (vector<16x128xf32>)  : i32 {
      %c8_i32_44 = arith.constant 8 : i32
      %26 = arith.muli %arg12, %c8_i32_44 : i32
      %27 = tpu.assume_multiple %26, 8 : i32
      %c0_45 = arith.constant 0 : index
      %c0_46 = arith.constant 0 : index
      %28 = arith.index_cast %27 : i32 to index
      %c0_47 = arith.constant 0 : index
      %29 = vector.load %arg2[%c0_45, %c0_46, %28, %c0_47] : memref<1x1x64x128xbf16, #tpu.memory_space<vmem>>, vector<1x1x8x128xbf16>
      %30 = vector.shape_cast %29 : vector<1x1x8x128xbf16> to vector<8x128xbf16>
      %31 = arith.extf %30 : vector<8x128xbf16> to vector<8x128xf32>
      %cst_48 = arith.constant dense<0.000000e+00> : vector<8x128xf32>
      %32 = tpu.matmul %30, %1, %cst_48 {dimension_numbers = #tpu.dot_dimension_numbers<[1], [0], [0], [1], [0, 0, 1, 1], [], []>} : vector<8x128xbf16>, vector<128x128xbf16>, vector<8x128xf32> -> vector<8x128xf32>
      %33 = vector.broadcast %5 : vector<1x128xf32> to vector<8x128xf32>
      %34 = arith.addf %32, %33 : vector<8x128xf32>
      %cst_49 = arith.constant 0.000000e+00 : f32
      %35 = vector.broadcast %cst_49 : f32 to vector<8x128xf32>
      %36 = arith.maximumf %34, %35 : vector<8x128xf32>
      %37 = math.absf %34 : vector<8x128xf32>
      %cst_50 = arith.constant 0.000000e+00 : f32
      %38 = vector.broadcast %cst_50 : f32 to vector<8x128xf32>
      %39 = arith.subf %38, %37 : vector<8x128xf32>
      %40 = math.exp %39 : vector<8x128xf32>
      %cst_51 = arith.constant 1.000000e+00 : f32
      %41 = vector.broadcast %cst_51 : f32 to vector<8x128xf32>
      %42 = arith.addf %41, %40 : vector<8x128xf32>
      %43 = math.log %42 : vector<8x128xf32>
      %44 = arith.addf %36, %43 : vector<8x128xf32>
      %cst_52 = arith.constant dense<0.000000e+00> : vector<8x32xf32>
      %45 = tpu.matmul %30, %3, %cst_52 {dimension_numbers = #tpu.dot_dimension_numbers<[1], [0], [0], [1], [0, 0, 1, 1], [], []>} : vector<8x128xbf16>, vector<128x32xbf16>, vector<8x32xf32> -> vector<8x32xf32>
      %46 = vector.extract_strided_slice %45 {offsets = [0, 0], sizes = [8, 16], strides = [1, 1]} : vector<8x32xf32> to vector<8x16xf32>
      %47 = vector.extract_strided_slice %45 {offsets = [0, 16], sizes = [8, 16], strides = [1, 1]} : vector<8x32xf32> to vector<8x16xf32>
      %48 = vector.shape_cast %44 : vector<8x128xf32> to vector<8x1x128xf32>
      %49 = vector.shape_cast %7 : vector<16x128xf32> to vector<1x16x128xf32>
      %50 = vector.broadcast %48 : vector<8x1x128xf32> to vector<8x16x128xf32>
      %51 = vector.broadcast %49 : vector<1x16x128xf32> to vector<8x16x128xf32>
      %52 = arith.mulf %50, %51 : vector<8x16x128xf32>
      %53 = math.exp %52 : vector<8x16x128xf32>
      %c0_53 = arith.constant 0 : index
      %c0_54 = arith.constant 0 : index
      %c0_55 = arith.constant 0 : index
      %54 = vector.load %arg9[%c0_53, %c0_54, %c0_55] : memref<8x16x128xf32, #tpu.memory_space<vmem>>, vector<8x16x128xf32>
      tpu.vector_store %arg9[%c0_53, %c0_54, %c0_55], %53 {strides = array<i32>} : memref<8x16x128xf32, #tpu.memory_space<vmem>>, vector<8x16x128xf32>,
      %55 = vector.shape_cast %46 : vector<8x16xf32> to vector<8x16x1xf32>
      %56 = arith.mulf %44, %31 : vector<8x128xf32>
      %57 = vector.shape_cast %56 : vector<8x128xf32> to vector<8x1x128xf32>
      %58 = vector.broadcast %55 : vector<8x16x1xf32> to vector<8x16x128xf32>
      %59 = vector.broadcast %57 : vector<8x1x128xf32> to vector<8x16x128xf32>
      %60 = arith.mulf %58, %59 : vector<8x16x128xf32>
      %c0_56 = arith.constant 0 : index
      %c0_57 = arith.constant 0 : index
      %c0_58 = arith.constant 0 : index
      %61 = vector.load %arg10[%c0_56, %c0_57, %c0_58] : memref<8x16x128xf32, #tpu.memory_space<vmem>>, vector<8x16x128xf32>
      tpu.vector_store %arg10[%c0_56, %c0_57, %c0_58], %60 {strides = array<i32>} : memref<8x16x128xf32, #tpu.memory_space<vmem>>, vector<8x16x128xf32>,
      %c0_59 = arith.constant 0 : index
      %c0_60 = arith.constant 0 : index
      %c0_61 = arith.constant 0 : index
      %62 = vector.load %arg9[%c0_59, %c0_60, %c0_61] : memref<8x16x128xf32, #tpu.memory_space<vmem>>, vector<1x16x128xf32>
      %63 = vector.shape_cast %62 : vector<1x16x128xf32> to vector<16x128xf32>
      %64 = arith.mulf %63, %arg13 : vector<16x128xf32>
      %c0_62 = arith.constant 0 : index
      %c0_63 = arith.constant 0 : index
      %c0_64 = arith.constant 0 : index
      %65 = vector.load %arg10[%c0_62, %c0_63, %c0_64] : memref<8x16x128xf32, #tpu.memory_space<vmem>>, vector<1x16x128xf32>
      %66 = vector.shape_cast %65 : vector<1x16x128xf32> to vector<16x128xf32>
      %67 = arith.addf %64, %66 : vector<16x128xf32>
      %c0_65 = arith.constant 0 : index
      %c0_66 = arith.constant 0 : index
      %c0_67 = arith.constant 0 : index
      %68 = vector.load %arg11[%c0_65, %c0_66, %c0_67] : memref<8x16x128xf32, #tpu.memory_space<vmem>>, vector<1x16x128xf32>
      %69 = vector.shape_cast %68 : vector<1x16x128xf32> to vector<16x128xf32>
      %70 = vector.shape_cast %67 : vector<16x128xf32> to vector<1x16x128xf32>
      tpu.vector_store %arg11[%c0_65, %c0_66, %c0_67], %70 {strides = array<i32>} : memref<8x16x128xf32, #tpu.memory_space<vmem>>, vector<1x16x128xf32>,
      %c1_68 = arith.constant 1 : index
      %c0_69 = arith.constant 0 : index
      %c0_70 = arith.constant 0 : index
      %71 = vector.load %arg9[%c1_68, %c0_69, %c0_70] : memref<8x16x128xf32, #tpu.memory_space<vmem>>, vector<1x16x128xf32>
      %72 = vector.shape_cast %71 : vector<1x16x128xf32> to vector<16x128xf32>
      %73 = arith.mulf %72, %67 : vector<16x128xf32>
      %c1_71 = arith.constant 1 : index
      %c0_72 = arith.constant 0 : index
      %c0_73 = arith.constant 0 : index
      %74 = vector.load %arg10[%c1_71, %c0_72, %c0_73] : memref<8x16x128xf32, #tpu.memory_space<vmem>>, vector<1x16x128xf32>
      %75 = vector.shape_cast %74 : vector<1x16x128xf32> to vector<16x128xf32>
      %76 = arith.addf %73, %75 : vector<16x128xf32>
      %c1_74 = arith.constant 1 : index
      %c0_75 = arith.constant 0 : index
      %c0_76 = arith.constant 0 : index
      %77 = vector.load %arg11[%c1_74, %c0_75, %c0_76] : memref<8x16x128xf32, #tpu.memory_space<vmem>>, vector<1x16x128xf32>
      %78 = vector.shape_cast %77 : vector<1x16x128xf32> to vector<16x128xf32>
      %79 = vector.shape_cast %76 : vector<16x128xf32> to vector<1x16x128xf32>
      tpu.vector_store %arg11[%c1_74, %c0_75, %c0_76], %79 {strides = array<i32>} : memref<8x16x128xf32, #tpu.memory_space<vmem>>, vector<1x16x128xf32>,
      %c2 = arith.constant 2 : index
      %c0_77 = arith.constant 0 : index
      %c0_78 = arith.constant 0 : index
      %80 = vector.load %arg9[%c2, %c0_77, %c0_78] : memref<8x16x128xf32, #tpu.memory_space<vmem>>, vector<1x16x128xf32>
      %81 = vector.shape_cast %80 : vector<1x16x128xf32> to vector<16x128xf32>
      %82 = arith.mulf %81, %76 : vector<16x128xf32>
      %c2_79 = arith.constant 2 : index
      %c0_80 = arith.constant 0 : index
      %c0_81 = arith.constant 0 : index
      %83 = vector.load %arg10[%c2_79, %c0_80, %c0_81] : memref<8x16x128xf32, #tpu.memory_space<vmem>>, vector<1x16x128xf32>
      %84 = vector.shape_cast %83 : vector<1x16x128xf32> to vector<16x128xf32>
      %85 = arith.addf %82, %84 : vector<16x128xf32>
      %c2_82 = arith.constant 2 : index
      %c0_83 = arith.constant 0 : index
      %c0_84 = arith.constant 0 : index
      %86 = vector.load %arg11[%c2_82, %c0_83, %c0_84] : memref<8x16x128xf32, #tpu.memory_space<vmem>>, vector<1x16x128xf32>
      %87 = vector.shape_cast %86 : vector<1x16x128xf32> to vector<16x128xf32>
      %88 = vector.shape_cast %85 : vector<16x128xf32> to vector<1x16x128xf32>
      tpu.vector_store %arg11[%c2_82, %c0_83, %c0_84], %88 {strides = array<i32>} : memref<8x16x128xf32, #tpu.memory_space<vmem>>, vector<1x16x128xf32>,
      %c3 = arith.constant 3 : index
      %c0_85 = arith.constant 0 : index
      %c0_86 = arith.constant 0 : index
      %89 = vector.load %arg9[%c3, %c0_85, %c0_86] : memref<8x16x128xf32, #tpu.memory_space<vmem>>, vector<1x16x128xf32>
      %90 = vector.shape_cast %89 : vector<1x16x128xf32> to vector<16x128xf32>
      %91 = arith.mulf %90, %85 : vector<16x128xf32>
      %c3_87 = arith.constant 3 : index
      %c0_88 = arith.constant 0 : index
      %c0_89 = arith.constant 0 : index
      %92 = vector.load %arg10[%c3_87, %c0_88, %c0_89] : memref<8x16x128xf32, #tpu.memory_space<vmem>>, vector<1x16x128xf32>
      %93 = vector.shape_cast %92 : vector<1x16x128xf32> to vector<16x128xf32>
      %94 = arith.addf %91, %93 : vector<16x128xf32>
      %c3_90 = arith.constant 3 : index
      %c0_91 = arith.constant 0 : index
      %c0_92 = arith.constant 0 : index
      %95 = vector.load %arg11[%c3_90, %c0_91, %c0_92] : memref<8x16x128xf32, #tpu.memory_space<vmem>>, vector<1x16x128xf32>
      %96 = vector.shape_cast %95 : vector<1x16x128xf32> to vector<16x128xf32>
      %97 = vector.shape_cast %94 : vector<16x128xf32> to vector<1x16x128xf32>
      tpu.vector_store %arg11[%c3_90, %c0_91, %c0_92], %97 {strides = array<i32>} : memref<8x16x128xf32, #tpu.memory_space<vmem>>, vector<1x16x128xf32>,
      %c4 = arith.constant 4 : index
      %c0_93 = arith.constant 0 : index
      %c0_94 = arith.constant 0 : index
      %98 = vector.load %arg9[%c4, %c0_93, %c0_94] : memref<8x16x128xf32, #tpu.memory_space<vmem>>, vector<1x16x128xf32>
      %99 = vector.shape_cast %98 : vector<1x16x128xf32> to vector<16x128xf32>
      %100 = arith.mulf %99, %94 : vector<16x128xf32>
      %c4_95 = arith.constant 4 : index
      %c0_96 = arith.constant 0 : index
      %c0_97 = arith.constant 0 : index
      %101 = vector.load %arg10[%c4_95, %c0_96, %c0_97] : memref<8x16x128xf32, #tpu.memory_space<vmem>>, vector<1x16x128xf32>
      %102 = vector.shape_cast %101 : vector<1x16x128xf32> to vector<16x128xf32>
      %103 = arith.addf %100, %102 : vector<16x128xf32>
      %c4_98 = arith.constant 4 : index
      %c0_99 = arith.constant 0 : index
      %c0_100 = arith.constant 0 : index
      %104 = vector.load %arg11[%c4_98, %c0_99, %c0_100] : memref<8x16x128xf32, #tpu.memory_space<vmem>>, vector<1x16x128xf32>
      %105 = vector.shape_cast %104 : vector<1x16x128xf32> to vector<16x128xf32>
      %106 = vector.shape_cast %103 : vector<16x128xf32> to vector<1x16x128xf32>
      tpu.vector_store %arg11[%c4_98, %c0_99, %c0_100], %106 {strides = array<i32>} : memref<8x16x128xf32, #tpu.memory_space<vmem>>, vector<1x16x128xf32>,
      %c5 = arith.constant 5 : index
      %c0_101 = arith.constant 0 : index
      %c0_102 = arith.constant 0 : index
      %107 = vector.load %arg9[%c5, %c0_101, %c0_102] : memref<8x16x128xf32, #tpu.memory_space<vmem>>, vector<1x16x128xf32>
      %108 = vector.shape_cast %107 : vector<1x16x128xf32> to vector<16x128xf32>
      %109 = arith.mulf %108, %103 : vector<16x128xf32>
      %c5_103 = arith.constant 5 : index
      %c0_104 = arith.constant 0 : index
      %c0_105 = arith.constant 0 : index
      %110 = vector.load %arg10[%c5_103, %c0_104, %c0_105] : memref<8x16x128xf32, #tpu.memory_space<vmem>>, vector<1x16x128xf32>
      %111 = vector.shape_cast %110 : vector<1x16x128xf32> to vector<16x128xf32>
      %112 = arith.addf %109, %111 : vector<16x128xf32>
      %c5_106 = arith.constant 5 : index
      %c0_107 = arith.constant 0 : index
      %c0_108 = arith.constant 0 : index
      %113 = vector.load %arg11[%c5_106, %c0_107, %c0_108] : memref<8x16x128xf32, #tpu.memory_space<vmem>>, vector<1x16x128xf32>
      %114 = vector.shape_cast %113 : vector<1x16x128xf32> to vector<16x128xf32>
      %115 = vector.shape_cast %112 : vector<16x128xf32> to vector<1x16x128xf32>
      tpu.vector_store %arg11[%c5_106, %c0_107, %c0_108], %115 {strides = array<i32>} : memref<8x16x128xf32, #tpu.memory_space<vmem>>, vector<1x16x128xf32>,
      %c6 = arith.constant 6 : index
      %c0_109 = arith.constant 0 : index
      %c0_110 = arith.constant 0 : index
      %116 = vector.load %arg9[%c6, %c0_109, %c0_110] : memref<8x16x128xf32, #tpu.memory_space<vmem>>, vector<1x16x128xf32>
      %117 = vector.shape_cast %116 : vector<1x16x128xf32> to vector<16x128xf32>
      %118 = arith.mulf %117, %112 : vector<16x128xf32>
      %c6_111 = arith.constant 6 : index
      %c0_112 = arith.constant 0 : index
      %c0_113 = arith.constant 0 : index
      %119 = vector.load %arg10[%c6_111, %c0_112, %c0_113] : memref<8x16x128xf32, #tpu.memory_space<vmem>>, vector<1x16x128xf32>
      %120 = vector.shape_cast %119 : vector<1x16x128xf32> to vector<16x128xf32>
      %121 = arith.addf %118, %120 : vector<16x128xf32>
      %c6_114 = arith.constant 6 : index
      %c0_115 = arith.constant 0 : index
      %c0_116 = arith.constant 0 : index
      %122 = vector.load %arg11[%c6_114, %c0_115, %c0_116] : memref<8x16x128xf32, #tpu.memory_space<vmem>>, vector<1x16x128xf32>
      %123 = vector.shape_cast %122 : vector<1x16x128xf32> to vector<16x128xf32>
      %124 = vector.shape_cast %121 : vector<16x128xf32> to vector<1x16x128xf32>
      tpu.vector_store %arg11[%c6_114, %c0_115, %c0_116], %124 {strides = array<i32>} : memref<8x16x128xf32, #tpu.memory_space<vmem>>, vector<1x16x128xf32>,
      %c7 = arith.constant 7 : index
      %c0_117 = arith.constant 0 : index
      %c0_118 = arith.constant 0 : index
      %125 = vector.load %arg9[%c7, %c0_117, %c0_118] : memref<8x16x128xf32, #tpu.memory_space<vmem>>, vector<1x16x128xf32>
      %126 = vector.shape_cast %125 : vector<1x16x128xf32> to vector<16x128xf32>
      %127 = arith.mulf %126, %121 : vector<16x128xf32>
      %c7_119 = arith.constant 7 : index
      %c0_120 = arith.constant 0 : index
      %c0_121 = arith.constant 0 : index
      %128 = vector.load %arg10[%c7_119, %c0_120, %c0_121] : memref<8x16x128xf32, #tpu.memory_space<vmem>>, vector<1x16x128xf32>
      %129 = vector.shape_cast %128 : vector<1x16x128xf32> to vector<16x128xf32>
      %130 = arith.addf %127, %129 : vector<16x128xf32>
      %c7_122 = arith.constant 7 : index
      %c0_123 = arith.constant 0 : index
      %c0_124 = arith.constant 0 : index
      %131 = vector.load %arg11[%c7_122, %c0_123, %c0_124] : memref<8x16x128xf32, #tpu.memory_space<vmem>>, vector<1x16x128xf32>
      %132 = vector.shape_cast %131 : vector<1x16x128xf32> to vector<16x128xf32>
      %133 = vector.shape_cast %130 : vector<16x128xf32> to vector<1x16x128xf32>
      tpu.vector_store %arg11[%c7_122, %c0_123, %c0_124], %133 {strides = array<i32>} : memref<8x16x128xf32, #tpu.memory_space<vmem>>, vector<1x16x128xf32>,
      %134 = vector.shape_cast %47 : vector<8x16xf32> to vector<8x16x1xf32>
      %c0_125 = arith.constant 0 : index
      %c0_126 = arith.constant 0 : index
      %c0_127 = arith.constant 0 : index
      %135 = vector.load %arg11[%c0_125, %c0_126, %c0_127] : memref<8x16x128xf32, #tpu.memory_space<vmem>>, vector<8x16x128xf32>
      %136 = vector.broadcast %134 : vector<8x16x1xf32> to vector<8x16x128xf32>
      %137 = arith.mulf %136, %135 : vector<8x16x128xf32>
      %cst_128 = arith.constant dense<0.000000e+00> : vector<8x128xf32>
      %138 = vector.multi_reduction <add>, %137, %cst_128 [1] : vector<8x16x128xf32> to vector<8x128xf32>
      %139 = vector.broadcast %9 : vector<1x128xf32> to vector<8x128xf32>
      %140 = arith.mulf %139, %31 : vector<8x128xf32>
      %141 = arith.addf %138, %140 : vector<8x128xf32>
      %c0_129 = arith.constant 0 : index
      %c0_130 = arith.constant 0 : index
      %142 = arith.index_cast %27 : i32 to index
      %c0_131 = arith.constant 0 : index
      %143 = vector.load %arg8[%c0_129, %c0_130, %142, %c0_131] : memref<1x1x64x128xf32, #tpu.memory_space<vmem>>, vector<1x1x8x128xf32>
      %144 = vector.shape_cast %143 : vector<1x1x8x128xf32> to vector<8x128xf32>
      %145 = vector.shape_cast %141 : vector<8x128xf32> to vector<1x1x8x128xf32>
      tpu.vector_store %arg8[%c0_129, %c0_130, %142, %c0_131], %145 {strides = array<i32>} : memref<1x1x64x128xf32, #tpu.memory_space<vmem>>, vector<1x1x8x128xf32>,
      scf.yield %130 : vector<16x128xf32>
    }
    %c8_i32_19 = arith.constant 8 : i32
    %c0_20 = arith.constant 0 : index
    %c1 = arith.constant 1 : index
    %c0_21 = arith.constant 0 : index
    %c0_22 = arith.constant 0 : index
    %13 = vector.load %arg3[%c0_20, %c1, %c0_21, %c0_22] : memref<1x2x128x128xbf16, #tpu.memory_space<vmem>>, vector<1x1x128x128xbf16>
    %14 = vector.shape_cast %13 : vector<1x1x128x128xbf16> to vector<128x128xbf16>
    %c0_23 = arith.constant 0 : index
    %c1_24 = arith.constant 1 : index
    %c0_25 = arith.constant 0 : index
    %c0_26 = arith.constant 0 : index
    %15 = vector.load %arg4[%c0_23, %c1_24, %c0_25, %c0_26] : memref<1x2x128x32xbf16, #tpu.memory_space<vmem>>, vector<1x1x128x32xbf16>
    %16 = vector.shape_cast %15 : vector<1x1x128x32xbf16> to vector<128x32xbf16>
    %c0_27 = arith.constant 0 : index
    %c1_28 = arith.constant 1 : index
    %c0_29 = arith.constant 0 : index
    %c0_30 = arith.constant 0 : index
    %17 = vector.load %arg5[%c0_27, %c1_28, %c0_29, %c0_30] : memref<1x2x1x128xf32, #tpu.memory_space<vmem>>, vector<1x1x1x128xf32>
    %18 = vector.shape_cast %17 : vector<1x1x1x128xf32> to vector<1x128xf32>
    %c0_31 = arith.constant 0 : index
    %c1_32 = arith.constant 1 : index
    %c0_33 = arith.constant 0 : index
    %c0_34 = arith.constant 0 : index
    %19 = vector.load %arg6[%c0_31, %c1_32, %c0_33, %c0_34] : memref<1x2x16x128xf32, #tpu.memory_space<vmem>>, vector<1x1x16x128xf32>
    %20 = vector.shape_cast %19 : vector<1x1x16x128xf32> to vector<16x128xf32>
    %c0_35 = arith.constant 0 : index
    %c1_36 = arith.constant 1 : index
    %c0_37 = arith.constant 0 : index
    %c0_38 = arith.constant 0 : index
    %21 = vector.load %arg7[%c0_35, %c1_36, %c0_37, %c0_38] : memref<1x2x1x128xf32, #tpu.memory_space<vmem>>, vector<1x1x1x128xf32>
    %22 = vector.shape_cast %21 : vector<1x1x1x128xf32> to vector<1x128xf32>
    %cst_39 = arith.constant 0.000000e+00 : f32
    %23 = vector.broadcast %cst_39 : f32 to vector<16x128xf32>
    %c0_i32_40 = arith.constant 0 : i32
    %c8_i32_41 = arith.constant 8 : i32
    %24 = arith.addi %c0_i32_40, %c8_i32_41 : i32
    %c1_i32_42 = arith.constant 1 : i32
    %25 = scf.for %arg12 = %c0_i32_40 to %24 step %c1_i32_42 iter_args(%arg13 = %23) -> (vector<16x128xf32>)  : i32 {
      %c7_i32 = arith.constant 7 : i32
      %26 = arith.subi %c7_i32, %arg12 : i32
      %c8_i32_44 = arith.constant 8 : i32
      %27 = arith.muli %26, %c8_i32_44 : i32
      %28 = tpu.assume_multiple %27, 8 : i32
      %c0_45 = arith.constant 0 : index
      %c0_46 = arith.constant 0 : index
      %29 = arith.index_cast %28 : i32 to index
      %c0_47 = arith.constant 0 : index
      %30 = vector.load %arg2[%c0_45, %c0_46, %29, %c0_47] : memref<1x1x64x128xbf16, #tpu.memory_space<vmem>>, vector<1x1x8x128xbf16>
      %31 = vector.shape_cast %30 : vector<1x1x8x128xbf16> to vector<8x128xbf16>
      %32 = arith.extf %31 : vector<8x128xbf16> to vector<8x128xf32>
      %cst_48 = arith.constant dense<0.000000e+00> : vector<8x128xf32>
      %33 = tpu.matmul %31, %14, %cst_48 {dimension_numbers = #tpu.dot_dimension_numbers<[1], [0], [0], [1], [0, 0, 1, 1], [], []>} : vector<8x128xbf16>, vector<128x128xbf16>, vector<8x128xf32> -> vector<8x128xf32>
      %34 = vector.broadcast %18 : vector<1x128xf32> to vector<8x128xf32>
      %35 = arith.addf %33, %34 : vector<8x128xf32>
      %cst_49 = arith.constant 0.000000e+00 : f32
      %36 = vector.broadcast %cst_49 : f32 to vector<8x128xf32>
      %37 = arith.maximumf %35, %36 : vector<8x128xf32>
      %38 = math.absf %35 : vector<8x128xf32>
      %cst_50 = arith.constant 0.000000e+00 : f32
      %39 = vector.broadcast %cst_50 : f32 to vector<8x128xf32>
      %40 = arith.subf %39, %38 : vector<8x128xf32>
      %41 = math.exp %40 : vector<8x128xf32>
      %cst_51 = arith.constant 1.000000e+00 : f32
      %42 = vector.broadcast %cst_51 : f32 to vector<8x128xf32>
      %43 = arith.addf %42, %41 : vector<8x128xf32>
      %44 = math.log %43 : vector<8x128xf32>
      %45 = arith.addf %37, %44 : vector<8x128xf32>
      %cst_52 = arith.constant dense<0.000000e+00> : vector<8x32xf32>
      %46 = tpu.matmul %31, %16, %cst_52 {dimension_numbers = #tpu.dot_dimension_numbers<[1], [0], [0], [1], [0, 0, 1, 1], [], []>} : vector<8x128xbf16>, vector<128x32xbf16>, vector<8x32xf32> -> vector<8x32xf32>
      %47 = vector.extract_strided_slice %46 {offsets = [0, 0], sizes = [8, 16], strides = [1, 1]} : vector<8x32xf32> to vector<8x16xf32>
      %48 = vector.extract_strided_slice %46 {offsets = [0, 16], sizes = [8, 16], strides = [1, 1]} : vector<8x32xf32> to vector<8x16xf32>
      %49 = vector.shape_cast %45 : vector<8x128xf32> to vector<8x1x128xf32>
      %50 = vector.shape_cast %20 : vector<16x128xf32> to vector<1x16x128xf32>
      %51 = vector.broadcast %49 : vector<8x1x128xf32> to vector<8x16x128xf32>
      %52 = vector.broadcast %50 : vector<1x16x128xf32> to vector<8x16x128xf32>
      %53 = arith.mulf %51, %52 : vector<8x16x128xf32>
      %54 = math.exp %53 : vector<8x16x128xf32>
      %c0_53 = arith.constant 0 : index
      %c0_54 = arith.constant 0 : index
      %c0_55 = arith.constant 0 : index
      %55 = vector.load %arg9[%c0_53, %c0_54, %c0_55] : memref<8x16x128xf32, #tpu.memory_space<vmem>>, vector<8x16x128xf32>
      tpu.vector_store %arg9[%c0_53, %c0_54, %c0_55], %54 {strides = array<i32>} : memref<8x16x128xf32, #tpu.memory_space<vmem>>, vector<8x16x128xf32>,
      %56 = vector.shape_cast %47 : vector<8x16xf32> to vector<8x16x1xf32>
      %57 = arith.mulf %45, %32 : vector<8x128xf32>
      %58 = vector.shape_cast %57 : vector<8x128xf32> to vector<8x1x128xf32>
      %59 = vector.broadcast %56 : vector<8x16x1xf32> to vector<8x16x128xf32>
      %60 = vector.broadcast %58 : vector<8x1x128xf32> to vector<8x16x128xf32>
      %61 = arith.mulf %59, %60 : vector<8x16x128xf32>
      %c0_56 = arith.constant 0 : index
      %c0_57 = arith.constant 0 : index
      %c0_58 = arith.constant 0 : index
      %62 = vector.load %arg10[%c0_56, %c0_57, %c0_58] : memref<8x16x128xf32, #tpu.memory_space<vmem>>, vector<8x16x128xf32>
      tpu.vector_store %arg10[%c0_56, %c0_57, %c0_58], %61 {strides = array<i32>} : memref<8x16x128xf32, #tpu.memory_space<vmem>>, vector<8x16x128xf32>,
      %c7 = arith.constant 7 : index
      %c0_59 = arith.constant 0 : index
      %c0_60 = arith.constant 0 : index
      %63 = vector.load %arg9[%c7, %c0_59, %c0_60] : memref<8x16x128xf32, #tpu.memory_space<vmem>>, vector<1x16x128xf32>
      %64 = vector.shape_cast %63 : vector<1x16x128xf32> to vector<16x128xf32>
      %65 = arith.mulf %64, %arg13 : vector<16x128xf32>
      %c7_61 = arith.constant 7 : index
      %c0_62 = arith.constant 0 : index
      %c0_63 = arith.constant 0 : index
      %66 = vector.load %arg10[%c7_61, %c0_62, %c0_63] : memref<8x16x128xf32, #tpu.memory_space<vmem>>, vector<1x16x128xf32>
      %67 = vector.shape_cast %66 : vector<1x16x128xf32> to vector<16x128xf32>
      %68 = arith.addf %65, %67 : vector<16x128xf32>
      %c7_64 = arith.constant 7 : index
      %c0_65 = arith.constant 0 : index
      %c0_66 = arith.constant 0 : index
      %69 = vector.load %arg11[%c7_64, %c0_65, %c0_66] : memref<8x16x128xf32, #tpu.memory_space<vmem>>, vector<1x16x128xf32>
      %70 = vector.shape_cast %69 : vector<1x16x128xf32> to vector<16x128xf32>
      %71 = vector.shape_cast %68 : vector<16x128xf32> to vector<1x16x128xf32>
      tpu.vector_store %arg11[%c7_64, %c0_65, %c0_66], %71 {strides = array<i32>} : memref<8x16x128xf32, #tpu.memory_space<vmem>>, vector<1x16x128xf32>,
      %c6 = arith.constant 6 : index
      %c0_67 = arith.constant 0 : index
      %c0_68 = arith.constant 0 : index
      %72 = vector.load %arg9[%c6, %c0_67, %c0_68] : memref<8x16x128xf32, #tpu.memory_space<vmem>>, vector<1x16x128xf32>
      %73 = vector.shape_cast %72 : vector<1x16x128xf32> to vector<16x128xf32>
      %74 = arith.mulf %73, %68 : vector<16x128xf32>
      %c6_69 = arith.constant 6 : index
      %c0_70 = arith.constant 0 : index
      %c0_71 = arith.constant 0 : index
      %75 = vector.load %arg10[%c6_69, %c0_70, %c0_71] : memref<8x16x128xf32, #tpu.memory_space<vmem>>, vector<1x16x128xf32>
      %76 = vector.shape_cast %75 : vector<1x16x128xf32> to vector<16x128xf32>
      %77 = arith.addf %74, %76 : vector<16x128xf32>
      %c6_72 = arith.constant 6 : index
      %c0_73 = arith.constant 0 : index
      %c0_74 = arith.constant 0 : index
      %78 = vector.load %arg11[%c6_72, %c0_73, %c0_74] : memref<8x16x128xf32, #tpu.memory_space<vmem>>, vector<1x16x128xf32>
      %79 = vector.shape_cast %78 : vector<1x16x128xf32> to vector<16x128xf32>
      %80 = vector.shape_cast %77 : vector<16x128xf32> to vector<1x16x128xf32>
      tpu.vector_store %arg11[%c6_72, %c0_73, %c0_74], %80 {strides = array<i32>} : memref<8x16x128xf32, #tpu.memory_space<vmem>>, vector<1x16x128xf32>,
      %c5 = arith.constant 5 : index
      %c0_75 = arith.constant 0 : index
      %c0_76 = arith.constant 0 : index
      %81 = vector.load %arg9[%c5, %c0_75, %c0_76] : memref<8x16x128xf32, #tpu.memory_space<vmem>>, vector<1x16x128xf32>
      %82 = vector.shape_cast %81 : vector<1x16x128xf32> to vector<16x128xf32>
      %83 = arith.mulf %82, %77 : vector<16x128xf32>
      %c5_77 = arith.constant 5 : index
      %c0_78 = arith.constant 0 : index
      %c0_79 = arith.constant 0 : index
      %84 = vector.load %arg10[%c5_77, %c0_78, %c0_79] : memref<8x16x128xf32, #tpu.memory_space<vmem>>, vector<1x16x128xf32>
      %85 = vector.shape_cast %84 : vector<1x16x128xf32> to vector<16x128xf32>
      %86 = arith.addf %83, %85 : vector<16x128xf32>
      %c5_80 = arith.constant 5 : index
      %c0_81 = arith.constant 0 : index
      %c0_82 = arith.constant 0 : index
      %87 = vector.load %arg11[%c5_80, %c0_81, %c0_82] : memref<8x16x128xf32, #tpu.memory_space<vmem>>, vector<1x16x128xf32>
      %88 = vector.shape_cast %87 : vector<1x16x128xf32> to vector<16x128xf32>
      %89 = vector.shape_cast %86 : vector<16x128xf32> to vector<1x16x128xf32>
      tpu.vector_store %arg11[%c5_80, %c0_81, %c0_82], %89 {strides = array<i32>} : memref<8x16x128xf32, #tpu.memory_space<vmem>>, vector<1x16x128xf32>,
      %c4 = arith.constant 4 : index
      %c0_83 = arith.constant 0 : index
      %c0_84 = arith.constant 0 : index
      %90 = vector.load %arg9[%c4, %c0_83, %c0_84] : memref<8x16x128xf32, #tpu.memory_space<vmem>>, vector<1x16x128xf32>
      %91 = vector.shape_cast %90 : vector<1x16x128xf32> to vector<16x128xf32>
      %92 = arith.mulf %91, %86 : vector<16x128xf32>
      %c4_85 = arith.constant 4 : index
      %c0_86 = arith.constant 0 : index
      %c0_87 = arith.constant 0 : index
      %93 = vector.load %arg10[%c4_85, %c0_86, %c0_87] : memref<8x16x128xf32, #tpu.memory_space<vmem>>, vector<1x16x128xf32>
      %94 = vector.shape_cast %93 : vector<1x16x128xf32> to vector<16x128xf32>
      %95 = arith.addf %92, %94 : vector<16x128xf32>
      %c4_88 = arith.constant 4 : index
      %c0_89 = arith.constant 0 : index
      %c0_90 = arith.constant 0 : index
      %96 = vector.load %arg11[%c4_88, %c0_89, %c0_90] : memref<8x16x128xf32, #tpu.memory_space<vmem>>, vector<1x16x128xf32>
      %97 = vector.shape_cast %96 : vector<1x16x128xf32> to vector<16x128xf32>
      %98 = vector.shape_cast %95 : vector<16x128xf32> to vector<1x16x128xf32>
      tpu.vector_store %arg11[%c4_88, %c0_89, %c0_90], %98 {strides = array<i32>} : memref<8x16x128xf32, #tpu.memory_space<vmem>>, vector<1x16x128xf32>,
      %c3 = arith.constant 3 : index
      %c0_91 = arith.constant 0 : index
      %c0_92 = arith.constant 0 : index
      %99 = vector.load %arg9[%c3, %c0_91, %c0_92] : memref<8x16x128xf32, #tpu.memory_space<vmem>>, vector<1x16x128xf32>
      %100 = vector.shape_cast %99 : vector<1x16x128xf32> to vector<16x128xf32>
      %101 = arith.mulf %100, %95 : vector<16x128xf32>
      %c3_93 = arith.constant 3 : index
      %c0_94 = arith.constant 0 : index
      %c0_95 = arith.constant 0 : index
      %102 = vector.load %arg10[%c3_93, %c0_94, %c0_95] : memref<8x16x128xf32, #tpu.memory_space<vmem>>, vector<1x16x128xf32>
      %103 = vector.shape_cast %102 : vector<1x16x128xf32> to vector<16x128xf32>
      %104 = arith.addf %101, %103 : vector<16x128xf32>
      %c3_96 = arith.constant 3 : index
      %c0_97 = arith.constant 0 : index
      %c0_98 = arith.constant 0 : index
      %105 = vector.load %arg11[%c3_96, %c0_97, %c0_98] : memref<8x16x128xf32, #tpu.memory_space<vmem>>, vector<1x16x128xf32>
      %106 = vector.shape_cast %105 : vector<1x16x128xf32> to vector<16x128xf32>
      %107 = vector.shape_cast %104 : vector<16x128xf32> to vector<1x16x128xf32>
      tpu.vector_store %arg11[%c3_96, %c0_97, %c0_98], %107 {strides = array<i32>} : memref<8x16x128xf32, #tpu.memory_space<vmem>>, vector<1x16x128xf32>,
      %c2 = arith.constant 2 : index
      %c0_99 = arith.constant 0 : index
      %c0_100 = arith.constant 0 : index
      %108 = vector.load %arg9[%c2, %c0_99, %c0_100] : memref<8x16x128xf32, #tpu.memory_space<vmem>>, vector<1x16x128xf32>
      %109 = vector.shape_cast %108 : vector<1x16x128xf32> to vector<16x128xf32>
      %110 = arith.mulf %109, %104 : vector<16x128xf32>
      %c2_101 = arith.constant 2 : index
      %c0_102 = arith.constant 0 : index
      %c0_103 = arith.constant 0 : index
      %111 = vector.load %arg10[%c2_101, %c0_102, %c0_103] : memref<8x16x128xf32, #tpu.memory_space<vmem>>, vector<1x16x128xf32>
      %112 = vector.shape_cast %111 : vector<1x16x128xf32> to vector<16x128xf32>
      %113 = arith.addf %110, %112 : vector<16x128xf32>
      %c2_104 = arith.constant 2 : index
      %c0_105 = arith.constant 0 : index
      %c0_106 = arith.constant 0 : index
      %114 = vector.load %arg11[%c2_104, %c0_105, %c0_106] : memref<8x16x128xf32, #tpu.memory_space<vmem>>, vector<1x16x128xf32>
      %115 = vector.shape_cast %114 : vector<1x16x128xf32> to vector<16x128xf32>
      %116 = vector.shape_cast %113 : vector<16x128xf32> to vector<1x16x128xf32>
      tpu.vector_store %arg11[%c2_104, %c0_105, %c0_106], %116 {strides = array<i32>} : memref<8x16x128xf32, #tpu.memory_space<vmem>>, vector<1x16x128xf32>,
      %c1_107 = arith.constant 1 : index
      %c0_108 = arith.constant 0 : index
      %c0_109 = arith.constant 0 : index
      %117 = vector.load %arg9[%c1_107, %c0_108, %c0_109] : memref<8x16x128xf32, #tpu.memory_space<vmem>>, vector<1x16x128xf32>
      %118 = vector.shape_cast %117 : vector<1x16x128xf32> to vector<16x128xf32>
      %119 = arith.mulf %118, %113 : vector<16x128xf32>
      %c1_110 = arith.constant 1 : index
      %c0_111 = arith.constant 0 : index
      %c0_112 = arith.constant 0 : index
      %120 = vector.load %arg10[%c1_110, %c0_111, %c0_112] : memref<8x16x128xf32, #tpu.memory_space<vmem>>, vector<1x16x128xf32>
      %121 = vector.shape_cast %120 : vector<1x16x128xf32> to vector<16x128xf32>
      %122 = arith.addf %119, %121 : vector<16x128xf32>
      %c1_113 = arith.constant 1 : index
      %c0_114 = arith.constant 0 : index
      %c0_115 = arith.constant 0 : index
      %123 = vector.load %arg11[%c1_113, %c0_114, %c0_115] : memref<8x16x128xf32, #tpu.memory_space<vmem>>, vector<1x16x128xf32>
      %124 = vector.shape_cast %123 : vector<1x16x128xf32> to vector<16x128xf32>
      %125 = vector.shape_cast %122 : vector<16x128xf32> to vector<1x16x128xf32>
      tpu.vector_store %arg11[%c1_113, %c0_114, %c0_115], %125 {strides = array<i32>} : memref<8x16x128xf32, #tpu.memory_space<vmem>>, vector<1x16x128xf32>,
      %c0_116 = arith.constant 0 : index
      %c0_117 = arith.constant 0 : index
      %c0_118 = arith.constant 0 : index
      %126 = vector.load %arg9[%c0_116, %c0_117, %c0_118] : memref<8x16x128xf32, #tpu.memory_space<vmem>>, vector<1x16x128xf32>
      %127 = vector.shape_cast %126 : vector<1x16x128xf32> to vector<16x128xf32>
      %128 = arith.mulf %127, %122 : vector<16x128xf32>
      %c0_119 = arith.constant 0 : index
      %c0_120 = arith.constant 0 : index
      %c0_121 = arith.constant 0 : index
      %129 = vector.load %arg10[%c0_119, %c0_120, %c0_121] : memref<8x16x128xf32, #tpu.memory_space<vmem>>, vector<1x16x128xf32>
      %130 = vector.shape_cast %129 : vector<1x16x128xf32> to vector<16x128xf32>
      %131 = arith.addf %128, %130 : vector<16x128xf32>
      %c0_122 = arith.constant 0 : index
      %c0_123 = arith.constant 0 : index
      %c0_124 = arith.constant 0 : index
      %132 = vector.load %arg11[%c0_122, %c0_123, %c0_124] : memref<8x16x128xf32, #tpu.memory_space<vmem>>, vector<1x16x128xf32>
      %133 = vector.shape_cast %132 : vector<1x16x128xf32> to vector<16x128xf32>
      %134 = vector.shape_cast %131 : vector<16x128xf32> to vector<1x16x128xf32>
      tpu.vector_store %arg11[%c0_122, %c0_123, %c0_124], %134 {strides = array<i32>} : memref<8x16x128xf32, #tpu.memory_space<vmem>>, vector<1x16x128xf32>,
      %135 = vector.shape_cast %48 : vector<8x16xf32> to vector<8x16x1xf32>
      %c0_125 = arith.constant 0 : index
      %c0_126 = arith.constant 0 : index
      %c0_127 = arith.constant 0 : index
      %136 = vector.load %arg11[%c0_125, %c0_126, %c0_127] : memref<8x16x128xf32, #tpu.memory_space<vmem>>, vector<8x16x128xf32>
      %137 = vector.broadcast %135 : vector<8x16x1xf32> to vector<8x16x128xf32>
      %138 = arith.mulf %137, %136 : vector<8x16x128xf32>
      %cst_128 = arith.constant dense<0.000000e+00> : vector<8x128xf32>
      %139 = vector.multi_reduction <add>, %138, %cst_128 [1] : vector<8x16x128xf32> to vector<8x128xf32>
      %140 = vector.broadcast %22 : vector<1x128xf32> to vector<8x128xf32>
      %141 = arith.mulf %140, %32 : vector<8x128xf32>
      %142 = arith.addf %139, %141 : vector<8x128xf32>
      %c0_129 = arith.constant 0 : index
      %c0_130 = arith.constant 0 : index
      %143 = arith.index_cast %28 : i32 to index
      %c0_131 = arith.constant 0 : index
      %144 = vector.load %arg8[%c0_129, %c0_130, %143, %c0_131] : memref<1x1x64x128xf32, #tpu.memory_space<vmem>>, vector<1x1x8x128xf32>
      %145 = vector.shape_cast %144 : vector<1x1x8x128xf32> to vector<8x128xf32>
      %146 = arith.addf %145, %142 : vector<8x128xf32>
      %c0_132 = arith.constant 0 : index
      %c0_133 = arith.constant 0 : index
      %147 = arith.index_cast %28 : i32 to index
      %c0_134 = arith.constant 0 : index
      %148 = vector.load %arg8[%c0_132, %c0_133, %147, %c0_134] : memref<1x1x64x128xf32, #tpu.memory_space<vmem>>, vector<1x1x8x128xf32>
      %149 = vector.shape_cast %148 : vector<1x1x8x128xf32> to vector<8x128xf32>
      %150 = vector.shape_cast %146 : vector<8x128xf32> to vector<1x1x8x128xf32>
      tpu.vector_store %arg8[%c0_132, %c0_133, %147, %c0_134], %150 {strides = array<i32>} : memref<1x1x64x128xf32, #tpu.memory_space<vmem>>, vector<1x1x8x128xf32>,
      scf.yield %131 : vector<16x128xf32>
    }
    %c8_i32_43 = arith.constant 8 : i32
    return
  }
  func.func @transform_0(%arg0: i32, %arg1: i32) -> (i32, i32, i32, i32) {
    %c0_i32 = arith.constant 0 : i32
    %c0_i32_0 = arith.constant 0 : i32
    %c0_i32_1 = arith.constant 0 : i32
    return %arg1, %arg0, %c0_i32, %c0_i32_0 : i32, i32, i32, i32
  }
  func.func @transform_1(%arg0: i32, %arg1: i32) -> (i32, i32, i32, i32) {
    %c0_i32 = arith.constant 0 : i32
    %c0_i32_0 = arith.constant 0 : i32
    %c0_i32_1 = arith.constant 0 : i32
    %c0_i32_2 = arith.constant 0 : i32
    return %arg1, %c0_i32, %c0_i32_0, %c0_i32_1 : i32, i32, i32, i32
  }
  func.func @transform_2(%arg0: i32, %arg1: i32) -> (i32, i32, i32, i32) {
    %c0_i32 = arith.constant 0 : i32
    %c0_i32_0 = arith.constant 0 : i32
    %c0_i32_1 = arith.constant 0 : i32
    %c0_i32_2 = arith.constant 0 : i32
    return %arg1, %c0_i32, %c0_i32_0, %c0_i32_1 : i32, i32, i32, i32
  }
  func.func @transform_3(%arg0: i32, %arg1: i32) -> (i32, i32, i32, i32) {
    %c0_i32 = arith.constant 0 : i32
    %c0_i32_0 = arith.constant 0 : i32
    %c0_i32_1 = arith.constant 0 : i32
    %c0_i32_2 = arith.constant 0 : i32
    return %arg1, %c0_i32, %c0_i32_0, %c0_i32_1 : i32, i32, i32, i32
  }
  func.func @transform_4(%arg0: i32, %arg1: i32) -> (i32, i32, i32, i32) {
    %c0_i32 = arith.constant 0 : i32
    %c0_i32_0 = arith.constant 0 : i32
    %c0_i32_1 = arith.constant 0 : i32
    %c0_i32_2 = arith.constant 0 : i32
    return %arg1, %c0_i32, %c0_i32_0, %c0_i32_1 : i32, i32, i32, i32
  }
  func.func @transform_5(%arg0: i32, %arg1: i32) -> (i32, i32, i32, i32) {
    %c0_i32 = arith.constant 0 : i32
    %c0_i32_0 = arith.constant 0 : i32
    %c0_i32_1 = arith.constant 0 : i32
    %c0_i32_2 = arith.constant 0 : i32
    return %arg1, %c0_i32, %c0_i32_0, %c0_i32_1 : i32, i32, i32, i32
  }
  func.func @transform_6(%arg0: i32, %arg1: i32) -> (i32, i32, i32, i32) {
    %c0_i32 = arith.constant 0 : i32
    %c0_i32_0 = arith.constant 0 : i32
    %c0_i32_1 = arith.constant 0 : i32
    return %arg0, %arg1, %c0_i32, %c0_i32_0 : i32, i32, i32, i32
  }
}

module attributes {stable_mosaic.version = 11 : i64} {
  func.func @_final_kernel(%arg0: i32, %arg1: memref<128x128xf32, #tpu.memory_space<vmem>>, %arg2: memref<128x128xf32, #tpu.memory_space<vmem>>, %arg3: memref<128x64xbf16, #tpu.memory_space<vmem>>, %arg4: memref<128x64xf32, #tpu.memory_space<vmem>>, %arg5: memref<1x128xf32, #tpu.memory_space<vmem>>, %arg6: memref<1x128xf32, #tpu.memory_space<vmem>>, %arg7: memref<64x128xbf16, #tpu.memory_space<vmem>>, %arg8: memref<128x64xbf16, #tpu.memory_space<vmem>>, %arg9: memref<128x64xf32, #tpu.memory_space<vmem>>) attributes {dimension_semantics = [#tpu.dimension_semantics<parallel>], iteration_bounds = array<i64: 1>, scalar_prefetch = 0 : i64, scratch_operands = 0 : i64, tpu.core_type = #tpu.core_type<tc>, window_params = [{transform_indices = @transform_0, window_bounds = array<i64: 128, 128>}, {transform_indices = @transform_1, window_bounds = array<i64: 128, 128>}, {transform_indices = @transform_2, window_bounds = array<i64: 128, 64>}, {transform_indices = @transform_3, window_bounds = array<i64: 128, 64>}, {pipeline_mode = #tpu.pipeline_mode<synchronous>, transform_indices = @transform_4, window_bounds = array<i64: 1, 128>}, {pipeline_mode = #tpu.pipeline_mode<synchronous>, transform_indices = @transform_5, window_bounds = array<i64: 1, 128>}, {pipeline_mode = #tpu.pipeline_mode<synchronous>, transform_indices = @transform_6, window_bounds = array<i64: 64, 128>}, {pipeline_mode = #tpu.pipeline_mode<synchronous>, transform_indices = @transform_7, window_bounds = array<i64: 128, 64>}, {transform_indices = @transform_8, window_bounds = array<i64: 128, 64>}]} {
    %c0 = arith.constant 0 : index
    %c0_0 = arith.constant 0 : index
    %0 = vector.load %arg1[%c0, %c0_0] : memref<128x128xf32, #tpu.memory_space<vmem>>, vector<128x128xf32>
    %c0_1 = arith.constant 0 : index
    %c0_2 = arith.constant 0 : index
    %1 = vector.load %arg2[%c0_1, %c0_2] : memref<128x128xf32, #tpu.memory_space<vmem>>, vector<128x128xf32>
    %2 = arith.addf %0, %1 : vector<128x128xf32>
    %cst = arith.constant dense<0.000000e+00> : vector<128xf32>
    %3 = vector.multi_reduction <add>, %2, %cst [1] : vector<128x128xf32> to vector<128xf32>
    %4 = vector.shape_cast %3 : vector<128xf32> to vector<128x1xf32>
    %cst_3 = arith.constant 1.280000e+02 : f32
    %5 = vector.broadcast %cst_3 : f32 to vector<128x1xf32>
    %6 = arith.divf %4, %5 : vector<128x1xf32>
    %7 = vector.broadcast %6 : vector<128x1xf32> to vector<128x128xf32>
    %8 = arith.subf %2, %7 : vector<128x128xf32>
    %9 = arith.mulf %8, %8 : vector<128x128xf32>
    %cst_4 = arith.constant dense<0.000000e+00> : vector<128xf32>
    %10 = vector.multi_reduction <add>, %9, %cst_4 [1] : vector<128x128xf32> to vector<128xf32>
    %11 = vector.shape_cast %10 : vector<128xf32> to vector<128x1xf32>
    %cst_5 = arith.constant 1.280000e+02 : f32
    %12 = vector.broadcast %cst_5 : f32 to vector<128x1xf32>
    %13 = arith.divf %11, %12 : vector<128x1xf32>
    %14 = vector.broadcast %6 : vector<128x1xf32> to vector<128x128xf32>
    %15 = arith.subf %2, %14 : vector<128x128xf32>
    %cst_6 = arith.constant 9.99999974E-6 : f32
    %16 = vector.broadcast %cst_6 : f32 to vector<128x1xf32>
    %17 = arith.addf %13, %16 : vector<128x1xf32>
    %18 = math.rsqrt %17 : vector<128x1xf32>
    %19 = vector.broadcast %18 : vector<128x1xf32> to vector<128x128xf32>
    %20 = arith.mulf %15, %19 : vector<128x128xf32>
    %c0_7 = arith.constant 0 : index
    %c0_8 = arith.constant 0 : index
    %21 = vector.load %arg5[%c0_7, %c0_8] : memref<1x128xf32, #tpu.memory_space<vmem>>, vector<1x128xf32>
    %22 = vector.broadcast %21 : vector<1x128xf32> to vector<128x128xf32>
    %23 = arith.mulf %20, %22 : vector<128x128xf32>
    %c0_9 = arith.constant 0 : index
    %c0_10 = arith.constant 0 : index
    %24 = vector.load %arg6[%c0_9, %c0_10] : memref<1x128xf32, #tpu.memory_space<vmem>>, vector<1x128xf32>
    %25 = vector.broadcast %24 : vector<1x128xf32> to vector<128x128xf32>
    %26 = arith.addf %23, %25 : vector<128x128xf32>
    %c0_11 = arith.constant 0 : index
    %c0_12 = arith.constant 0 : index
    %27 = vector.load %arg3[%c0_11, %c0_12] : memref<128x64xbf16, #tpu.memory_space<vmem>>, vector<128x64xbf16>
    %c0_13 = arith.constant 0 : index
    %c0_14 = arith.constant 0 : index
    %28 = vector.load %arg7[%c0_13, %c0_14] : memref<64x128xbf16, #tpu.memory_space<vmem>>, vector<64x128xbf16>
    %cst_15 = arith.constant dense<0.000000e+00> : vector<128x128xf32>
    %29 = tpu.matmul %27, %28, %cst_15 {dimension_numbers = #tpu.dot_dimension_numbers<[1], [0], [0], [1], [0, 0, 1, 1], [], []>} : vector<128x64xbf16>, vector<64x128xbf16>, vector<128x128xf32> -> vector<128x128xf32>
    %cst_16 = arith.constant 0.000000e+00 : f32
    %30 = vector.broadcast %cst_16 : f32 to vector<128x128xf32>
    %31 = arith.subf %30, %29 : vector<128x128xf32>
    %32 = math.exp %31 : vector<128x128xf32>
    %cst_17 = arith.constant 1.000000e+00 : f32
    %33 = vector.broadcast %cst_17 : f32 to vector<128x128xf32>
    %34 = arith.addf %33, %32 : vector<128x128xf32>
    %cst_18 = arith.constant 1.000000e+00 : f32
    %35 = vector.broadcast %cst_18 : f32 to vector<128x128xf32>
    %36 = arith.divf %35, %34 : vector<128x128xf32>
    %37 = arith.mulf %29, %36 : vector<128x128xf32>
    %38 = arith.mulf %26, %37 : vector<128x128xf32>
    %39 = arith.truncf %38 : vector<128x128xf32> to vector<128x128xbf16>
    %c0_19 = arith.constant 0 : index
    %c0_20 = arith.constant 0 : index
    %40 = vector.load %arg4[%c0_19, %c0_20] : memref<128x64xf32, #tpu.memory_space<vmem>>, vector<128x64xf32>
    %c0_21 = arith.constant 0 : index
    %c0_22 = arith.constant 0 : index
    %41 = vector.load %arg8[%c0_21, %c0_22] : memref<128x64xbf16, #tpu.memory_space<vmem>>, vector<128x64xbf16>
    %cst_23 = arith.constant dense<0.000000e+00> : vector<128x64xf32>
    %42 = tpu.matmul %39, %41, %cst_23 {dimension_numbers = #tpu.dot_dimension_numbers<[1], [0], [0], [1], [0, 0, 1, 1], [], []>} : vector<128x128xbf16>, vector<128x64xbf16>, vector<128x64xf32> -> vector<128x64xf32>
    %43 = arith.addf %40, %42 : vector<128x64xf32>
    %c0_24 = arith.constant 0 : index
    %c0_25 = arith.constant 0 : index
    %44 = vector.load %arg9[%c0_24, %c0_25] : memref<128x64xf32, #tpu.memory_space<vmem>>, vector<128x64xf32>
    tpu.vector_store %arg9[%c0_24, %c0_25], %43 {strides = array<i32>} : memref<128x64xf32, #tpu.memory_space<vmem>>, vector<128x64xf32>,
    return
  }
  func.func @transform_0(%arg0: i32) -> (i32, i32) {
    %c0_i32 = arith.constant 0 : i32
    %c0_i32_0 = arith.constant 0 : i32
    return %arg0, %c0_i32 : i32, i32
  }
  func.func @transform_1(%arg0: i32) -> (i32, i32) {
    %c0_i32 = arith.constant 0 : i32
    %c0_i32_0 = arith.constant 0 : i32
    return %arg0, %c0_i32 : i32, i32
  }
  func.func @transform_2(%arg0: i32) -> (i32, i32) {
    %c0_i32 = arith.constant 0 : i32
    %c0_i32_0 = arith.constant 0 : i32
    return %arg0, %c0_i32 : i32, i32
  }
  func.func @transform_3(%arg0: i32) -> (i32, i32) {
    %c0_i32 = arith.constant 0 : i32
    %c0_i32_0 = arith.constant 0 : i32
    return %arg0, %c0_i32 : i32, i32
  }
  func.func @transform_4(%arg0: i32) -> (i32, i32) {
    %c0_i32 = arith.constant 0 : i32
    %c0_i32_0 = arith.constant 0 : i32
    %c0_i32_1 = arith.constant 0 : i32
    return %c0_i32, %c0_i32_0 : i32, i32
  }
  func.func @transform_5(%arg0: i32) -> (i32, i32) {
    %c0_i32 = arith.constant 0 : i32
    %c0_i32_0 = arith.constant 0 : i32
    %c0_i32_1 = arith.constant 0 : i32
    return %c0_i32, %c0_i32_0 : i32, i32
  }
  func.func @transform_6(%arg0: i32) -> (i32, i32) {
    %c0_i32 = arith.constant 0 : i32
    %c0_i32_0 = arith.constant 0 : i32
    %c0_i32_1 = arith.constant 0 : i32
    return %c0_i32, %c0_i32_0 : i32, i32
  }
  func.func @transform_7(%arg0: i32) -> (i32, i32) {
    %c0_i32 = arith.constant 0 : i32
    %c0_i32_0 = arith.constant 0 : i32
    %c0_i32_1 = arith.constant 0 : i32
    return %c0_i32, %c0_i32_0 : i32, i32
  }
  func.func @transform_8(%arg0: i32) -> (i32, i32) {
    %c0_i32 = arith.constant 0 : i32
    %c0_i32_0 = arith.constant 0 : i32
    return %arg0, %c0_i32 : i32, i32
  }
}

</mosaic_0001>

<bundles_post_ra>
// kernel: vss_block_forward.4
= control target key start
LH: loop header
LB: loop body
LE: loop exit
PB: predicated region body
PF: predicated region fallthrough
CT: control target
= control target key end

     0   :  { %vm42_vm0 = vcmask 523264   ;;  %v878_v28 = vmov 64.0   ;;  %s1639_s0 = inlined_call_operand.vmem [shape: f32[128,64], index: 0, kind: input, shape index: {}]   ;;  %s1640_s1 = inlined_call_operand.vmem [shape: f32[1,64], index: 1, kind: input, shape index: {}]   ;;  %s1641_s2 = inlined_call_operand.vmem [shape: f32[1,64], index: 2, kind: input, shape index: {}]   ;;  %s1642_s3 = inlined_call_operand.vmem [shape: bf16[64,64], index: 3, kind: input, shape index: {}]   ;;  %s1643_s5 = inlined_call_operand.vmem [shape: bf16[64,128], index: 5, kind: input, shape index: {}]   ;;  %s1644_s4 = inlined_call_operand.vmem [shape: f32[1,64], index: 4, kind: input, shape index: {}]   ;;  %s1645_s6 = inlined_call_operand.vmem [shape: bf16[128,64], index: 6, kind: output, shape index: {0}]   ;;  %s1646_s7 = inlined_call_operand.vmem [shape: bf16[128,128], index: 7, kind: output, shape index: {1}]  }
   0x1   :  { %v34_v0 = vld [vmem:[%s1639_s0 + $0x40] sm:$0xff]  ;;  %v930_v2 = vld [vmem:[%s1639_s0 + $0x50] sm:$0xff]  ;;  %v35_v6 = vld [vmem:[%s1639_s0 + $0x48] sm:$0xff]  ;;  %844 = vrcp.f32 %v878_v28 }
   0x2   :  { %v925_v1 = vld [vmem:[%s1639_s0] sm:$0xff]  ;;  %v67_v3 = vsel %vm42_vm0, %v34_v0, 0.0  ;;  %v73_v5 = vsel %vm42_vm0, %v930_v2, 0.0  ;;  %v27_v7 = vld [vmem:[%s1639_s0 + $0x8] sm:$0xff]  ;;  %v37_v8 = vld [vmem:[%s1639_s0 + $0x58] sm:$0xff]  ;;  %v70_v9 = vsel %vm42_vm0, %v35_v6, 0.0 }
   0x3   :  { %v43_v4 = vsel %vm42_vm0, %v925_v1, 0.0  ;;  %68 = vadd.xlane.f32.xlu0 %v67_v3  ;;  %74 = vadd.xlane.f32.xlu2 %v73_v5  ;;  %v46_v10 = vsel %vm42_vm0, %v27_v7, 0.0  ;;  %v76_v11 = vsel %vm42_vm0, %v37_v8, 0.0  ;;  %v952_v12 = vld [vmem:[%s1639_s0 + $0x10] sm:$0xff]  ;;  %v957_v13 = vld [vmem:[%s1639_s0 + $0x18] sm:$0xff]  ;;  %v962_v14 = vld [vmem:[%s1639_s0 + $0x60] sm:$0xff] }
   0x4   :  { %44 = vadd.xlane.f32.xlu1 %v43_v4  ;;  %v49_v15 = vsel %vm42_vm0, %v952_v12, 0.0  ;;  %v52_v16 = vsel %vm42_vm0, %v957_v13, 0.0  ;;  %v79_v17 = vsel %vm42_vm0, %v962_v14, 0.0  ;;  %v973_v18 = vld [vmem:[%s1639_s0 + $0x68] sm:$0xff]  ;;  %v978_v19 = vld [vmem:[%s1639_s0 + $0x20] sm:$0xff]  ;;  %v994_v24 = vld [vmem:[%s1639_s0 + $0x78] sm:$0xff] }
   0x5   :  { %v983_v20 = vld [vmem:[%s1639_s0 + $0x28] sm:$0xff]  ;;  %v82_v21 = vsel %vm42_vm0, %v973_v18, 0.0  ;;  %v55_v22 = vsel %vm42_vm0, %v978_v19, 0.0  ;;  %v999_v25 = vld [vmem:[%s1639_s0 + $0x70] sm:$0xff]  ;;  %v88_v26 = vsel %vm42_vm0, %v994_v24, 0.0 }
   0x6   :  { %v58_v23 = vsel %vm42_vm0, %v983_v20, 0.0  ;;  %v85_v27 = vsel %vm42_vm0, %v999_v25, 0.0  ;;  %v1019_v48 = vld [vmem:[%s1639_s0 + $0x30] sm:$0xff] }
   0x7   :  { %v845_v29 = vpop.eup %844  ;;  %v61_v53 = vsel %vm42_vm0, %v1019_v48, 0.0 }
   0x8   :  { %v92_v30 = vmul.f32 64.0, %v845_v29  ;;  %vm96_vm1 = vweird.f32 %v845_v29 }
   0xa   :  { %v93_v31 = vsub.f32 1.0, %v92_v30 }
   0xb   :  { %71 = vadd.xlane.f32.xlu0 %v70_v9  ;;  %77 = vadd.xlane.f32.xlu2 %v76_v11 }
   0xc   :  { %47 = vadd.xlane.f32.xlu1 %v46_v10  ;;  %v94_v32 = vmul.f32 %v845_v29, %v93_v31 }
   0xe   :  { %v95_v33 = vadd.f32 %v845_v29, %v94_v32 }
  0x10   :  { %v1005_v34 = vsel %vm96_vm1, %v845_v29, %v95_v33 }
  0x13   :  { %50 = vadd.xlane.f32.xlu0 %v49_v15  ;;  %80 = vadd.xlane.f32.xlu2 %v79_v17 }
  0x14   :  { %53 = vadd.xlane.f32.xlu1 %v52_v16 }
  0x1b   :  { %83 = vadd.xlane.f32.xlu0 %v82_v21  ;;  %59 = vadd.xlane.f32.xlu2 %v58_v23  ;;  %v1067_v21 = vld [vmem:[%s1639_s0 + $0x38] sm:$0xff] }
  0x1c   :  { %56 = vadd.xlane.f32.xlu1 %v55_v22  ;;  %v64_v28 = vsel %vm42_vm0, %v1067_v21, 0.0 }
  0x23   :  { %89 = vadd.xlane.f32.xlu0 %v88_v26  ;;  %86 = vadd.xlane.f32.xlu2 %v85_v27 }
  0x76   :  { %v69_v35 = vpop.xlane.xlu0 %68  ;;  %v75_v38 = vpop.xlane.xlu2 %74 }
  0x77   :  { %v45_v36 = vpop.xlane.xlu1 %44  ;;  %v106_v37 = vmul.f32 %v1005_v34, %v69_v35  ;;  %v108_v49 = vmul.f32 %v1005_v34, %v75_v38 }
  0x78   :  { %v98_v44 = vmul.f32 %v1005_v34, %v45_v36 }
  0x79   :  { %v1008_v39 = vsub.f32 %v34_v0, %v106_v37  ;;  %v1039_v58 = vsub.f32 %v930_v2, %v108_v49  ;;  %v780_v49 = vld [vmem:[%s1642_s3 + $0x18] sm:$0xff] }
  0x7a   :  { %v1030_v54 = vsub.f32 %v925_v1, %v98_v44  ;;  %832 = vmatpush.bf16.msra.mxu2 %v780_v49  ;;  %514 = vmatpush.bf16.msra.mxu0 %v780_v49 }
  0x7b   :  { %v138_v40 = vmul.f32 %v1008_v39, %v1008_v39  ;;  %v140_v2 = vmul.f32 %v1039_v58, %v1039_v58 }
  0x7c   :  { %v130_v1 = vmul.f32 %v1030_v54, %v1030_v54 }
  0x7d   :  { %v170_v41 = vsel %vm42_vm0, %v138_v40, 0.0 }
  0x7e   :  { %v72_v42 = vpop.xlane.xlu0 %71  ;;  %171 = vadd.xlane.f32.xlu0 %v170_v41  ;;  %v78_v47 = vpop.xlane.xlu2 %77 }
  0x7f   :  { %v48_v43 = vpop.xlane.xlu1 %47  ;;  %v107_v45 = vmul.f32 %v1005_v34, %v72_v42  ;;  %v109_v50 = vmul.f32 %v1005_v34, %v78_v47 }
  0x80   :  { %v99_v46 = vmul.f32 %v1005_v34, %v48_v43 }
  0x81   :  { %v1023_v51 = vsub.f32 %v35_v6, %v107_v45  ;;  %v1032_v55 = vsub.f32 %v37_v8, %v109_v50  ;;  %v176_v8 = vsel %vm42_vm0, %v140_v2, 0.0  ;;  %v779_v50 = vld [vmem:[%s1642_s3 + $0x10] sm:$0xff] }
  0x82   :  { %v1025_v52 = vsub.f32 %v27_v7, %v99_v46  ;;  %v146_v7 = vsel %vm42_vm0, %v130_v1, 0.0  ;;  %833 = vmatpush.bf16.msra.mxu2 %v779_v50  ;;  %515 = vmatpush.bf16.msra.mxu0 %v779_v50 }
  0x83   :  { %v139_v56 = vmul.f32 %v1023_v51, %v1023_v51  ;;  %v141_v0 = vmul.f32 %v1032_v55, %v1032_v55 }
  0x84   :  { %v131_v57 = vmul.f32 %v1025_v52, %v1025_v52 }
  0x85   :  { %v173_v59 = vsel %vm42_vm0, %v139_v56, 0.0  ;;  %v179_v6 = vsel %vm42_vm0, %v141_v0, 0.0 }
  0x86   :  { %v149_v60 = vsel %vm42_vm0, %v131_v57, 0.0  ;;  %62 = vadd.xlane.f32.xlu0 %v61_v53  ;;  %174 = vadd.xlane.f32.xlu1 %v173_v59  ;;  %v51_v61 = vpop.xlane.xlu0 %50  ;;  %v81_v63 = vpop.xlane.xlu2 %80  ;;  %v783_v53 = vld [vmem:[%s1643_s5 + $0x10] sm:$0xff]  ;;  %v778_v59 = vld [vmem:[%s1642_s3 + $0x8] sm:$0xff] }
  0x87   :  { %v54_v62 = vpop.xlane.xlu1 %53  ;;  %150 = vadd.xlane.f32.xlu2 %v149_v60  ;;  %v110_v3 = vmul.f32 %v1005_v34, %v81_v63  ;;  %v100_v15 = vmul.f32 %v1005_v34, %v51_v61  ;;  %v782_v60 = vld [vmem:[%s1643_s5 + $0x8] sm:$0xff]  ;;  %834 = vmatpush.bf16.msra.mxu2 %v778_v59  ;;  %v781_v63 = vld [vmem:[%s1643_s5] sm:$0xff] }
  0x88   :  { %v101_v4 = vmul.f32 %v1005_v34, %v54_v62  ;;  %516 = vmatpush.bf16.msra.mxu0 %v778_v59  ;;  %v777_v62 = vld [vmem:[%s1642_s3] sm:$0xff] }
  0x89   :  { %v1052_v5 = vsub.f32 %v962_v14, %v110_v3  ;;  %v1073_v23 = vsub.f32 %v952_v12, %v100_v15 }
  0x8a   :  { %v1058_v9 = vsub.f32 %v957_v13, %v101_v4 }
  0x8b   :  { %v142_v14 = vmul.f32 %v1052_v5, %v1052_v5  ;;  %835 = vmatpush.bf16.msra.mxu2 %v777_v62 }
  0x8c   :  { %v133_v13 = vmul.f32 %v1058_v9, %v1058_v9  ;;  %517 = vmatpush.bf16.msra.mxu0 %v777_v62 }
  0x8d   :  { %v182_v27 = vsel %vm42_vm0, %v142_v14, 0.0 }
  0x8e   :  { %180 = vadd.xlane.f32.xlu0 %v179_v6  ;;  %147 = vadd.xlane.f32.xlu1 %v146_v7  ;;  %v84_v10 = vpop.xlane.xlu0 %83  ;;  %v60_v16 = vpop.xlane.xlu2 %59  ;;  %v155_v29 = vsel %vm42_vm0, %v133_v13, 0.0 }
  0x8f   :  { %v57_v11 = vpop.xlane.xlu1 %56  ;;  %177 = vadd.xlane.f32.xlu2 %v176_v8  ;;  %v103_v17 = vmul.f32 %v1005_v34, %v60_v16  ;;  %v111_v32 = vmul.f32 %v1005_v34, %v84_v10 }
  0x90   :  { %v102_v22 = vmul.f32 %v1005_v34, %v57_v11 }
  0x91   :  { %v1076_v26 = vsub.f32 %v983_v20, %v103_v17  ;;  %v132_v20 = vmul.f32 %v1073_v23, %v1073_v23 }
  0x92   :  { %v1083_v30 = vsub.f32 %v978_v19, %v102_v22  ;;  %v1094_v19 = vsub.f32 %v973_v18, %v111_v32 }
  0x93   :  { %v135_v12 = vmul.f32 %v1076_v26, %v1076_v26  ;;  %v152_v37 = vsel %vm42_vm0, %v132_v20, 0.0 }
  0x94   :  { %v134_v35 = vmul.f32 %v1083_v30, %v1083_v30  ;;  %v143_v43 = vmul.f32 %v1094_v19, %v1094_v19 }
  0x95   :  { %v161_v36 = vsel %vm42_vm0, %v135_v12, 0.0 }
  0x96   :  { %183 = vadd.xlane.f32.xlu0 %v182_v27  ;;  %65 = vadd.xlane.f32.xlu1 %v64_v28  ;;  %v90_v31 = vpop.xlane.xlu0 %89  ;;  %v158_v40 = vsel %vm42_vm0, %v134_v35, 0.0  ;;  %v87_v41 = vpop.xlane.xlu2 %86 }
  0x97   :  { %156 = vadd.xlane.f32.xlu2 %v155_v29  ;;  %v113_v33 = vmul.f32 %v1005_v34, %v90_v31  ;;  %v112_v42 = vmul.f32 %v1005_v34, %v87_v41 }
  0x99   :  { %v1099_v38 = vsub.f32 %v994_v24, %v113_v33  ;;  %v1108_v44 = vsub.f32 %v999_v25, %v112_v42  ;;  %v185_v24 = vsel %vm42_vm0, %v143_v43, 0.0  ;;  %v784_v25 = vld [vmem:[%s1643_s5 + $0x18] sm:$0xff] }
  0x9a   :  { %836 = vmatpush.bf16.msra.mxu3 %v784_v25  ;;  %644 = vmatpush.bf16.msra.mxu1 %v784_v25 }
  0x9b   :  { %v145_v18 = vmul.f32 %v1099_v38, %v1099_v38  ;;  %v144_v46 = vmul.f32 %v1108_v44, %v1108_v44 }
  0x9d   :  { %v191_v45 = vsel %vm42_vm0, %v145_v18, 0.0  ;;  %v188_v47 = vsel %vm42_vm0, %v144_v46, 0.0 }
  0x9e   :  { %162 = vadd.xlane.f32.xlu0 %v161_v36  ;;  %153 = vadd.xlane.f32.xlu1 %v152_v37 }
  0x9f   :  { %159 = vadd.xlane.f32.xlu2 %v158_v40  ;;  %837 = vmatpush.bf16.msra.mxu3 %v783_v53 }
  0xa0   :  { %645 = vmatpush.bf16.msra.mxu1 %v783_v53 }
  0xa3   :  { %838 = vmatpush.bf16.msra.mxu3 %v782_v60 }
  0xa4   :  { %646 = vmatpush.bf16.msra.mxu1 %v782_v60 }
  0xa6   :  { %186 = vadd.xlane.f32.xlu1 %v185_v24 }
  0xa7   :  { %192 = vadd.xlane.f32.xlu2 %v191_v45  ;;  %839 = vmatpush.bf16.msra.mxu3 %v781_v63 }
  0xa8   :  { %647 = vmatpush.bf16.msra.mxu1 %v781_v63 }
  0xae   :  { %189 = vadd.xlane.f32.xlu1 %v188_v47 }
  0xf1   :  { %v172_v56 = vpop.xlane.xlu0 %171 }
  0xf2   :  { %v202_v57 = vmul.f32 %v172_v56, %v1005_v34 }
  0xf4   :  { %v1134_v61 = vadd.f32 1e-06, %v202_v57 }
  0xf6   :  { %846 = vrsqrt.f32 %v1134_v61  ;;  %vm312_vm3 = vweird.f32 %v1134_v61 }
  0xf9   :  { %v63_v0 = vpop.xlane.xlu0 %62  ;;  %v175_v1 = vpop.xlane.xlu1 %174 }
  0xfa   :  { %v104_v3 = vmul.f32 %v1005_v34, %v63_v0  ;;  %v151_v2 = vpop.xlane.xlu2 %150  ;;  %v203_v4 = vmul.f32 %v175_v1, %v1005_v34 }
  0xfb   :  { %v195_v6 = vmul.f32 %v151_v2, %v1005_v34 }
  0xfc   :  { %v1146_v7 = vpop.eup %846  ;;  %v1149_v8 = vsub.f32 %v1019_v48, %v104_v3  ;;  %v219_v10 = vadd.f32 1e-06, %v203_v4 }
  0xfd   :  { %v307_v11 = vmul.f32 %v1146_v7, %v1134_v61  ;;  %v1153_v15 = vadd.f32 1e-06, %v195_v6  ;;  %vm313_vm2 = vweird.f32 %v1146_v7 }
  0xfe   :  { %848 = vrsqrt.f32 %v219_v10  ;;  %v136_v16 = vmul.f32 %v1149_v8, %v1149_v8  ;;  %vm322_vm4 = vweird.f32 %v219_v10  ;;  %vm1201_vm6 = vmor %vm312_vm3, %vm313_vm2 }
  0xff   :  { %v308_v14 = vmul.f32 %v1146_v7, %v307_v11  ;;  %850 = vrsqrt.f32 %v1153_v15  ;;  %vm242_vm7 = vweird.f32 %v1153_v15 }
 0x100   :  { %v164_v17 = vsel %vm42_vm0, %v136_v16, 0.0 }
 0x101   :  { %165 = vadd.xlane.f32.xlu0 %v164_v17  ;;  %v181_v13 = vpop.xlane.xlu0 %180  ;;  %v148_v48 = vpop.xlane.xlu1 %147  ;;  %v309_v29 = vmul.f32 0.5, %v308_v14 }
 0x102   :  { %v205_v22 = vmul.f32 %v181_v13, %v1005_v34  ;;  %v178_v27 = vpop.xlane.xlu2 %177  ;;  %v194_v28 = vmul.f32 %v148_v48, %v1005_v34 }
 0x103   :  { %v204_v31 = vmul.f32 %v178_v27, %v1005_v34  ;;  %v310_v40 = vsub.f32 1.5, %v309_v29 }
 0x104   :  { %v1163_v32 = vpop.eup %848  ;;  %v1165_v12 = vadd.f32 1e-06, %v205_v22  ;;  %v1167_v20 = vadd.f32 1e-06, %v194_v28 }
 0x105   :  { %v1169_v33 = vpop.eup %850  ;;  %v317_v35 = vmul.f32 %v1163_v32, %v219_v10  ;;  %v1172_v36 = vadd.f32 1e-06, %v204_v31  ;;  %v311_v25 = vmul.f32 %v1146_v7, %v310_v40  ;;  %vm323_vm5 = vweird.f32 %v1163_v32 }
 0x106   :  { %v237_v37 = vmul.f32 %v1169_v33, %v1153_v15  ;;  %852 = vrsqrt.f32 %v1165_v12  ;;  %vm243_vm8 = vweird.f32 %v1169_v33  ;;  %vm1216_vm9 = vmor %vm322_vm4, %vm323_vm5  ;;  %vm342_vm10 = vweird.f32 %v1165_v12 }
 0x107   :  { %v318_v41 = vmul.f32 %v1163_v32, %v317_v35  ;;  %854 = vrsqrt.f32 %v1172_v36  ;;  %v315_v4 = vsel %vm1201_vm6, %v1146_v7, %v311_v25  ;;  %vm332_vm11 = vweird.f32 %v1172_v36  ;;  %vm1238_vm12 = vmor %vm242_vm7, %vm243_vm8  ;;  %v1248_v35 = vld [vmem:[%s1640_s1] ss:$0 sm:$0xff] }
 0x108   :  { %v238_v42 = vmul.f32 %v1169_v33, %v237_v37  ;;  %856 = vrsqrt.f32 %v1167_v20  ;;  %v394_v22 = vmul.f32 %v315_v4, %v1008_v39  ;;  %vm232_vm13 = vweird.f32 %v1167_v20 }
 0x109   :  { %v319_v43 = vmul.f32 0.5, %v318_v41  ;;  %v184_v18 = vpop.xlane.xlu0 %183  ;;  %v66_v24 = vpop.xlane.xlu1 %65 }
 0x10a   :  { %v239_v45 = vmul.f32 0.5, %v238_v42  ;;  %v206_v46 = vmul.f32 %v184_v18, %v1005_v34  ;;  %v157_v47 = vpop.xlane.xlu2 %156  ;;  %v105_v49 = vmul.f32 %v1005_v34, %v66_v24 }
 0x10b   :  { %v320_v50 = vsub.f32 1.5, %v319_v43  ;;  %v197_v53 = vmul.f32 %v157_v47, %v1005_v34  ;;  %v414_v47 = vmul.f32 %v1248_v35, %v394_v22 }
 0x10c   :  { %v1186_v56 = vpop.eup %852  ;;  %v1190_v57 = vadd.f32 1e-06, %v206_v46  ;;  %v240_v60 = vsub.f32 1.5, %v239_v45  ;;  %v1210_v2 = vsub.f32 %v1067_v21, %v105_v49 }
 0x10d   :  { %v1192_v59 = vpop.eup %854  ;;  %v321_v62 = vmul.f32 %v1163_v32, %v320_v50  ;;  %v337_v63 = vmul.f32 %v1186_v56, %v1165_v12  ;;  %v1197_v0 = vadd.f32 1e-06, %v197_v53  ;;  %vm343_vm15 = vweird.f32 %v1186_v56  ;;  %v1278_v53 = vld [vmem:[%s1641_s2] ss:$0 sm:$0xff] }
 0x10e   :  { %v1199_v1 = vpop.eup %856  ;;  %v327_v61 = vmul.f32 %v1192_v59, %v1172_v36  ;;  %858 = vrsqrt.f32 %v1190_v57  ;;  %v241_v7 = vmul.f32 %v1169_v33, %v240_v60  ;;  %vm333_vm1 = vweird.f32 %v1192_v59  ;;  %vm1290_vm3 = vmor %vm342_vm10, %vm343_vm15 }
 0x10f   :  { %v338_v11 = vmul.f32 %v1186_v56, %v337_v63  ;;  %v227_v16 = vmul.f32 %v1199_v1, %v1167_v20  ;;  %v325_v21 = vsel %vm1216_vm9, %v1163_v32, %v321_v62  ;;  %860 = vrsqrt.f32 %v1197_v0  ;;  %vm1299_vm4 = vmor %vm332_vm11, %vm333_vm1 }
 0x110   :  { %v328_v14 = vmul.f32 %v1192_v59, %v327_v61  ;;  %v137_v32 = vmul.f32 %v1210_v2, %v1210_v2  ;;  %v395_v39 = vmul.f32 %v325_v21, %v1023_v51  ;;  %vm233_vm14 = vweird.f32 %v1199_v1 }
 0x111   :  { %v339_v10 = vmul.f32 0.5, %v338_v11  ;;  %v228_v17 = vmul.f32 %v1199_v1, %v227_v16  ;;  %v163_v13 = vpop.xlane.xlu0 %162  ;;  %v154_v48 = vpop.xlane.xlu1 %153  ;;  %v245_v43 = vsel %vm1238_vm12, %v1169_v33, %v241_v7  ;;  %vm234_vm2 = vmor %vm232_vm13, %vm233_vm14  ;;  %vm262_vm5 = vweird.f32 %v1197_v0 }
 0x112   :  { %v329_v28 = vmul.f32 0.5, %v328_v14  ;;  %v199_v29 = vmul.f32 %v163_v13, %v1005_v34  ;;  %v160_v31 = vpop.xlane.xlu2 %159  ;;  %v196_v40 = vmul.f32 %v154_v48, %v1005_v34  ;;  %v167_v42 = vsel %vm42_vm0, %v137_v32, 0.0 }
 0x113   :  { %v229_v37 = vmul.f32 0.5, %v228_v17  ;;  %v198_v15 = vmul.f32 %v160_v31, %v1005_v34  ;;  %v340_v18 = vsub.f32 1.5, %v339_v10  ;;  %168 = vadd.xlane.f32.xlu1 %v167_v42  ;;  %v415_v50 = vmul.f32 %v1248_v35, %v395_v39 }
 0x114   :  { %v1255_v41 = vadd.f32 1e-06, %v199_v29  ;;  %v330_v24 = vsub.f32 1.5, %v329_v28  ;;  %v1261_v45 = vpop.eup %858  ;;  %v1272_v25 = vadd.f32 1e-06, %v196_v40  ;;  %v387_v60 = vmul.f32 %v245_v43, %v1025_v52 }
 0x115   :  { %v230_v51 = vsub.f32 1.5, %v229_v37  ;;  %v1265_v46 = vadd.f32 1e-06, %v198_v15  ;;  %v1268_v49 = vpop.eup %860  ;;  %v341_v63 = vmul.f32 %v1186_v56, %v340_v18  ;;  %v347_v12 = vmul.f32 %v1261_v45, %v1190_v57 }
 0x116   :  { %862 = vrsqrt.f32 %v1255_v41  ;;  %v257_v62 = vmul.f32 %v1268_v49, %v1197_v0  ;;  %v331_v61 = vmul.f32 %v1192_v59, %v330_v24  ;;  %v1312_v21 = vadd.f32 %v1278_v53, %v415_v50 }
 0x117   :  { %v231_v33 = vmul.f32 %v1199_v1, %v230_v51  ;;  %864 = vrsqrt.f32 %v1265_v46  ;;  %v345_v17 = vsel %vm1290_vm3, %v1186_v56, %v341_v63  ;;  %v348_v22 = vmul.f32 %v1261_v45, %v347_v12 }
 0x118   :  { %v258_v11 = vmul.f32 %v1268_v49, %v257_v62  ;;  %866 = vrsqrt.f32 %v1272_v25  ;;  %v335_v13 = vsel %vm1299_vm4, %v1192_v59, %v331_v61  ;;  %v407_v29 = vmul.f32 %v1248_v35, %v387_v60 }
 0x119   :  { %v235_v52 = vsel %vm234_vm2, %v1199_v1, %v231_v33  ;;  %v187_v4 = vpop.xlane.xlu1 %186  ;;  %v1309_v1 = vadd.f32 %v1278_v53, %v414_v47  ;;  %vm263_vm6 = vweird.f32 %v1268_v49  ;;  %v396_v39 = vmul.f32 %v335_v13, %v1039_v58 }
 0x11a   :  { %v386_v6 = vmul.f32 %v235_v52, %v1030_v54  ;;  %v193_v16 = vpop.xlane.xlu2 %192  ;;  %v259_v7 = vmul.f32 0.5, %v258_v11  ;;  %v207_v54 = vmul.f32 %v187_v4, %v1005_v34  ;;  %v397_v40 = vmul.f32 %v345_v17, %v1032_v55  ;;  %vm1354_vm7 = vmor %vm262_vm5, %vm263_vm6 }
 0x11b   :  { %v209_v36 = vmul.f32 %v193_v16, %v1005_v34  ;;  %v446_v48 = vpack.c.bf16 %v1312_v21, %v1309_v1  ;;  %v349_v24 = vmul.f32 0.5, %v348_v22  ;;  %v1360_v51 = vadd.f32 %v1278_v53, %v407_v29 }
 0x11c   :  { %v1315_v14 = vpop.eup %862  ;;  %v406_v10 = vmul.f32 %v1248_v35, %v386_v6  ;;  %v260_v27 = vsub.f32 1.5, %v259_v7  ;;  %v1328_v28 = vadd.f32 1e-06, %v207_v54  ;;  %vm252_vm8 = vweird.f32 %v1272_v25 }
 0x11d   :  { %v1331_v31 = vpop.eup %864  ;;  %v277_v56 = vmul.f32 %v1315_v14, %v1255_v41  ;;  %749 = vmatmul.msk.bf16.vlgmr.msra.gmra.mxu2 %vm42_vm0, %v446_v48  ;;  %773 = vmatmul.msk.bf16.vlgmr.msra.gmra.mxu3 %vm42_vm0, %v446_v48  ;;  %v1339_v59 = vadd.f32 1e-06, %v209_v36  ;;  %v416_v60 = vmul.f32 %v1248_v35, %v396_v39  ;;  %v417_v3 = vmul.f32 %v1248_v35, %v397_v40 }
 0x11e   :  { %v867_v32 = vpop.eup %866  ;;  %v267_v37 = vmul.f32 %v1331_v31, %v1265_v46  ;;  %v1345_v15 = vadd.f32 %v1278_v53, %v406_v10  ;;  %v261_v42 = vmul.f32 %v1268_v49, %v260_v27  ;;  %868 = vrsqrt.f32 %v1328_v28 }
 0x11f   :  { %v247_v43 = vmul.f32 %v867_v32, %v1272_v25  ;;  %v278_v55 = vmul.f32 %v1315_v14, %v277_v56  ;;  %870 = vrsqrt.f32 %v1339_v59  ;;  %vm253_vm9 = vweird.f32 %v867_v32 }
 0x120   :  { %v268_v33 = vmul.f32 %v1331_v31, %v267_v37  ;;  %v442_v0 = vpack.c.bf16 %v1360_v51, %v1345_v15  ;;  %v265_v62 = vsel %vm1354_vm7, %v1268_v49, %v261_v42  ;;  %v350_v61 = vsub.f32 1.5, %v349_v24  ;;  %vm254_vm12 = vmor %vm252_vm8, %vm253_vm9 }
 0x121   :  { %v190_v18 = vpop.xlane.xlu1 %189  ;;  %v248_v47 = vmul.f32 %v867_v32, %v247_v43  ;;  %vm352_vm10 = vweird.f32 %v1190_v57  ;;  %v279_v4 = vmul.f32 0.5, %v278_v55  ;;  %vm353_vm11 = vweird.f32 %v1261_v45 }
 0x122   :  { %v208_v50 = vmul.f32 %v190_v18, %v1005_v34  ;;  %745 = vmatmul.msk.bf16.vlgmr.msra.gmra.mxu0 %vm42_vm0, %v442_v0  ;;  %769 = vmatmul.msk.bf16.vlgmr.msra.gmra.mxu1 %vm42_vm0, %v442_v0  ;;  %v389_v49 = vmul.f32 %v265_v62, %v1058_v9  ;;  %v269_v12 = vmul.f32 0.5, %v268_v33  ;;  %v1384_v11 = vadd.f32 %v1278_v53, %v416_v60  ;;  %vm1396_vm13 = vmor %vm352_vm10, %vm353_vm11 }
 0x123   :  { %v249_v63 = vmul.f32 0.5, %v248_v47  ;;  %v1391_v54 = vadd.f32 %v1278_v53, %v417_v3  ;;  %v351_v10 = vmul.f32 %v1261_v45, %v350_v61  ;;  %v280_v25 = vsub.f32 1.5, %v279_v4 }
 0x124   :  { %v1376_v52 = vadd.f32 1e-06, %v208_v50  ;;  %v869_v6 = vpop.eup %868  ;;  %vm362_vm14 = vweird.f32 %v1328_v28  ;;  %v409_v27 = vmul.f32 %v1248_v35, %v389_v49  ;;  %v270_v29 = vsub.f32 1.5, %v269_v12 }
 0x125   :  { %v250_v20 = vsub.f32 1.5, %v249_v63  ;;  %v1386_v16 = vpop.eup %870  ;;  %v357_v7 = vmul.f32 %v869_v6, %v1328_v28  ;;  %vm363_vm15 = vweird.f32 %v869_v6  ;;  %v447_v57 = vpack.c.bf16 %v1391_v54, %v1384_v11 }
 0x126   :  { %872 = vrsqrt.f32 %v1376_v52  ;;  %v377_v22 = vmul.f32 %v1386_v16, %v1339_v59  ;;  %vm282_vm1 = vweird.f32 %v1255_v41  ;;  %vm283_vm2 = vweird.f32 %v1315_v14  ;;  %vm364_vm5 = vmor %vm362_vm14, %vm363_vm15 }
 0x127   :  { %v251_v36 = vmul.f32 %v867_v32, %v250_v20  ;;  %v358_v13 = vmul.f32 %v869_v6, %v357_v7  ;;  %v281_v37 = vmul.f32 %v1315_v14, %v280_v25  ;;  %vm272_vm3 = vweird.f32 %v1265_v46  ;;  %vm1433_vm6 = vmor %vm282_vm1, %vm283_vm2 }
 0x128   :  { %vm273_vm4 = vweird.f32 %v1331_v31  ;;  %v1426_v18 = vadd.f32 %v1278_v53, %v409_v27  ;;  %v271_v28 = vmul.f32 %v1331_v31, %v270_v29  ;;  %vm372_vm8 = vweird.f32 %v1376_v52 }
 0x129   :  { %v255_v17 = vsel %vm254_vm12, %v867_v32, %v251_v36  ;;  %v359_v56 = vmul.f32 0.5, %v358_v13  ;;  %v355_v32 = vsel %vm1396_vm13, %v1261_v45, %v351_v10  ;;  %v378_v45 = vmul.f32 %v1386_v16, %v377_v22  ;;  %vm1438_vm7 = vmor %vm272_vm3, %vm273_vm4 }
 0x12a   :  { %v388_v48 = vmul.f32 %v255_v17, %v1073_v23  ;;  %v398_v46 = vmul.f32 %v355_v32, %v1052_v5  ;;  %v285_v41 = vsel %vm1433_vm6, %v1315_v14, %v281_v37  ;;  %v275_v62 = vsel %vm1438_vm7, %v1331_v31, %v271_v28 }
 0x12b   :  { %v360_v40 = vsub.f32 1.5, %v359_v56  ;;  %v379_v0 = vmul.f32 0.5, %v378_v45  ;;  %v391_v4 = vmul.f32 %v285_v41, %v1076_v26  ;;  %vm382_vm10 = vweird.f32 %v1339_v59  ;;  %v1505_v41 = vld [vmem:[%s1644_s4] ss:$0 sm:$0xff] }
 0x12c   :  { %v408_v23 = vmul.f32 %v1248_v35, %v388_v48  ;;  %v873_v39 = vpop.eup %872  ;;  %v418_v63 = vmul.f32 %v1248_v35, %v398_v46  ;;  %vm383_vm11 = vweird.f32 %v1386_v16 }
 0x12d   :  { %750 = vmatmul.msk.bf16.gmra.mxu2 %vm42_vm0, %v447_v57  ;;  %774 = vmatmul.msk.bf16.gmra.mxu3 %vm42_vm0, %v447_v57  ;;  %v367_v42 = vmul.f32 %v873_v39, %v1376_v52  ;;  %v361_v58 = vmul.f32 %v869_v6, %v360_v40  ;;  %v380_v14 = vsub.f32 1.5, %v379_v0  ;;  %vm373_vm9 = vweird.f32 %v873_v39  ;;  %vm384_vm13 = vmor %vm382_vm10, %vm383_vm11 }
 0x12e   :  { %v1423_v43 = vadd.f32 %v1278_v53, %v408_v23  ;;  %v1462_v31 = vadd.f32 %v1278_v53, %v418_v63  ;;  %vm374_vm12 = vmor %vm372_vm8, %vm373_vm9  ;;  %v411_v49 = vmul.f32 %v1248_v35, %v391_v4 }
 0x12f   :  { %v368_v47 = vmul.f32 %v873_v39, %v367_v42  ;;  %v365_v5 = vsel %vm364_vm5, %v869_v6, %v361_v58  ;;  %v381_v52 = vmul.f32 %v1386_v16, %v380_v14  ;;  %vm591_vm5 = vcmask 519168  }
 0x130   :  { %v443_v33 = vpack.c.bf16 %v1426_v18, %v1423_v43  ;;  %v399_v50 = vmul.f32 %v365_v5, %v1094_v19  ;;  %v390_v19 = vmul.f32 %v275_v62, %v1083_v30  ;;  %v1478_v7 = vadd.f32 %v1278_v53, %v411_v49 }
 0x131   :  { %v369_v60 = vmul.f32 0.5, %v368_v47  ;;  %v385_v59 = vsel %vm384_vm13, %v1386_v16, %v381_v52 }
 0x132   :  { %746 = vmatmul.msk.bf16.gmra.mxu0 %vm42_vm0, %v443_v33  ;;  %770 = vmatmul.msk.bf16.gmra.mxu1 %vm42_vm0, %v443_v33  ;;  %v419_v61 = vmul.f32 %v1248_v35, %v399_v50  ;;  %v410_v30 = vmul.f32 %v1248_v35, %v390_v19  ;;  %v401_v9 = vmul.f32 %v385_v59, %v1099_v38 }
 0x133   :  { %v370_v3 = vsub.f32 1.5, %v369_v60 }
 0x134   :  { %v1459_v20 = vadd.f32 %v1278_v53, %v419_v61  ;;  %v1475_v36 = vadd.f32 %v1278_v53, %v410_v30  ;;  %v421_v16 = vmul.f32 %v1248_v35, %v401_v9 }
 0x135   :  { %v371_v6 = vmul.f32 %v873_v39, %v370_v3 }
 0x136   :  { %v448_v26 = vpack.c.bf16 %v1459_v20, %v1462_v31  ;;  %v444_v25 = vpack.c.bf16 %v1478_v7, %v1475_v36  ;;  %v1492_v48 = vadd.f32 %v1278_v53, %v421_v16 }
 0x137   :  { %v375_v12 = vsel %vm374_vm12, %v873_v39, %v371_v6 }
 0x138   :  { %v400_v10 = vmul.f32 %v375_v12, %v1108_v44 }
 0x13a   :  { %v420_v17 = vmul.f32 %v1248_v35, %v400_v10 }
 0x13c   :  { %v1489_v13 = vadd.f32 %v1278_v53, %v420_v17 }
 0x13d   :  { %751 = vmatmul.msk.bf16.gmra.mxu2 %vm42_vm0, %v448_v26  ;;  %775 = vmatmul.msk.bf16.gmra.mxu3 %vm42_vm0, %v448_v26 }
 0x13e   :  { %v449_v38 = vpack.c.bf16 %v1492_v48, %v1489_v13 }
 0x142   :  { %747 = vmatmul.msk.bf16.gmra.mxu0 %vm42_vm0, %v444_v25  ;;  %771 = vmatmul.msk.bf16.gmra.mxu1 %vm42_vm0, %v444_v25 }
 0x14d   :  { %752 = vmatmul.msk.bf16.gmra.mxu2 %vm42_vm0, %v449_v38  ;;  %776 = vmatmul.msk.bf16.gmra.mxu3 %vm42_vm0, %v449_v38 }
 0x174   :  { %v166_v44 = vpop.xlane.xlu0 %165 }
 0x175   :  { %v200_v22 = vmul.f32 %v166_v44, %v1005_v34 }
 0x177   :  { %v216_v27 = vadd.f32 1e-06, %v200_v22 }
 0x179   :  { %874 = vrsqrt.f32 %v216_v27  ;;  %vm292_vm14 = vweird.f32 %v216_v27 }
 0x17f   :  { %v875_v29 = vpop.eup %874 }
 0x180   :  { %v287_v56 = vmul.f32 %v875_v29, %v216_v27  ;;  %vm293_vm15 = vweird.f32 %v875_v29 }
 0x181   :  { %vm294_vm1 = vmor %vm292_vm14, %vm293_vm15 }
 0x182   :  { %v288_v57 = vmul.f32 %v875_v29, %v287_v56 }
 0x184   :  { %v289_v37 = vmul.f32 0.5, %v288_v57 }
 0x186   :  { %v169_v32 = vpop.xlane.xlu1 %168  ;;  %v290_v40 = vsub.f32 1.5, %v289_v37 }
 0x187   :  { %v201_v23 = vmul.f32 %v169_v32, %v1005_v34 }
 0x188   :  { %v291_v42 = vmul.f32 %v875_v29, %v290_v40 }
 0x189   :  { %v217_v39 = vadd.f32 1e-06, %v201_v23 }
 0x18a   :  { %v295_v28 = vsel %vm294_vm1, %v875_v29, %v291_v42 }
 0x18b   :  { %876 = vrsqrt.f32 %v217_v39  ;;  %v392_v47 = vmul.f32 %v295_v28, %v1149_v8  ;;  %vm302_vm3 = vweird.f32 %v217_v39 }
 0x18d   :  { %v412_v0 = vmul.f32 %v1248_v35, %v392_v47 }
 0x18f   :  { %v1511_v61 = vadd.f32 %v1278_v53, %v412_v0 }
 0x191   :  { %v877_v45 = vpop.eup %876 }
 0x192   :  { %v297_v46 = vmul.f32 %v877_v45, %v217_v39  ;;  %vm303_vm2 = vweird.f32 %v877_v45 }
 0x193   :  { %vm304_vm4 = vmor %vm302_vm3, %vm303_vm2 }
 0x194   :  { %v298_v24 = vmul.f32 %v877_v45, %v297_v46 }
 0x196   :  { %v299_v58 = vmul.f32 0.5, %v298_v24 }
 0x198   :  { %v300_v55 = vsub.f32 1.5, %v299_v58 }
 0x19a   :  { %v301_v33 = vmul.f32 %v877_v45, %v300_v55 }
 0x19c   :  { %v305_v34 = vsel %vm304_vm4, %v877_v45, %v301_v33 }
 0x19d   :  { %v393_v5 = vmul.f32 %v305_v34, %v1210_v2 }
 0x19f   :  { %v413_v50 = vmul.f32 %v1248_v35, %v393_v5  ;;  %v519_v8 = vpop.f32.mrf.mxu0  ;;  %v649_v3 = vpop.f32.mrf.mxu1 }
 0x1a0   :  { %v539_v60 = vpop.f32.mrf.mxu2  ;;  %v669_v62 = vpop.f32.mrf.mxu3  ;;  %v520_v4 = vadd.f32 %v1505_v41, %v519_v8 }
 0x1a1   :  { %v540_v63 = vadd.f32 %v1505_v41, %v539_v60  ;;  %v1514_v2 = vadd.f32 %v1278_v53, %v413_v50 }
 0x1a2   :  { %v559_v35 = vmul.f32 %v520_v4, %v1345_v15 }
 0x1a3   :  { %v567_v19 = vmul.f32 %v540_v63, %v1309_v1  ;;  %v445_v14 = vpack.c.bf16 %v1514_v2, %v1511_v61 }
 0x1a4   :  { %v575_v26 = vpack.c.bf16 %v559_v35, %v559_v35 }
 0x1a5   :  { %v583_v6 = vpack.c.bf16 %v567_v19, %v567_v19  ;;  %748 = vmatmul.msk.bf16.gmra.mxu0 %vm42_vm0, %v445_v14  ;;  %772 = vmatmul.msk.bf16.gmra.mxu1 %vm42_vm0, %v445_v14 }
 0x1a6   :  { %592 = vst.msk [vmem:[%s1645_s6] sm:$0xf] %vm591_vm5, %v575_v26 }
 0x1a7   :  { %600 = vst.msk [vmem:[%s1645_s6 + $0x20] sm:$0xf] %vm591_vm5, %v583_v6  ;;  %v521_v30 = vpop.f32.mrf.mxu0  ;;  %v651_v49 = vpop.f32.mrf.mxu1 }
 0x1a8   :  { %v541_v53 = vpop.f32.mrf.mxu2  ;;  %v671_v1 = vpop.f32.mrf.mxu3  ;;  %v522_v12 = vadd.f32 %v1505_v41, %v521_v30  ;;  %v788_v59 = vpack.c.bf16 %v651_v49, %v649_v3 }
 0x1a9   :  { %v542_v15 = vadd.f32 %v1505_v41, %v541_v53  ;;  %v808_v52 = vpack.c.bf16 %v671_v1, %v669_v62 }
 0x1aa   :  { %v560_v9 = vmul.f32 %v522_v12, %v1360_v51  ;;  %789 = vst [vmem:[%s1646_s7] sm:$0xff] %v788_v59  }
 0x1ab   :  { %v568_v10 = vmul.f32 %v542_v15, %v1312_v21  ;;  %828 = vst [vmem:[%s1646_s7 + $0x20] sm:$0xff] %v808_v52  }
 0x1ac   :  { %v576_v17 = vpack.c.bf16 %v560_v9, %v560_v9 }
 0x1ad   :  { %v584_v25 = vpack.c.bf16 %v568_v10, %v568_v10 }
 0x1ae   :  { %593 = vst.msk [vmem:[%s1645_s6 + $0x4] sm:$0xf] %vm591_vm5, %v576_v17 }
 0x1af   :  { %601 = vst.msk [vmem:[%s1645_s6 + $0x24] sm:$0xf] %vm591_vm5, %v584_v25  ;;  %v524_v38 = vpop.f32.mrf.mxu0  ;;  %v654_v44 = vpop.f32.mrf.mxu1 }
 0x1b0   :  { %v544_v21 = vpop.f32.mrf.mxu2  ;;  %v674_v16 = vpop.f32.mrf.mxu3  ;;  %v525_v22 = vadd.f32 %v1505_v41, %v524_v38 }
 0x1b1   :  { %v545_v51 = vadd.f32 %v1505_v41, %v544_v21 }
 0x1b2   :  { %v561_v29 = vmul.f32 %v525_v22, %v1423_v43 }
 0x1b3   :  { %v569_v27 = vmul.f32 %v545_v51, %v1384_v11 }
 0x1b4   :  { %v577_v57 = vpack.c.bf16 %v561_v29, %v561_v29 }
 0x1b5   :  { %v585_v56 = vpack.c.bf16 %v569_v27, %v569_v27 }
 0x1b6   :  { %594 = vst.msk [vmem:[%s1645_s6 + $0x8] sm:$0xf] %vm591_vm5, %v577_v57 }
 0x1b7   :  { %602 = vst.msk [vmem:[%s1645_s6 + $0x28] sm:$0xf] %vm591_vm5, %v585_v56  ;;  %v526_v11 = vpop.f32.mrf.mxu0  ;;  %v656_v40 = vpop.f32.mrf.mxu1 }
 0x1b8   :  { %v546_v32 = vpop.f32.mrf.mxu2  ;;  %v676_v23 = vpop.f32.mrf.mxu3  ;;  %v527_v43 = vadd.f32 %v1505_v41, %v526_v11  ;;  %v793_v45 = vpack.c.bf16 %v656_v40, %v654_v44 }
 0x1b9   :  { %v547_v39 = vadd.f32 %v1505_v41, %v546_v32  ;;  %v813_v37 = vpack.c.bf16 %v676_v23, %v674_v16 }
 0x1ba   :  { %v562_v46 = vmul.f32 %v527_v43, %v1426_v18  ;;  %825 = vst [vmem:[%s1646_s7 + $0x8] sm:$0xff] %v793_v45  }
 0x1bb   :  { %v570_v42 = vmul.f32 %v547_v39, %v1391_v54  ;;  %829 = vst [vmem:[%s1646_s7 + $0x28] sm:$0xff] %v813_v37  }
 0x1bc   :  { %v578_v28 = vpack.c.bf16 %v562_v46, %v562_v46 }
 0x1bd   :  { %v586_v24 = vpack.c.bf16 %v570_v42, %v570_v42 }
 0x1be   :  { %595 = vst.msk [vmem:[%s1645_s6 + $0xc] sm:$0xf] %vm591_vm5, %v578_v28 }
 0x1bf   :  { %603 = vst.msk [vmem:[%s1645_s6 + $0x2c] sm:$0xf] %vm591_vm5, %v586_v24  ;;  %v529_v55 = vpop.f32.mrf.mxu0  ;;  %v659_v47 = vpop.f32.mrf.mxu1 }
 0x1c0   :  { %v549_v54 = vpop.f32.mrf.mxu2  ;;  %v679_v58 = vpop.f32.mrf.mxu3  ;;  %v530_v33 = vadd.f32 %v1505_v41, %v529_v55 }
 0x1c1   :  { %v550_v18 = vadd.f32 %v1505_v41, %v549_v54 }
 0x1c2   :  { %v563_v5 = vmul.f32 %v530_v33, %v1475_v36 }
 0x1c3   :  { %v571_v34 = vmul.f32 %v550_v18, %v1462_v31 }
 0x1c4   :  { %v579_v50 = vpack.c.bf16 %v563_v5, %v563_v5 }
 0x1c5   :  { %v587_v0 = vpack.c.bf16 %v571_v34, %v571_v34 }
 0x1c6   :  { %596 = vst.msk [vmem:[%s1645_s6 + $0x10] sm:$0xf] %vm591_vm5, %v579_v50 }
 0x1c7   :  { %604 = vst.msk [vmem:[%s1645_s6 + $0x30] sm:$0xf] %vm591_vm5, %v587_v0  ;;  %v531_v31 = vpop.f32.mrf.mxu0  ;;  %v661_v3 = vpop.f32.mrf.mxu1 }
 0x1c8   :  { %v551_v60 = vpop.f32.mrf.mxu2  ;;  %v681_v62 = vpop.f32.mrf.mxu3  ;;  %v532_v36 = vadd.f32 %v1505_v41, %v531_v31  ;;  %v798_v4 = vpack.c.bf16 %v661_v3, %v659_v47 }
 0x1c9   :  { %v552_v63 = vadd.f32 %v1505_v41, %v551_v60  ;;  %v818_v8 = vpack.c.bf16 %v681_v62, %v679_v58 }
 0x1ca   :  { %v564_v14 = vmul.f32 %v532_v36, %v1478_v7  ;;  %826 = vst [vmem:[%s1646_s7 + $0x10] sm:$0xff] %v798_v4  }
 0x1cb   :  { %v572_v19 = vmul.f32 %v552_v63, %v1459_v20  ;;  %830 = vst [vmem:[%s1646_s7 + $0x30] sm:$0xff] %v818_v8  }
 0x1cc   :  { %v580_v6 = vpack.c.bf16 %v564_v14, %v564_v14 }
 0x1cd   :  { %v588_v35 = vpack.c.bf16 %v572_v19, %v572_v19 }
 0x1ce   :  { %597 = vst.msk [vmem:[%s1645_s6 + $0x14] sm:$0xf] %vm591_vm5, %v580_v6 }
 0x1cf   :  { %605 = vst.msk [vmem:[%s1645_s6 + $0x34] sm:$0xf] %vm591_vm5, %v588_v35 }
 0x1d0   :  { %v554_v20 = vpop.f32.mrf.mxu2  ;;  %v684_v26 = vpop.f32.mrf.mxu3 }
 0x1d1   :  { %v555_v7 = vadd.f32 %v1505_v41, %v554_v20 }
 0x1d3   :  { %v573_v53 = vmul.f32 %v555_v7, %v1489_v13 }
 0x1d5   :  { %v589_v1 = vpack.c.bf16 %v573_v53, %v573_v53 }
 0x1d7   :  { %606 = vst.msk [vmem:[%s1645_s6 + $0x38] sm:$0xf] %vm591_vm5, %v589_v1 }
 0x1d8   :  { %v556_v15 = vpop.f32.mrf.mxu2  ;;  %v686_v52 = vpop.f32.mrf.mxu3 }
 0x1d9   :  { %v557_v30 = vadd.f32 %v1505_v41, %v556_v15  ;;  %v823_v49 = vpack.c.bf16 %v686_v52, %v684_v26 }
 0x1db   :  { %v574_v12 = vmul.f32 %v557_v30, %v1492_v48  ;;  %831 = vst [vmem:[%s1646_s7 + $0x38] sm:$0xff] %v823_v49  }
 0x1dd   :  { %v590_v59 = vpack.c.bf16 %v574_v12, %v574_v12 }
 0x1df   :  { %607 = vst.msk [vmem:[%s1645_s6 + $0x3c] sm:$0xf] %vm591_vm5, %v590_v59 }
 0x222   :  { %v534_v13 = vpop.f32.mrf.mxu0  ;;  %v664_v10 = vpop.f32.mrf.mxu1 }
 0x223   :  { %v535_v9 = vadd.f32 %v1505_v41, %v534_v13 }
 0x225   :  { %v565_v25 = vmul.f32 %v535_v9, %v1511_v61 }
 0x227   :  { %v581_v17 = vpack.c.bf16 %v565_v25, %v565_v25 }
 0x229   :  { %598 = vst.msk [vmem:[%s1645_s6 + $0x18] sm:$0xf] %vm591_vm5, %v581_v17 }
 0x22a   :  { %v536_v48 = vpop.f32.mrf.mxu0  ;;  %v666_v21 = vpop.f32.mrf.mxu1 }
 0x22b   :  { %v537_v16 = vadd.f32 %v1505_v41, %v536_v48  ;;  %v803_v51 = vpack.c.bf16 %v666_v21, %v664_v10 }
 0x22d   :  { %v566_v38 = vmul.f32 %v537_v16, %v1514_v2  ;;  %827 = vst [vmem:[%s1646_s7 + $0x18] sm:$0xff] %v803_v51  }
 0x22f   :  { %v582_v44 = vpack.c.bf16 %v566_v38, %v566_v38 }
 0x231   :  { %599 = vst.msk [vmem:[%s1645_s6 + $0x1c] sm:$0xf] %vm591_vm5, %v582_v44 }

// kernel: vss_block_forward.5
= control target key start
LH: loop header
LB: loop body
LE: loop exit
PB: predicated region body
PF: predicated region fallthrough
CT: control target
= control target key end

     0   :  { %s1356_s12 = smov 0   ;;  %s1358_s13 = smov 0   ;;  %s2063_s0 = inlined_call_operand.vmem [shape: bf16[2,10,10,128], index: 0, kind: input, shape index: {}]   ;;  %s2064_s1 = inlined_call_operand.vmem [shape: f32[9,1,128], index: 1, kind: input, shape index: {}]   ;;  %s2065_s2 = inlined_call_operand.vmem [shape: f32[1,1,128], index: 2, kind: input, shape index: {}]   ;;  %s2066_s3 = inlined_call_operand.vmem [shape: bf16[2,8,8,128], index: 3, kind: output, shape index: {}]  }
   0x1   :  { %s1360_s14 = smov 0  }
   0x2 LB: > { %s25_s15 = sadd.s32 1, %s1330_s13  ;;  %p1159_p0 = scmp.ge.s32.totalorder %s1334_s14, 1  ;;  %s1334_s14 = sphi %s1360_s14, %s13_s14   ;;  %s1330_s13 = sphi %s1358_s13, %s2096_s13   ;;  %s1326_s12 = sphi %s1356_s12, %s2095_s12  }
   0x3   : > { %p27_p1 = scmp.ge.s32.totalorder %s25_s15, 2  ;;  %p151_p2 = scmp.lt.s32.totalorder %s1334_s14, 3 }
   0x5   : > { %s2098_s15 = smov (%p27_p1, %s25_s15), 0  ;;  %p152_p3 = pnand %p1159_p0, %p151_p2 }
   0x6   : > { %p179_p4 = scmp.lt.s32.totalorder (!%p152_p3), %s1326_s12, 1 }
   0x7   : > { %155 = sbr.rel (%p152_p3) target bundleno = 173 (0xad), region = 32 }
   0xc   : > { %s2100_s12 = smov (!%p179_p4, %s1326_s12), 1  ;;  %v1270_v0 = vld [vmem:[%s2064_s1] ss:$0 sm:$0xff]  ;;  %v1271_v9 = vld [vmem:[%s2064_s1 + $0x1] ss:$0 sm:$0xff]  ;;  %vm287_vm0 = vcmask 1046528  }
   0xd   : > { %s1245_s16 = smul.u32 80, %s2100_s12  ;;  %vm381_vm1 = vcmask 1045504   ;;  %s1221_s17 = sshll.u32 %s2100_s12, 5 }
   0xf   : > { %s1380_s19 = scalar_lea.vmem %s2063_s0, %s1245_s16 }
  0x10   : > { %v198_v1 = vld [vmem:[%s1380_s19] sm:$0xf]  ;;  %v199_v2 = vld [vmem:[%s1380_s19 + $0x8] sm:$0xf]  ;;  %v200_v3 = vld [vmem:[%s1380_s19 + $0x10] sm:$0xf] }
  0x11   : > { %v201_v4 = vld [vmem:[%s1380_s19 + $0x18] sm:$0xf]  ;;  %v202_v5 = vld [vmem:[%s1380_s19 + $0x20] sm:$0xf]  ;;  %v203_v6 = vld [vmem:[%s1380_s19 + $0x28] sm:$0xf]  ;;  %v206_v7 = vunpack.c.l.bf16 %v198_v1  ;;  %v207_v8 = vunpack.c.l.bf16 %v199_v2  ;;  %v208_v12 = vunpack.c.l.bf16 %v200_v3 }
  0x12   : > { %v204_v10 = vld [vmem:[%s1380_s19 + $0x30] sm:$0xf]  ;;  %v205_v11 = vld [vmem:[%s1380_s19 + $0x38] sm:$0xf]  ;;  %v209_v13 = vunpack.c.l.bf16 %v201_v4  ;;  %v210_v14 = vunpack.c.l.bf16 %v202_v5  ;;  %v211_v15 = vunpack.c.l.bf16 %v203_v6  ;;  %v1397_v16 = vld [vmem:[%s1380_s19 + $0x4] sm:$0x1] }
  0x13   : > { %v212_v17 = vunpack.c.l.bf16 %v204_v10  ;;  %v213_v18 = vunpack.c.l.bf16 %v205_v11  ;;  %v218_v19 = vmul.f32 %v1270_v0, %v206_v7  ;;  %v1399_v20 = vmul.f32 %v1270_v0, %v207_v8  ;;  %v1402_v21 = vld [vmem:[%s1380_s19 + $0xc] sm:$0x1]  ;;  %v1405_v22 = vld [vmem:[%s1380_s19 + $0x14] sm:$0x1]  ;;  %v1408_v23 = vld [vmem:[%s1380_s19 + $0x1c] sm:$0x1] }
  0x14   : > { %v1410_v24 = vmul.f32 %v1270_v0, %v208_v12  ;;  %v1412_v25 = vmul.f32 %v1270_v0, %v209_v13  ;;  %v1414_v26 = vmul.f32 %v1270_v0, %v210_v14  ;;  %v1416_v27 = vmul.f32 %v1270_v0, %v211_v15  ;;  %v1419_v28 = vld [vmem:[%s1380_s19 + $0x24] sm:$0x1]  ;;  %v1422_v29 = vld [vmem:[%s1380_s19 + $0x2c] sm:$0x1]  ;;  %v1425_v30 = vld [vmem:[%s1380_s19 + $0x34] sm:$0x1] }
  0x15   : > { %v1427_v31 = vmul.f32 %v1270_v0, %v212_v17  ;;  %v1429_v32 = vmul.f32 %v1270_v0, %v213_v18  ;;  %v1432_v33 = vld [vmem:[%s1380_s19 + $0x3c] sm:$0x1]  ;;  %v242_v34 = vunpack.c.l.bf16 %v1397_v16  ;;  %v243_v35 = vunpack.c.l.bf16 %v1402_v21 }
  0x16   : > { %v244_v36 = vunpack.c.l.bf16 %v1405_v22  ;;  %v245_v37 = vunpack.c.l.bf16 %v1408_v23  ;;  %v246_v38 = vunpack.c.l.bf16 %v1419_v28  ;;  %v247_v39 = vunpack.c.l.bf16 %v1422_v29 }
  0x17   : > { %v248_v40 = vunpack.c.l.bf16 %v1425_v30  ;;  %v249_v41 = vunpack.c.l.bf16 %v1432_v33  ;;  %v255_v42 = vmul.f32 %v1271_v9, %v206_v7  ;;  %v256_v43 = vmul.f32 %v1271_v9, %v242_v34 }
  0x18   : > { %v257_v44 = vmul.f32 %v1271_v9, %v207_v8  ;;  %v258_v45 = vmul.f32 %v1271_v9, %v243_v35  ;;  %v259_v46 = vmul.f32 %v1271_v9, %v208_v12  ;;  %v260_v47 = vmul.f32 %v1271_v9, %v244_v36  ;;  %v328_v12 = vld [vmem:[%s1380_s19] sm:$0xe] }
  0x19   : > { %v261_v48 = vmul.f32 %v1271_v9, %v209_v13  ;;  %v262_v49 = vmul.f32 %v1271_v9, %v245_v37  ;;  %v263_v50 = vmul.f32 %v1271_v9, %v210_v14  ;;  %v264_v51 = vmul.f32 %v1271_v9, %v246_v38  ;;  %v1272_v13 = vld [vmem:[%s2064_s1 + $0x2] ss:$0 sm:$0xff] }
  0x1a   : > { %v265_v52 = vmul.f32 %v1271_v9, %v211_v15  ;;  %v266_v53 = vmul.f32 %v1271_v9, %v247_v39  ;;  %v267_v54 = vmul.f32 %v1271_v9, %v212_v17  ;;  %v268_v55 = vmul.f32 %v1271_v9, %v248_v40 }
  0x1b   : > { %v269_v56 = vmul.f32 %v1271_v9, %v213_v18  ;;  %v270_v57 = vmul.f32 %v1271_v9, %v249_v41  ;;  %v288_v58 = vrot.slane %v255_v42, 1  ;;  %v289_v59 = vrot.slane %v256_v43, 1  ;;  %v329_v42 = vld [vmem:[%s1380_s19 + $0x8] sm:$0xe]  ;;  %v330_v43 = vld [vmem:[%s1380_s19 + $0x10] sm:$0xe] }
  0x1c   : > { %v291_v60 = vrot.slane %v257_v44, 1  ;;  %v292_v61 = vrot.slane %v258_v45, 1  ;;  %v294_v62 = vrot.slane %v259_v46, 1  ;;  %v295_v63 = vrot.slane %v260_v47, 1 }
  0x1d   : > { %v290_v0 = vsel %vm287_vm0, %v288_v58, %v289_v59  ;;  %v297_v1 = vrot.slane %v261_v48, 1  ;;  %v298_v2 = vrot.slane %v262_v49, 1  ;;  %v300_v3 = vrot.slane %v263_v50, 1  ;;  %v331_v48 = vld [vmem:[%s1380_s19 + $0x18] sm:$0xe] }
  0x1e   : > { %v293_v4 = vsel %vm287_vm0, %v291_v60, %v292_v61  ;;  %v296_v5 = vsel %vm287_vm0, %v294_v62, %v295_v63  ;;  %v301_v6 = vrot.slane %v264_v51, 1  ;;  %v303_v7 = vrot.slane %v265_v52, 1  ;;  %v332_v49 = vld [vmem:[%s1380_s19 + $0x20] sm:$0xe]  ;;  %v333_v50 = vld [vmem:[%s1380_s19 + $0x28] sm:$0xe] }
  0x1f   : > { %v299_v8 = vsel %vm287_vm0, %v297_v1, %v298_v2  ;;  %v304_v9 = vrot.slane %v266_v53, 1  ;;  %v306_v10 = vrot.slane %v267_v54, 1  ;;  %v307_v11 = vrot.slane %v268_v55, 1  ;;  %v334_v54 = vld [vmem:[%s1380_s19 + $0x30] sm:$0xe] }
  0x20   : > { %v302_v14 = vsel %vm287_vm0, %v300_v3, %v301_v6  ;;  %v309_v15 = vrot.slane %v269_v56, 1  ;;  %v310_v17 = vrot.slane %v270_v57, 1  ;;  %v1467_v18 = vadd.f32 %v290_v0, %v218_v19 }
  0x21   : > { %v305_v44 = vsel %vm287_vm0, %v303_v7, %v304_v9  ;;  %v308_v45 = vsel %vm287_vm0, %v306_v10, %v307_v11  ;;  %v1474_v46 = vadd.f32 %v293_v4, %v1399_v20  ;;  %v1477_v47 = vadd.f32 %v296_v5, %v1410_v24  ;;  %v335_v20 = vld [vmem:[%s1380_s19 + $0x38] sm:$0xe]  ;;  %v1520_v9 = vld [vmem:[%s1380_s19 + $0x8] sm:$0xf] }
  0x22   : > { %v311_v19 = vsel %vm287_vm0, %v309_v15, %v310_v17  ;;  %v1484_v51 = vadd.f32 %v299_v8, %v1412_v25  ;;  %v1487_v52 = vadd.f32 %v302_v14, %v1414_v26  ;;  %v1490_v53 = vadd.f32 %v305_v44, %v1416_v27  ;;  %v1524_v14 = vld [vmem:[%s1380_s19 + $0x10] sm:$0xf]  ;;  %v1529_v44 = vld [vmem:[%s1380_s19 + $0x18] sm:$0xf] }
  0x23   : > { %v1495_v55 = vadd.f32 %v308_v45, %v1427_v31  ;;  %v1498_v24 = vadd.f32 %v311_v19, %v1429_v32  ;;  %v336_v56 = vunpack.c.l.bf16 %v328_v12  ;;  %v337_v57 = vunpack.c.l.bf16 %v329_v42  ;;  %v1532_v45 = vld [vmem:[%s1380_s19 + $0x20] sm:$0xf] }
  0x24   : > { %v338_v58 = vunpack.c.l.bf16 %v330_v43  ;;  %v339_v59 = vunpack.c.l.bf16 %v331_v48  ;;  %v340_v25 = vunpack.c.l.bf16 %v332_v49  ;;  %v341_v60 = vunpack.c.l.bf16 %v333_v50 }
  0x25   : > { %v342_v61 = vunpack.c.l.bf16 %v334_v54  ;;  %v343_v26 = vunpack.c.l.bf16 %v335_v20  ;;  %v349_v62 = vmul.f32 %v1272_v13, %v336_v56  ;;  %v350_v27 = vmul.f32 %v1272_v13, %v242_v34  ;;  %v1169_v54 = vld [vmem:[%s1380_s19 + $0x28] sm:$0xf]  ;;  %v1170_v20 = vld [vmem:[%s1380_s19 + $0x30] sm:$0xf]  ;;  %v1273_v56 = vld [vmem:[%s2064_s1 + $0x3] ss:$0 sm:$0xff] }
  0x26   : > { %v351_v63 = vmul.f32 %v1272_v13, %v337_v57  ;;  %v352_v31 = vmul.f32 %v1272_v13, %v243_v35  ;;  %v353_v0 = vmul.f32 %v1272_v13, %v338_v58  ;;  %v354_v32 = vmul.f32 %v1272_v13, %v244_v36 }
  0x27   : > { %v355_v1 = vmul.f32 %v1272_v13, %v339_v59  ;;  %v356_v2 = vmul.f32 %v1272_v13, %v245_v37  ;;  %v357_v3 = vmul.f32 %v1272_v13, %v340_v25  ;;  %v358_v4 = vmul.f32 %v1272_v13, %v246_v38  ;;  %v1171_v25 = vld [vmem:[%s1380_s19 + $0x38] sm:$0xf] }
  0x28   : > { %v359_v5 = vmul.f32 %v1272_v13, %v341_v60  ;;  %v360_v16 = vmul.f32 %v1272_v13, %v247_v39  ;;  %v361_v34 = vmul.f32 %v1272_v13, %v342_v61  ;;  %v362_v21 = vmul.f32 %v1272_v13, %v248_v40  ;;  %v1172_v60 = vld [vmem:[%s1380_s19 + $0x40] sm:$0xf] }
  0x29   : > { %v363_v35 = vmul.f32 %v1272_v13, %v343_v26  ;;  %v364_v22 = vmul.f32 %v1272_v13, %v249_v41  ;;  %v382_v36 = vrot.slane %v349_v62, 2  ;;  %v383_v23 = vrot.slane %v350_v27, 2 }
  0x2a   : > { %v385_v37 = vrot.slane %v351_v63, 2  ;;  %v386_v6 = vrot.slane %v352_v31, 2  ;;  %v388_v28 = vrot.slane %v353_v0, 2  ;;  %v389_v38 = vrot.slane %v354_v32, 2 }
  0x2b   : > { %v384_v7 = vsel %vm381_vm1, %v382_v36, %v383_v23  ;;  %v391_v29 = vrot.slane %v355_v1, 2  ;;  %v392_v39 = vrot.slane %v356_v2, 2  ;;  %v394_v8 = vrot.slane %v357_v3, 2  ;;  %v1559_v3 = vld [vmem:[%s1380_s19 + $0x14] sm:$0x1] }
  0x2c   : > { %v387_v30 = vsel %vm381_vm1, %v385_v37, %v386_v6  ;;  %v390_v33 = vsel %vm381_vm1, %v388_v28, %v389_v38  ;;  %v395_v40 = vrot.slane %v358_v4, 2  ;;  %v397_v41 = vrot.slane %v359_v5, 2  ;;  %v1562_v4 = vld [vmem:[%s1380_s19 + $0x1c] sm:$0x1]  ;;  %v1565_v5 = vld [vmem:[%s1380_s19 + $0x24] sm:$0x1] }
  0x2d   : > { %v393_v10 = vsel %vm381_vm1, %v391_v29, %v392_v39  ;;  %v398_v11 = vrot.slane %v360_v16, 2  ;;  %v400_v12 = vrot.slane %v361_v34, 2  ;;  %v401_v13 = vrot.slane %v362_v21, 2  ;;  %v1573_v36 = vld [vmem:[%s1380_s19 + $0x34] sm:$0x1] }
  0x2e   : > { %v396_v15 = vsel %vm381_vm1, %v394_v8, %v395_v40  ;;  %v403_v17 = vrot.slane %v363_v35, 2  ;;  %v404_v42 = vrot.slane %v364_v22, 2  ;;  %v414_v43 = vadd.f32 %v384_v7, %v1467_v18  ;;  %v1570_v22 = vld [vmem:[%s1380_s19 + $0x2c] sm:$0x1]  ;;  %v1274_v23 = vld [vmem:[%s2064_s1 + $0x4] ss:$0 sm:$0xff] }
  0x2f   : > { %v399_v48 = vsel %vm381_vm1, %v397_v41, %v398_v11  ;;  %v402_v49 = vsel %vm381_vm1, %v400_v12, %v401_v13  ;;  %v415_v50 = vadd.f32 %v387_v30, %v1474_v46  ;;  %v416_v19 = vadd.f32 %v390_v33, %v1477_v47  ;;  %v1585_v7 = vld [vmem:[%s1380_s19 + $0x3c] sm:$0x1]  ;;  %v1588_v29 = vld [vmem:[%s1380_s19 + $0x44] sm:$0x1] }
  0x30   : > { %v405_v18 = vsel %vm381_vm1, %v403_v17, %v404_v42  ;;  %v417_v57 = vadd.f32 %v393_v10, %v1484_v51  ;;  %v418_v58 = vadd.f32 %v396_v15, %v1487_v52  ;;  %v419_v59 = vadd.f32 %v399_v48, %v1490_v53 }
  0x31   : > { %v420_v46 = vadd.f32 %v402_v49, %v1495_v55  ;;  %v421_v47 = vadd.f32 %v405_v18, %v1498_v24  ;;  %v434_v61 = vunpack.c.l.bf16 %v1520_v9  ;;  %v435_v26 = vunpack.c.l.bf16 %v1524_v14  ;;  %v1556_v24 = vld [vmem:[%s1380_s19 + $0xc] sm:$0x1] }
  0x32   : > { %v436_v51 = vunpack.c.l.bf16 %v1529_v44  ;;  %v437_v52 = vunpack.c.l.bf16 %v1532_v45  ;;  %v438_v62 = vunpack.c.l.bf16 %v1169_v54  ;;  %v439_v27 = vunpack.c.l.bf16 %v1170_v20 }
  0x33   : > { %v440_v53 = vunpack.c.l.bf16 %v1171_v25  ;;  %v441_v63 = vunpack.c.l.bf16 %v1172_v60  ;;  %v447_v55 = vmul.f32 %v1273_v56, %v434_v61  ;;  %v448_v31 = vmul.f32 %v1273_v56, %v435_v26 }
  0x34   : > { %v449_v0 = vmul.f32 %v1273_v56, %v436_v51  ;;  %v450_v32 = vmul.f32 %v1273_v56, %v437_v52  ;;  %v451_v1 = vmul.f32 %v1273_v56, %v438_v62  ;;  %v452_v2 = vmul.f32 %v1273_v56, %v439_v27 }
  0x35   : > { %v453_v16 = vmul.f32 %v1273_v56, %v440_v53  ;;  %v454_v34 = vmul.f32 %v1273_v56, %v441_v63  ;;  %v455_v21 = vadd.f32 %v447_v55, %v414_v43  ;;  %v1567_v35 = vadd.f32 %v448_v31, %v415_v50 }
  0x36   : > { %v457_v37 = vadd.f32 %v449_v0, %v416_v19  ;;  %v1578_v6 = vadd.f32 %v450_v32, %v417_v57  ;;  %v1580_v28 = vadd.f32 %v451_v1, %v418_v58  ;;  %v1582_v38 = vadd.f32 %v452_v2, %v419_v59  ;;  %v1184_v1 = vld [vmem:[%s1380_s19 + $0x10] sm:$0xe] }
  0x37   : > { %v1590_v39 = vadd.f32 %v453_v16, %v420_v46  ;;  %v1592_v8 = vadd.f32 %v454_v34, %v421_v47  ;;  %v471_v30 = vunpack.c.l.bf16 %v1556_v24  ;;  %v472_v33 = vunpack.c.l.bf16 %v1559_v3 }
  0x38   : > { %v473_v40 = vunpack.c.l.bf16 %v1562_v4  ;;  %v474_v41 = vunpack.c.l.bf16 %v1565_v5  ;;  %v475_v9 = vunpack.c.l.bf16 %v1570_v22  ;;  %v476_v10 = vunpack.c.l.bf16 %v1573_v36 }
  0x39   : > { %v477_v11 = vunpack.c.l.bf16 %v1585_v7  ;;  %v478_v12 = vunpack.c.l.bf16 %v1588_v29  ;;  %v484_v13 = vmul.f32 %v1274_v23, %v434_v61  ;;  %v485_v14 = vmul.f32 %v1274_v23, %v471_v30 }
  0x3a   : > { %v486_v15 = vmul.f32 %v1274_v23, %v435_v26  ;;  %v487_v17 = vmul.f32 %v1274_v23, %v472_v33  ;;  %v488_v42 = vmul.f32 %v1274_v23, %v436_v51  ;;  %v489_v43 = vmul.f32 %v1274_v23, %v473_v40 }
  0x3b   : > { %v490_v44 = vmul.f32 %v1274_v23, %v437_v52  ;;  %v491_v45 = vmul.f32 %v1274_v23, %v474_v41  ;;  %v492_v48 = vmul.f32 %v1274_v23, %v438_v62  ;;  %v493_v49 = vmul.f32 %v1274_v23, %v475_v9 }
  0x3c   : > { %v494_v50 = vmul.f32 %v1274_v23, %v439_v27  ;;  %v495_v19 = vmul.f32 %v1274_v23, %v476_v10  ;;  %v496_v54 = vmul.f32 %v1274_v23, %v440_v53  ;;  %v497_v20 = vmul.f32 %v1274_v23, %v477_v11 }
  0x3d   : > { %v498_v56 = vmul.f32 %v1274_v23, %v441_v63  ;;  %v499_v18 = vmul.f32 %v1274_v23, %v478_v12  ;;  %v516_v57 = vrot.slane %v484_v13, 1  ;;  %v517_v58 = vrot.slane %v485_v14, 1  ;;  %v1183_v63 = vld [vmem:[%s1380_s19 + $0x8] sm:$0xe]  ;;  %v1185_v13 = vld [vmem:[%s1380_s19 + $0x18] sm:$0xe] }
  0x3e   : > { %v519_v59 = vrot.slane %v486_v15, 1  ;;  %v520_v25 = vrot.slane %v487_v17, 1  ;;  %v522_v60 = vrot.slane %v488_v42, 1  ;;  %v523_v46 = vrot.slane %v489_v43, 1  ;;  %v1186_v14 = vld [vmem:[%s1380_s19 + $0x20] sm:$0xe] }
  0x3f   : > { %v518_v47 = vsel %vm287_vm0, %v516_v57, %v517_v58  ;;  %v525_v61 = vrot.slane %v490_v44, 1  ;;  %v526_v26 = vrot.slane %v491_v45, 1  ;;  %v528_v51 = vrot.slane %v492_v48, 1  ;;  %v1187_v44 = vld [vmem:[%s1380_s19 + $0x28] sm:$0xe] }
  0x40   : > { %v521_v52 = vsel %vm287_vm0, %v519_v59, %v520_v25  ;;  %v524_v62 = vsel %vm287_vm0, %v522_v60, %v523_v46  ;;  %v529_v27 = vrot.slane %v493_v49, 1  ;;  %v531_v53 = vrot.slane %v494_v50, 1  ;;  %v1188_v45 = vld [vmem:[%s1380_s19 + $0x30] sm:$0xe]  ;;  %v1275_v48 = vld [vmem:[%s2064_s1 + $0x5] ss:$0 sm:$0xff] }
  0x41   : > { %v527_v55 = vsel %vm287_vm0, %v525_v61, %v526_v26  ;;  %v532_v31 = vrot.slane %v495_v19, 1  ;;  %v534_v0 = vrot.slane %v496_v54, 1  ;;  %v535_v32 = vrot.slane %v497_v20, 1 }
  0x42   : > { %v530_v2 = vsel %vm287_vm0, %v528_v51, %v529_v27  ;;  %v537_v16 = vrot.slane %v498_v56, 1  ;;  %v538_v34 = vrot.slane %v499_v18, 1  ;;  %v1625_v23 = vadd.f32 %v518_v47, %v455_v21 }
  0x43   : > { %v533_v15 = vsel %vm287_vm0, %v531_v53, %v532_v31  ;;  %v536_v17 = vsel %vm287_vm0, %v534_v0, %v535_v32  ;;  %v1632_v42 = vadd.f32 %v521_v52, %v1567_v35  ;;  %v1634_v43 = vadd.f32 %v524_v62, %v457_v37  ;;  %v1189_v35 = vld [vmem:[%s1380_s19 + $0x38] sm:$0xe]  ;;  %v1190_v37 = vld [vmem:[%s1380_s19 + $0x40] sm:$0xe] }
  0x44   : > { %v539_v21 = vsel %vm287_vm0, %v537_v16, %v538_v34  ;;  %v1643_v49 = vadd.f32 %v527_v55, %v1578_v6  ;;  %v1646_v50 = vadd.f32 %v530_v2, %v1580_v28  ;;  %v1649_v19 = vadd.f32 %v533_v15, %v1582_v38  ;;  %v1679_v55 = vld [vmem:[%s1380_s19 + $0x10] sm:$0xf]  ;;  %v1683_v2 = vld [vmem:[%s1380_s19 + $0x18] sm:$0xf]  ;;  %v1688_v15 = vld [vmem:[%s1380_s19 + $0x20] sm:$0xf] }
  0x45   : > { %v1654_v54 = vadd.f32 %v536_v17, %v1590_v39  ;;  %v1657_v20 = vadd.f32 %v539_v21, %v1592_v8  ;;  %v564_v56 = vunpack.c.l.bf16 %v1183_v63  ;;  %v565_v18 = vunpack.c.l.bf16 %v1184_v1  ;;  %v1691_v17 = vld [vmem:[%s1380_s19 + $0x28] sm:$0xf] }
  0x46   : > { %v566_v57 = vunpack.c.l.bf16 %v1185_v13  ;;  %v567_v58 = vunpack.c.l.bf16 %v1186_v14  ;;  %v568_v6 = vunpack.c.l.bf16 %v1187_v44  ;;  %v569_v59 = vunpack.c.l.bf16 %v1188_v45 }
  0x47   : > { %v570_v25 = vunpack.c.l.bf16 %v1189_v35  ;;  %v571_v28 = vunpack.c.l.bf16 %v1190_v37  ;;  %v577_v60 = vmul.f32 %v1275_v48, %v564_v56  ;;  %v578_v38 = vmul.f32 %v1275_v48, %v471_v30  ;;  %v1196_v35 = vld [vmem:[%s1380_s19 + $0x30] sm:$0xf]  ;;  %v1197_v37 = vld [vmem:[%s1380_s19 + $0x38] sm:$0xf]  ;;  %v1276_v56 = vld [vmem:[%s2064_s1 + $0x6] ss:$0 sm:$0xff] }
  0x48   : > { %v579_v46 = vmul.f32 %v1275_v48, %v565_v18  ;;  %v580_v39 = vmul.f32 %v1275_v48, %v472_v33  ;;  %v581_v47 = vmul.f32 %v1275_v48, %v566_v57  ;;  %v582_v8 = vmul.f32 %v1275_v48, %v473_v40 }
  0x49   : > { %v583_v61 = vmul.f32 %v1275_v48, %v567_v58  ;;  %v584_v26 = vmul.f32 %v1275_v48, %v474_v41  ;;  %v585_v51 = vmul.f32 %v1275_v48, %v568_v6  ;;  %v586_v52 = vmul.f32 %v1275_v48, %v475_v9  ;;  %v1198_v6 = vld [vmem:[%s1380_s19 + $0x40] sm:$0xf] }
  0x4a   : > { %v587_v62 = vmul.f32 %v1275_v48, %v569_v59  ;;  %v588_v24 = vmul.f32 %v1275_v48, %v476_v10  ;;  %v589_v30 = vmul.f32 %v1275_v48, %v570_v25  ;;  %v590_v3 = vmul.f32 %v1275_v48, %v477_v11  ;;  %v1199_v59 = vld [vmem:[%s1380_s19 + $0x48] sm:$0xf] }
  0x4b   : > { %v591_v33 = vmul.f32 %v1275_v48, %v571_v28  ;;  %v592_v4 = vmul.f32 %v1275_v48, %v478_v12  ;;  %v609_v40 = vrot.slane %v577_v60, 2  ;;  %v610_v5 = vrot.slane %v578_v38, 2 }
  0x4c   : > { %v612_v41 = vrot.slane %v579_v46, 2  ;;  %v613_v27 = vrot.slane %v580_v39, 2  ;;  %v615_v22 = vrot.slane %v581_v47, 2  ;;  %v616_v9 = vrot.slane %v582_v8, 2 }
  0x4d   : > { %v611_v53 = vsel %vm381_vm1, %v609_v40, %v610_v5  ;;  %v618_v36 = vrot.slane %v583_v61, 2  ;;  %v619_v10 = vrot.slane %v584_v26, 2  ;;  %v621_v63 = vrot.slane %v585_v51, 2  ;;  %v1718_v51 = vld [vmem:[%s1380_s19 + $0x1c] sm:$0x1] }
  0x4e   : > { %v614_v7 = vsel %vm381_vm1, %v612_v41, %v613_v27  ;;  %v617_v29 = vsel %vm381_vm1, %v615_v22, %v616_v9  ;;  %v622_v11 = vrot.slane %v586_v52, 2  ;;  %v624_v12 = vrot.slane %v587_v62, 2  ;;  %v1721_v52 = vld [vmem:[%s1380_s19 + $0x24] sm:$0x1]  ;;  %v1724_v62 = vld [vmem:[%s1380_s19 + $0x2c] sm:$0x1] }
  0x4f   : > { %v620_v31 = vsel %vm381_vm1, %v618_v36, %v619_v10  ;;  %v625_v0 = vrot.slane %v588_v24, 2  ;;  %v627_v32 = vrot.slane %v589_v30, 2  ;;  %v628_v1 = vrot.slane %v590_v3, 2  ;;  %v1732_v40 = vld [vmem:[%s1380_s19 + $0x3c] sm:$0x1] }
  0x50   : > { %v623_v16 = vsel %vm381_vm1, %v621_v63, %v622_v11  ;;  %v630_v34 = vrot.slane %v591_v33, 2  ;;  %v631_v13 = vrot.slane %v592_v4, 2  ;;  %v641_v14 = vadd.f32 %v611_v53, %v1625_v23  ;;  %v1729_v4 = vld [vmem:[%s1380_s19 + $0x34] sm:$0x1]  ;;  %v1277_v5 = vld [vmem:[%s2064_s1 + $0x7] ss:$0 sm:$0xff] }
  0x51   : > { %v626_v44 = vsel %vm381_vm1, %v624_v12, %v625_v0  ;;  %v629_v45 = vsel %vm381_vm1, %v627_v32, %v628_v1  ;;  %v642_v48 = vadd.f32 %v614_v7, %v1632_v42  ;;  %v643_v21 = vadd.f32 %v617_v29, %v1634_v43  ;;  %v1744_v53 = vld [vmem:[%s1380_s19 + $0x44] sm:$0x1]  ;;  %v1747_v36 = vld [vmem:[%s1380_s19 + $0x4c] sm:$0x1] }
  0x52   : > { %v632_v23 = vsel %vm381_vm1, %v630_v34, %v631_v13  ;;  %v644_v18 = vadd.f32 %v620_v31, %v1643_v49  ;;  %v645_v57 = vadd.f32 %v623_v16, %v1646_v50  ;;  %v646_v58 = vadd.f32 %v626_v44, %v1649_v19 }
  0x53   : > { %v647_v42 = vadd.f32 %v629_v45, %v1654_v54  ;;  %v648_v43 = vadd.f32 %v632_v23, %v1657_v20  ;;  %v661_v25 = vunpack.c.l.bf16 %v1679_v55  ;;  %v662_v28 = vunpack.c.l.bf16 %v1683_v2  ;;  %v1715_v20 = vld [vmem:[%s1380_s19 + $0x14] sm:$0x1] }
  0x54   : > { %v663_v49 = vunpack.c.l.bf16 %v1688_v15  ;;  %v664_v50 = vunpack.c.l.bf16 %v1691_v17  ;;  %v665_v60 = vunpack.c.l.bf16 %v1196_v35  ;;  %v666_v38 = vunpack.c.l.bf16 %v1197_v37 }
  0x55   : > { %v667_v19 = vunpack.c.l.bf16 %v1198_v6  ;;  %v668_v46 = vunpack.c.l.bf16 %v1199_v59  ;;  %v674_v54 = vmul.f32 %v1276_v56, %v661_v25  ;;  %v675_v39 = vmul.f32 %v1276_v56, %v662_v28 }
  0x56   : > { %v676_v47 = vmul.f32 %v1276_v56, %v663_v49  ;;  %v677_v8 = vmul.f32 %v1276_v56, %v664_v50  ;;  %v678_v61 = vmul.f32 %v1276_v56, %v665_v60  ;;  %v679_v26 = vmul.f32 %v1276_v56, %v666_v38 }
  0x57   : > { %v680_v24 = vmul.f32 %v1276_v56, %v667_v19  ;;  %v681_v30 = vmul.f32 %v1276_v56, %v668_v46  ;;  %v682_v3 = vadd.f32 %v674_v54, %v641_v14  ;;  %v1726_v33 = vadd.f32 %v675_v39, %v642_v48 }
  0x58   : > { %v684_v41 = vadd.f32 %v676_v47, %v643_v21  ;;  %v1737_v27 = vadd.f32 %v677_v8, %v644_v18  ;;  %v1739_v22 = vadd.f32 %v678_v61, %v645_v57  ;;  %v1741_v9 = vadd.f32 %v679_v26, %v646_v58  ;;  %v1211_v61 = vld [vmem:[%s1380_s19 + $0x18] sm:$0xe] }
  0x59   : > { %v1749_v10 = vadd.f32 %v680_v24, %v647_v42  ;;  %v1751_v63 = vadd.f32 %v681_v30, %v648_v43  ;;  %v698_v7 = vunpack.c.l.bf16 %v1715_v20  ;;  %v699_v29 = vunpack.c.l.bf16 %v1718_v51 }
  0x5a   : > { %v700_v11 = vunpack.c.l.bf16 %v1721_v52  ;;  %v701_v12 = vunpack.c.l.bf16 %v1724_v62  ;;  %v702_v55 = vunpack.c.l.bf16 %v1729_v4  ;;  %v703_v31 = vunpack.c.l.bf16 %v1732_v40 }
  0x5b   : > { %v704_v0 = vunpack.c.l.bf16 %v1744_v53  ;;  %v705_v32 = vunpack.c.l.bf16 %v1747_v36  ;;  %v711_v1 = vmul.f32 %v1277_v5, %v661_v25  ;;  %v712_v2 = vmul.f32 %v1277_v5, %v698_v7 }
  0x5c   : > { %v713_v16 = vmul.f32 %v1277_v5, %v662_v28  ;;  %v714_v34 = vmul.f32 %v1277_v5, %v699_v29  ;;  %v715_v13 = vmul.f32 %v1277_v5, %v663_v49  ;;  %v716_v14 = vmul.f32 %v1277_v5, %v700_v11 }
  0x5d   : > { %v717_v15 = vmul.f32 %v1277_v5, %v664_v50  ;;  %v718_v17 = vmul.f32 %v1277_v5, %v701_v12  ;;  %v719_v44 = vmul.f32 %v1277_v5, %v665_v60  ;;  %v720_v45 = vmul.f32 %v1277_v5, %v702_v55 }
  0x5e   : > { %v721_v48 = vmul.f32 %v1277_v5, %v666_v38  ;;  %v722_v21 = vmul.f32 %v1277_v5, %v703_v31  ;;  %v723_v35 = vmul.f32 %v1277_v5, %v667_v19  ;;  %v724_v37 = vmul.f32 %v1277_v5, %v704_v0 }
  0x5f   : > { %v725_v56 = vmul.f32 %v1277_v5, %v668_v46  ;;  %v726_v23 = vmul.f32 %v1277_v5, %v705_v32  ;;  %v743_v18 = vrot.slane %v711_v1, 1  ;;  %v744_v57 = vrot.slane %v712_v2, 1  ;;  %v1210_v46 = vld [vmem:[%s1380_s19 + $0x10] sm:$0xe]  ;;  %v1212_v1 = vld [vmem:[%s1380_s19 + $0x20] sm:$0xe] }
  0x60   : > { %v746_v58 = vrot.slane %v713_v16, 1  ;;  %v747_v6 = vrot.slane %v714_v34, 1  ;;  %v749_v59 = vrot.slane %v715_v13, 1  ;;  %v750_v42 = vrot.slane %v716_v14, 1  ;;  %v1213_v2 = vld [vmem:[%s1380_s19 + $0x28] sm:$0xe] }
  0x61   : > { %v745_v43 = vsel %vm287_vm0, %v743_v18, %v744_v57  ;;  %v752_v25 = vrot.slane %v717_v15, 1  ;;  %v753_v28 = vrot.slane %v718_v17, 1  ;;  %v755_v49 = vrot.slane %v719_v44, 1  ;;  %v1214_v15 = vld [vmem:[%s1380_s19 + $0x30] sm:$0xe] }
  0x62   : > { %v748_v50 = vsel %vm287_vm0, %v746_v58, %v747_v6  ;;  %v751_v60 = vsel %vm287_vm0, %v749_v59, %v750_v42  ;;  %v756_v38 = vrot.slane %v720_v45, 1  ;;  %v758_v19 = vrot.slane %v721_v48, 1  ;;  %v1215_v17 = vld [vmem:[%s1380_s19 + $0x38] sm:$0xe]  ;;  %v1278_v44 = vld [vmem:[%s2064_s1 + $0x8] ss:$0 sm:$0xff] }
  0x63   : > { %v754_v54 = vsel %vm287_vm0, %v752_v25, %v753_v28  ;;  %v759_v39 = vrot.slane %v722_v21, 1  ;;  %v761_v47 = vrot.slane %v723_v35, 1  ;;  %v762_v8 = vrot.slane %v724_v37, 1  ;;  %v1216_v35 = vld [vmem:[%s1380_s19 + $0x40] sm:$0xe] }
  0x64   : > { %v757_v26 = vsel %vm287_vm0, %v755_v49, %v756_v38  ;;  %v764_v24 = vrot.slane %v725_v56, 1  ;;  %v765_v30 = vrot.slane %v726_v23, 1  ;;  %v1784_v5 = vadd.f32 %v745_v43, %v682_v3  ;;  %v1217_v37 = vld [vmem:[%s1380_s19 + $0x48] sm:$0xe]  ;;  %s2020_s19 = scalar_lea.vmem %s2066_s3, %s1221_s17 }
  0x65   : > { %v760_v16 = vsel %vm287_vm0, %v758_v19, %v759_v39  ;;  %v763_v34 = vsel %vm287_vm0, %v761_v47, %v762_v8  ;;  %v1791_v13 = vadd.f32 %v748_v50, %v1726_v33  ;;  %v777_v14 = vadd.f32 %v751_v60, %v684_v41 }
  0x66   : > { %v766_v45 = vsel %vm287_vm0, %v764_v24, %v765_v30  ;;  %v778_v3 = vadd.f32 %v754_v54, %v1737_v27  ;;  %v779_v48 = vadd.f32 %v757_v26, %v1739_v22  ;;  %v780_v21 = vadd.f32 %v760_v16, %v1741_v9 }
  0x67   : > { %v781_v33 = vadd.f32 %v763_v34, %v1749_v10  ;;  %v782_v41 = vadd.f32 %v766_v45, %v1751_v63  ;;  %v791_v56 = vunpack.c.l.bf16 %v1210_v46  ;;  %v792_v23 = vunpack.c.l.bf16 %v1211_v61  ;;  %v1279_v61 = vld [vmem:[%s2065_s2] ss:$0 sm:$0xff] }
  0x68   : > { %v793_v18 = vunpack.c.l.bf16 %v1212_v1  ;;  %v794_v57 = vunpack.c.l.bf16 %v1213_v2  ;;  %v795_v58 = vunpack.c.l.bf16 %v1214_v15  ;;  %v796_v6 = vunpack.c.l.bf16 %v1215_v17 }
  0x69   : > { %v797_v59 = vunpack.c.l.bf16 %v1216_v35  ;;  %v798_v42 = vunpack.c.l.bf16 %v1217_v37  ;;  %v804_v43 = vmul.f32 %v1278_v44, %v791_v56  ;;  %v805_v27 = vmul.f32 %v1278_v44, %v698_v7 }
  0x6a   : > { %v806_v22 = vmul.f32 %v1278_v44, %v792_v23  ;;  %v807_v9 = vmul.f32 %v1278_v44, %v699_v29  ;;  %v808_v25 = vmul.f32 %v1278_v44, %v793_v18  ;;  %v809_v10 = vmul.f32 %v1278_v44, %v700_v11 }
  0x6b   : > { %v810_v63 = vmul.f32 %v1278_v44, %v794_v57  ;;  %v811_v28 = vmul.f32 %v1278_v44, %v701_v12  ;;  %v812_v49 = vmul.f32 %v1278_v44, %v795_v58  ;;  %v813_v50 = vmul.f32 %v1278_v44, %v702_v55 }
  0x6c   : > { %v814_v60 = vmul.f32 %v1278_v44, %v796_v6  ;;  %v815_v20 = vmul.f32 %v1278_v44, %v703_v31  ;;  %v816_v7 = vmul.f32 %v1278_v44, %v797_v59  ;;  %v817_v51 = vmul.f32 %v1278_v44, %v704_v0 }
  0x6d   : > { %v818_v29 = vmul.f32 %v1278_v44, %v798_v42  ;;  %v819_v52 = vmul.f32 %v1278_v44, %v705_v32  ;;  %v836_v11 = vrot.slane %v804_v43, 2  ;;  %v837_v38 = vrot.slane %v805_v27, 2 }
  0x6e   : > { %v839_v62 = vrot.slane %v806_v22, 2  ;;  %v840_v12 = vrot.slane %v807_v9, 2  ;;  %v842_v19 = vrot.slane %v808_v25, 2  ;;  %v843_v46 = vrot.slane %v809_v10, 2 }
  0x6f   : > { %v838_v4 = vsel %vm381_vm1, %v836_v11, %v837_v38  ;;  %v845_v55 = vrot.slane %v810_v63, 2  ;;  %v846_v54 = vrot.slane %v811_v28, 2  ;;  %v848_v40 = vrot.slane %v812_v49, 2 }
  0x70   : > { %v841_v31 = vsel %vm381_vm1, %v839_v62, %v840_v12  ;;  %v844_v53 = vsel %vm381_vm1, %v842_v19, %v843_v46  ;;  %v849_v0 = vrot.slane %v813_v50, 2  ;;  %v851_v39 = vrot.slane %v814_v60, 2 }
  0x71   : > { %v847_v36 = vsel %vm381_vm1, %v845_v55, %v846_v54  ;;  %v852_v32 = vrot.slane %v815_v20, 2  ;;  %v854_v47 = vrot.slane %v816_v7, 2  ;;  %v855_v8 = vrot.slane %v817_v51, 2 }
  0x72   : > { %v850_v26 = vsel %vm381_vm1, %v848_v40, %v849_v0  ;;  %v857_v24 = vrot.slane %v818_v29, 2  ;;  %v858_v30 = vrot.slane %v819_v52, 2  ;;  %v868_v1 = vadd.f32 %v838_v4, %v1784_v5 }
  0x73   : > { %v853_v2 = vsel %vm381_vm1, %v851_v39, %v852_v32  ;;  %v856_v16 = vsel %vm381_vm1, %v854_v47, %v855_v8  ;;  %v869_v34 = vadd.f32 %v841_v31, %v1791_v13  ;;  %v870_v15 = vadd.f32 %v844_v53, %v777_v14 }
  0x74   : > { %v859_v17 = vsel %vm381_vm1, %v857_v24, %v858_v30  ;;  %v871_v44 = vadd.f32 %v847_v36, %v778_v3  ;;  %v872_v45 = vadd.f32 %v850_v26, %v779_v48  ;;  %v873_v35 = vadd.f32 %v853_v2, %v780_v21 }
  0x75   : > { %v874_v37 = vadd.f32 %v856_v16, %v781_v33  ;;  %v875_v56 = vadd.f32 %v859_v17, %v782_v41  ;;  %v1835_v23 = vadd.f32 %v1279_v61, %v868_v1  ;;  %v1837_v18 = vadd.f32 %v1279_v61, %v869_v34 }
  0x76   : > { %v1839_v57 = vadd.f32 %v1279_v61, %v870_v15  ;;  %v1841_v5 = vadd.f32 %v1279_v61, %v871_v44  ;;  %v1843_v58 = vadd.f32 %v1279_v61, %v872_v45  ;;  %v1845_v6 = vadd.f32 %v1279_v61, %v873_v35 }
  0x77   : > { %v1847_v13 = vadd.f32 %v1279_v61, %v874_v37  ;;  %v1849_v14 = vadd.f32 %v1279_v61, %v875_v56  ;;  %v888_v3 = vsub.f32 0.0, %v1835_v23  ;;  %v889_v48 = vsub.f32 0.0, %v1837_v18 }
  0x78   : > { %v890_v21 = vsub.f32 0.0, %v1839_v57  ;;  %v891_v33 = vsub.f32 0.0, %v1841_v5  ;;  %v892_v41 = vsub.f32 0.0, %v1843_v58  ;;  %v893_v59 = vsub.f32 0.0, %v1845_v6 }
  0x79   : > { %v896_v42 = vmul.f32 1.442695, %v888_v3  ;;  %v898_v43 = vmul.f32 1.442695, %v889_v48  ;;  %v894_v27 = vsub.f32 0.0, %v1847_v13  ;;  %v895_v25 = vsub.f32 0.0, %v1849_v14 }
  0x7a   : > { %v900_v22 = vmul.f32 1.442695, %v890_v21  ;;  %v902_v9 = vmul.f32 1.442695, %v891_v33  ;;  %v904_v10 = vmul.f32 1.442695, %v892_v41 }
  0x7b   : > { %1280 = vpow2.f32 %v896_v42  ;;  %v906_v63 = vmul.f32 1.442695, %v893_v59  ;;  %v908_v28 = vmul.f32 1.442695, %v894_v27  ;;  %v910_v49 = vmul.f32 1.442695, %v895_v25 }
  0x7c   : > { %1282 = vpow2.f32 %v898_v43 }
  0x7d   : > { %1284 = vpow2.f32 %v900_v22 }
  0x7e   : > { %1286 = vpow2.f32 %v902_v9 }
  0x7f   : > { %1288 = vpow2.f32 %v904_v10 }
  0x80   : > { %1290 = vpow2.f32 %v906_v63 }
  0x81   : > { %v1281_v50 = vpop.eup %1280  ;;  %1292 = vpow2.f32 %v908_v28 }
  0x82   : > { %v1283_v60 = vpop.eup %1282  ;;  %v912_v20 = vadd.f32 1.0, %v1281_v50  ;;  %1294 = vpow2.f32 %v910_v49 }
  0x83   : > { %v1285_v7 = vpop.eup %1284  ;;  %v1859_v51 = vadd.f32 1.0, %v1283_v60 }
  0x84   : > { %v1287_v29 = vpop.eup %1286  ;;  %v1861_v52 = vadd.f32 1.0, %v1285_v7  ;;  %1296 = vrcp.f32 %v912_v20  ;;  %v931_v19 = vand.u32 2147483648, %v912_v20  ;;  %vm925_vm2 = vweird.f32 %v912_v20 }
  0x85   : > { %v1289_v11 = vpop.eup %1288  ;;  %v1863_v38 = vadd.f32 1.0, %v1287_v29  ;;  %1298 = vrcp.f32 %v1859_v51  ;;  %v946_v46 = vand.u32 2147483648, %v1859_v51  ;;  %v929_v55 = vand.u32 2147483647, %v912_v20 }
  0x86   : > { %v1291_v62 = vpop.eup %1290  ;;  %v1866_v12 = vadd.f32 1.0, %v1289_v11  ;;  %1300 = vrcp.f32 %v1861_v52  ;;  %vm940_vm3 = vweird.f32 %v1859_v51  ;;  %v944_v31 = vand.u32 2147483647, %v1859_v51 }
  0x87   : > { %v1293_v4 = vpop.eup %1292  ;;  %v1871_v40 = vadd.f32 1.0, %v1291_v62  ;;  %v961_v53 = vand.u32 2147483648, %v1861_v52  ;;  %1302 = vrcp.f32 %v1863_v38  ;;  %v1878_v39 = vor.u32 1.1754944e-38, %v931_v19 }
  0x88   : > { %v1295_v54 = vpop.eup %1294  ;;  %vm955_vm4 = vweird.f32 %v1861_v52  ;;  %v959_v36 = vand.u32 2147483647, %v1861_v52  ;;  %1304 = vrcp.f32 %v1866_v12  ;;  %v1885_v47 = vadd.f32 1.0, %v1293_v4 }
  0x89   : > { %v1888_v61 = vor.u32 1.1754944e-38, %v946_v46  ;;  %v974_v26 = vand.u32 2147483647, %v1863_v38  ;;  %v1891_v24 = vadd.f32 1.0, %v1295_v54  ;;  %vm970_vm5 = vweird.f32 %v1863_v38 }
  0x8a   : > { %v1876_v0 = vpop.eup %1296  ;;  %v976_v1 = vand.u32 2147483648, %v1863_v38  ;;  %vm1900_vm7 = vcmp.eq.f32.partialorder %v929_v55, 8.507059e+37  ;;  %vm1904_vm8 = vcmp.eq.f32.partialorder %v944_v31, 8.507059e+37  ;;  %v962_v17 = vor.u32 1.1754944e-38, %v961_v53 }
  0x8b   : > { %v1883_v32 = vpop.eup %1298  ;;  %v921_v8 = vmul.f32 %v1876_v0, %v912_v20  ;;  %vm926_vm6 = vweird.f32 %v1876_v0  ;;  %1306 = vrcp.f32 %v1871_v40  ;;  %vm1912_vm10 = vcmp.eq.f32.partialorder %v959_v36, 8.507059e+37 }
  0x8c   : > { %v936_v30 = vmul.f32 %v1883_v32, %v1859_v51  ;;  %v1897_v2 = vpop.eup %1300  ;;  %vm941_vm9 = vweird.f32 %v1883_v32  ;;  %vm985_vm11 = vweird.f32 %v1866_v12  ;;  %vm1918_vm12 = vcmp.eq.f32.partialorder %v974_v26, 8.507059e+37  ;;  %vm1931_vm14 = vmor %vm925_vm2, %vm926_vm6 }
  0x8d   : > { %v922_v16 = vsub.f32 1.0, %v921_v8  ;;  %v951_v45 = vmul.f32 %v1897_v2, %v1861_v52  ;;  %v1303_v37 = vpop.eup %1302  ;;  %v989_v48 = vand.u32 2147483647, %v1866_v12  ;;  %v991_v21 = vand.u32 2147483648, %v1866_v12  ;;  %vm1942_vm15 = vmor %vm940_vm3, %vm941_vm9 }
  0x8e   : > { %v937_v44 = vsub.f32 1.0, %v936_v30  ;;  %v1305_v33 = vpop.eup %1304  ;;  %vm956_vm13 = vweird.f32 %v1897_v2  ;;  %v966_v42 = vmul.f32 %v1303_v37, %v1863_v38  ;;  %v977_v22 = vor.u32 1.1754944e-38, %v976_v1 }
  0x8f   : > { %v923_v56 = vmul.f32 %v1876_v0, %v922_v16  ;;  %v952_v59 = vsub.f32 1.0, %v951_v45  ;;  %v981_v9 = vmul.f32 %v1305_v33, %v1866_v12  ;;  %v1004_v25 = vand.u32 2147483647, %v1871_v40  ;;  %vm1949_vm1 = vmor %vm955_vm4, %vm956_vm13 }
  0x90   : > { %v938_v41 = vmul.f32 %v1883_v32, %v937_v44  ;;  %v967_v49 = vsub.f32 1.0, %v966_v42  ;;  %vm971_vm0 = vweird.f32 %v1303_v37  ;;  %vm986_vm2 = vweird.f32 %v1305_v33 }
  0x91   : > { %v924_v43 = vadd.f32 %v1876_v0, %v923_v56  ;;  %v953_v28 = vmul.f32 %v1897_v2, %v952_v59  ;;  %v1307_v50 = vpop.eup %1306  ;;  %v982_v20 = vsub.f32 1.0, %v981_v9  ;;  %vm1000_vm6 = vweird.f32 %v1871_v40  ;;  %vm1968_vm4 = vmor %vm970_vm5, %vm971_vm0 }
  0x92   : > { %v939_v10 = vadd.f32 %v1883_v32, %v938_v41  ;;  %1308 = vrcp.f32 %v1885_v47  ;;  %v968_v51 = vmul.f32 %v1303_v37, %v967_v49  ;;  %vm1956_vm3 = vcmp.eq.f32.partialorder %v989_v48, 8.507059e+37  ;;  %vm1978_vm9 = vmor %vm985_vm11, %vm986_vm2 }
  0x93   : > { %v954_v7 = vadd.f32 %v1897_v2, %v953_v28  ;;  %v992_v11 = vor.u32 1.1754944e-38, %v991_v21  ;;  %v928_v52 = vsel %vm1931_vm14, %v1876_v0, %v924_v43  ;;  %v983_v46 = vmul.f32 %v1305_v33, %v982_v20 }
  0x94   : > { %v943_v62 = vsel %vm1942_vm15, %v1883_v32, %v939_v10  ;;  %v996_v4 = vmul.f32 %v1307_v50, %v1871_v40  ;;  %v969_v54 = vadd.f32 %v1303_v37, %v968_v51  ;;  %vm1982_vm13 = vcmp.eq.f32.partialorder %v1004_v25, 8.507059e+37 }
  0x95   : > { %v958_v55 = vsel %vm1949_vm1, %v1897_v2, %v954_v7  ;;  %v1006_v53 = vand.u32 2147483648, %v1871_v40  ;;  %v984_v0 = vadd.f32 %v1305_v33, %v983_v46  ;;  %vm1001_vm5 = vweird.f32 %v1307_v50 }
  0x96   : > { %v997_v36 = vsub.f32 1.0, %v996_v4  ;;  %vm1015_vm14 = vweird.f32 %v1885_v47  ;;  %v933_v32 = vsel %vm1900_vm7, %v1878_v39, %v928_v52  ;;  %v948_v12 = vsel %vm1904_vm8, %v1888_v61, %v943_v62  ;;  %vm2008_vm7 = vmor %vm1000_vm6, %vm1001_vm5 }
  0x97   : > { %v973_v8 = vsel %vm1968_vm4, %v1303_v37, %v969_v54  ;;  %1310 = vrcp.f32 %v1891_v24  ;;  %v963_v30 = vsel %vm1912_vm10, %v962_v17, %v958_v55  ;;  %v988_v39 = vsel %vm1978_vm9, %v1305_v33, %v984_v0 }
  0x98   : > { %v1309_v26 = vpop.eup %1308  ;;  %v978_v1 = vsel %vm1918_vm12, %v977_v22, %v973_v8  ;;  %v998_v2 = vmul.f32 %v1307_v50, %v997_v36  ;;  %v993_v61 = vsel %vm1956_vm3, %v992_v11, %v988_v39  ;;  %v1007_v34 = vor.u32 1.1754944e-38, %v1006_v53 }
  0x99   : > { %v1011_v15 = vmul.f32 %v1309_v26, %v1885_v47  ;;  %v1019_v17 = vand.u32 2147483647, %v1885_v47  ;;  %v1021_v45 = vand.u32 2147483648, %v1885_v47  ;;  %v1040_v35 = vmul.f32 %v933_v32, %v1835_v23 }
  0x9a   : > { %v999_v44 = vadd.f32 %v1307_v50, %v998_v2  ;;  %v1041_v37 = vmul.f32 %v948_v12, %v1837_v18  ;;  %vm1016_vm8 = vweird.f32 %v1309_v26  ;;  %v1042_v56 = vmul.f32 %v963_v30, %v1839_v57 }
  0x9b   : > { %v1012_v40 = vsub.f32 1.0, %v1011_v15  ;;  %v1043_v3 = vmul.f32 %v978_v1, %v1841_v5  ;;  %v1044_v23 = vmul.f32 %v993_v61, %v1843_v58  ;;  %vm2031_vm10 = vmor %vm1015_vm14, %vm1016_vm8  ;;  %vm2035_vm11 = vcmp.eq.f32.partialorder %v1019_v17, 8.507059e+37 }
  0x9c   : > { %v1003_v48 = vsel %vm2008_vm7, %v1307_v50, %v999_v44  ;;  %v1225_v21 = vpack.c.bf16 %v1041_v37, %v1040_v35  ;;  %v1022_v27 = vor.u32 1.1754944e-38, %v1021_v45  ;;  %vm1030_vm12 = vweird.f32 %v1891_v24 }
  0x9d   : > { %v1311_v18 = vpop.eup %1310  ;;  %v1008_v33 = vsel %vm1982_vm13, %v1007_v34, %v1003_v48  ;;  %v1013_v41 = vmul.f32 %v1309_v26, %v1012_v40  ;;  %v1230_v59 = vpack.c.bf16 %v1043_v3, %v1042_v56  ;;  %v1036_v47 = vand.u32 2147483648, %v1891_v24 }
  0x9e   : > { %v1026_v5 = vmul.f32 %v1311_v18, %v1891_v24  ;;  %v1045_v58 = vmul.f32 %v1008_v33, %v1845_v6  ;;  %1226 = vst [vmem:[%s2020_s19] sm:$0xff] %v1225_v21   ;;  %vm1031_vm15 = vweird.f32 %v1311_v18  ;;  %v1034_v9 = vand.u32 2147483647, %v1891_v24 }
  0x9f   : > { %v1014_v43 = vadd.f32 %v1309_v26, %v1013_v41  ;;  %1242 = vst [vmem:[%s2020_s19 + $0x8] sm:$0xff] %v1230_v59   ;;  %vm1032_vm0 = vmor %vm1030_vm12, %vm1031_vm15  ;;  %v1037_v28 = vor.u32 1.1754944e-38, %v1036_v47 }
  0xa0   : > { %v1027_v22 = vsub.f32 1.0, %v1026_v5  ;;  %v1235_v25 = vpack.c.bf16 %v1045_v58, %v1044_v23  ;;  %vm1035_vm1 = vcmp.eq.f32.partialorder %v1034_v9, 8.507059e+37 }
  0xa1   : > { %v1018_v10 = vsel %vm2031_vm10, %v1309_v26, %v1014_v43 }
  0xa2   : > { %v1028_v63 = vmul.f32 %v1311_v18, %v1027_v22  ;;  %1243 = vst [vmem:[%s2020_s19 + $0x10] sm:$0xff] %v1235_v25   ;;  %v1023_v6 = vsel %vm2035_vm11, %v1022_v27, %v1018_v10 }
  0xa3   : > { %v1046_v60 = vmul.f32 %v1023_v6, %v1847_v13 }
  0xa4   : > { %v1029_v49 = vadd.f32 %v1311_v18, %v1028_v63 }
  0xa6   : > { %v1033_v50 = vsel %vm1032_vm0, %v1311_v18, %v1029_v49 }
  0xa7   : > { %v1038_v20 = vsel %vm1035_vm1, %v1037_v28, %v1033_v50 }
  0xa8   : > { %v1047_v7 = vmul.f32 %v1038_v20, %v1849_v14 }
  0xaa   : > { %v1240_v24 = vpack.c.bf16 %v1047_v7, %v1046_v60 }
  0xac   : > { %1244 = vst [vmem:[%s2020_s19 + $0x18] sm:$0xff] %v1240_v24  }
  0xad PF: > { %s13_s14 = sadd.s32 1, %s1334_s14   ;;  %s2095_s12 = smov %s1330_s13 }
  0xae   : > { %p10_p5 = scmp.ge.s32.totalorder %s13_s14, 4   ;;  %s2096_s13 = smov %s2098_s15 }
  0xb0   :  { %12 = sbr.rel (!%p10_p5) target bundleno = 2 (0x2), region = 73 }

// kernel: vss_block_forward.7
= control target key start
LH: loop header
LB: loop body
LE: loop exit
PB: predicated region body
PF: predicated region fallthrough
CT: control target
= control target key end

     0   :  { %s2697_s0 = inlined_call_operand.vmem [shape: f32[128,128], index: 0, kind: input, shape index: {}]   ;;  %s2698_s1 = inlined_call_operand.vmem [shape: f32[128,128], index: 1, kind: input, shape index: {}]   ;;  %s2699_s2 = inlined_call_operand.vmem [shape: bf16[128,64], index: 2, kind: input, shape index: {}]   ;;  %s2700_s3 = inlined_call_operand.vmem [shape: f32[128,64], index: 3, kind: input, shape index: {}]   ;;  %s2701_s4 = inlined_call_operand.vmem [shape: f32[1,128], index: 4, kind: input, shape index: {}]   ;;  %s2702_s5 = inlined_call_operand.vmem [shape: f32[1,128], index: 5, kind: input, shape index: {}]   ;;  %s2703_s6 = inlined_call_operand.vmem [shape: bf16[64,128], index: 6, kind: input, shape index: {}]   ;;  %s2704_s7 = inlined_call_operand.vmem [shape: bf16[128,64], index: 7, kind: input, shape index: {}]   ;;  %s2705_s8 = inlined_call_operand.hbm [shape: f32[128,64], index: 8, kind: output, shape index: {}]  }
   0x1   :  { %v39_v0 = vld [vmem:[%s2697_s0 + $0x40] sm:$0xff]  ;;  %v41_v5 = vld [vmem:[%s2697_s0 + $0x50] sm:$0xff]  ;;  %v40_v9 = vld [vmem:[%s2697_s0 + $0x48] sm:$0xff] }
   0x2   :  { %v55_v1 = vld [vmem:[%s2698_s1 + $0x40] sm:$0xff]  ;;  %v57_v6 = vld [vmem:[%s2698_s1 + $0x50] sm:$0xff]  ;;  %v56_v10 = vld [vmem:[%s2698_s1 + $0x48] sm:$0xff] }
   0x3   :  { %v31_v2 = vld [vmem:[%s2697_s0] sm:$0xff]  ;;  %v1439_v3 = vadd.f32 %v55_v1, %v39_v0  ;;  %v1452_v8 = vadd.f32 %v57_v6, %v41_v5  ;;  %v32_v11 = vld [vmem:[%s2697_s0 + $0x8] sm:$0xff]  ;;  %v42_v13 = vld [vmem:[%s2697_s0 + $0x58] sm:$0xff]  ;;  %v1478_v16 = vadd.f32 %v56_v10, %v40_v9 }
   0x4   :  { %v47_v4 = vld [vmem:[%s2698_s1] sm:$0xff]  ;;  %v48_v12 = vld [vmem:[%s2698_s1 + $0x8] sm:$0xff]  ;;  %v58_v14 = vld [vmem:[%s2698_s1 + $0x58] sm:$0xff] }
   0x5   :  { %v1450_v7 = vadd.f32 %v47_v4, %v31_v2  ;;  %95 = vadd.xlane.f32.xlu0 %v1439_v3  ;;  %99 = vadd.xlane.f32.xlu2 %v1452_v8  ;;  %v1230_v15 = vld [vmem:[%s2703_s6 + $0x18] sm:$0xff]  ;;  %v1480_v17 = vadd.f32 %v48_v12, %v32_v11  ;;  %v1482_v18 = vadd.f32 %v58_v14, %v42_v13  ;;  %v1229_v19 = vld [vmem:[%s2703_s6 + $0x10] sm:$0xff]  ;;  %v43_v20 = vld [vmem:[%s2697_s0 + $0x60] sm:$0xff] }
   0x6   :  { %563 = vmatpush.bf16.msra.mxu0 %v1230_v15  ;;  %1239 = vmatpush.bf16.msra.mxu3 %v1230_v15  ;;  %v59_v21 = vld [vmem:[%s2698_s1 + $0x60] sm:$0xff]  ;;  %v33_v22 = vld [vmem:[%s2697_s0 + $0x10] sm:$0xff] }
   0x7   :  { %79 = vadd.xlane.f32.xlu1 %v1450_v7  ;;  %v49_v23 = vld [vmem:[%s2698_s1 + $0x10] sm:$0xff] }
   0xd   :  { %97 = vadd.xlane.f32.xlu0 %v1478_v16  ;;  %101 = vadd.xlane.f32.xlu2 %v1482_v18 }
   0xf   :  { %81 = vadd.xlane.f32.xlu1 %v1480_v17 }
  0x10   :  { %13 = vsyncpa [#allocation3], 0  ;;  %v34_v24 = vld [vmem:[%s2697_s0 + $0x18] sm:$0xff]  ;;  %564 = vmatpush.bf16.msra.mxu0 %v1229_v19  ;;  %v1228_v26 = vld [vmem:[%s2703_s6 + $0x8] sm:$0xff]  ;;  %1240 = vmatpush.bf16.msra.mxu3 %v1229_v19  ;;  %v1511_v27 = vadd.f32 %v49_v23, %v33_v22  ;;  %v1513_v28 = vadd.f32 %v59_v21, %v43_v20  ;;  %vm534_vm0 = vcmask 523264   ;;  %v1381_v53 = vmov 128.0  }
  0x11   :  { %v50_v25 = vld [vmem:[%s2698_s1 + $0x18] sm:$0xff]  ;;  %v1227_v30 = vld [vmem:[%s2703_s6] sm:$0xff]  ;;  %v36_v31 = vld [vmem:[%s2697_s0 + $0x28] sm:$0xff]  ;;  %1257 = vrcp.f32 %v1381_v53  ;;  %s1119_s20 = sshll.u32 %s2705_s8, 4  ;;  %s1383_s23 = smov 128   ;;  %s1120_s20 = int_to_ptr.hbm [resolvable:$true] %s1119_s20 }
  0x12   :  { %v1515_v29 = vadd.f32 %v50_v25, %v34_v24  ;;  %v44_v32 = vld [vmem:[%s2697_s0 + $0x68] sm:$0xff]  ;;  %v1219_v34 = vld [vmem:[%s2699_s2] sm:$0xff]  ;;  %v46_v41 = vld [vmem:[%s2697_s0 + $0x78] sm:$0xff] }
  0x13   :  { %v60_v33 = vld [vmem:[%s2698_s1 + $0x68] sm:$0xff]  ;;  %v35_v36 = vld [vmem:[%s2697_s0 + $0x20] sm:$0xff]  ;;  %v62_v42 = vld [vmem:[%s2698_s1 + $0x78] sm:$0xff] }
  0x14   :  { %565 = vmatpush.bf16.msra.mxu0 %v1228_v26  ;;  %1241 = vmatpush.bf16.msra.mxu3 %v1228_v26  ;;  %v52_v35 = vld [vmem:[%s2698_s1 + $0x28] sm:$0xff]  ;;  %v51_v37 = vld [vmem:[%s2698_s1 + $0x20] sm:$0xff]  ;;  %v1544_v38 = vadd.f32 %v60_v33, %v44_v32  ;;  %v45_v43 = vld [vmem:[%s2697_s0 + $0x70] sm:$0xff]  ;;  %v1566_v45 = vadd.f32 %v62_v42, %v46_v41 }
  0x15   :  { %83 = vadd.xlane.f32.xlu0 %v1511_v27  ;;  %103 = vadd.xlane.f32.xlu2 %v1513_v28  ;;  %v1546_v39 = vadd.f32 %v52_v35, %v36_v31  ;;  %v1548_v40 = vadd.f32 %v51_v37, %v35_v36  ;;  %v61_v44 = vld [vmem:[%s2698_s1 + $0x70] sm:$0xff]  ;;  %v1220_v47 = vld [vmem:[%s2699_s2 + $0x8] sm:$0xff]  ;;  %v1222_v50 = vld [vmem:[%s2699_s2 + $0x18] sm:$0xff] }
  0x16   :  { %v1568_v46 = vadd.f32 %v61_v44, %v45_v43  ;;  %v1224_v48 = vld [vmem:[%s2699_s2 + $0x28] sm:$0xff]  ;;  %v1221_v49 = vld [vmem:[%s2699_s2 + $0x10] sm:$0xff]  ;;  %v1223_v51 = vld [vmem:[%s2699_s2 + $0x20] sm:$0xff] }
  0x17   :  { %85 = vadd.xlane.f32.xlu1 %v1515_v29  ;;  %v1225_v52 = vld [vmem:[%s2699_s2 + $0x30] sm:$0xff]  ;;  %v1258_v54 = vpop.eup %1257  ;;  %v1226_v56 = vld [vmem:[%s2699_s2 + $0x38] sm:$0xff]  ;;  %s1382_s2 = smov [#allocation2]  }
  0x18   :  { %566 = vmatpush.bf16.msra.mxu0 %v1227_v30  ;;  %1242 = vmatpush.bf16.msra.mxu3 %v1227_v30  ;;  %v112_v55 = vmul.f32 128.0, %v1258_v54  ;;  %vm116_vm1 = vweird.f32 %v1258_v54  ;;  %v37_v5 = vld [vmem:[%s2697_s0 + $0x30] sm:$0xff]  ;;  %v54_v35 = vld [vmem:[%s2698_s1 + $0x38] sm:$0xff]  ;;  %s1117_s17 = sshll.u32 %s1382_s2, 4  ;;  %s1118_s17 = int_to_ptr.vmem [resolvable:$true] %s1117_s17 }
  0x19   :  { %v53_v6 = vld [vmem:[%s2698_s1 + $0x30] sm:$0xff] }
  0x1a   :  { %v113_v57 = vsub.f32 1.0, %v112_v55  ;;  %v1620_v14 = vadd.f32 %v53_v6, %v37_v5 }
  0x1b   :  { %1179 = vmatmul.msk.bf16.vlgmr.msra.gmra.mxu0 %vm534_vm0, %v1219_v34  ;;  %1184 = vmatmul.msk.bf16.vlgmr.msra.gmra.mxu3 %vm534_vm0, %v1224_v48  ;;  %v38_v34 = vld [vmem:[%s2697_s0 + $0x38] sm:$0xff]  ;;  %s1384_s0 = smov 8  }
  0x1c   :  { %v114_v58 = vmul.f32 %v1258_v54, %v113_v57  ;;  %v1664_v43 = vadd.f32 %v54_v35, %v38_v34 }
  0x1d   :  { %105 = vadd.xlane.f32.xlu0 %v1544_v38  ;;  %89 = vadd.xlane.f32.xlu2 %v1546_v39 }
  0x1e   :  { %v115_v59 = vadd.f32 %v1258_v54, %v114_v58 }
  0x1f   :  { %87 = vadd.xlane.f32.xlu1 %v1548_v40 }
  0x20   :  { %v1600_v60 = vsel %vm116_vm1, %v1258_v54, %v115_v59 }
  0x25   :  { %109 = vadd.xlane.f32.xlu0 %v1566_v45  ;;  %107 = vadd.xlane.f32.xlu2 %v1568_v46 }
  0x2b   :  { %1180 = vmatmul.msk.bf16.gmra.mxu0 %vm534_vm0, %v1220_v47  ;;  %1185 = vmatmul.msk.bf16.gmra.mxu3 %vm534_vm0, %v1225_v52 }
  0x3b   :  { %1181 = vmatmul.msk.bf16.gmra.mxu0 %vm534_vm0, %v1221_v49  ;;  %1186 = vmatmul.msk.bf16.gmra.mxu3 %vm534_vm0, %v1226_v56 }
  0x4b   :  { %1182 = vmatmul.msk.bf16.gmra.mxu0 %vm534_vm0, %v1222_v50 }
  0x5b   :  { %1183 = vmatmul.msk.bf16.gmra.mxu0 %vm534_vm0, %v1223_v51 }
  0x78   :  { %v96_v61 = vpop.xlane.xlu0 %95  ;;  %v100_v0 = vpop.xlane.xlu2 %99 }
  0x79   :  { %v126_v62 = vmul.f32 %v1600_v60, %v96_v61  ;;  %v128_v19 = vmul.f32 %v1600_v60, %v100_v0 }
  0x7a   :  { %v80_v63 = vpop.xlane.xlu1 %79 }
  0x7b   :  { %v1604_v1 = vsub.f32 %v1439_v3, %v126_v62  ;;  %v118_v12 = vmul.f32 %v1600_v60, %v80_v63  ;;  %v1639_v24 = vsub.f32 %v1452_v8, %v128_v19 }
  0x7d   :  { %v158_v2 = vmul.f32 %v1604_v1, %v1604_v1  ;;  %v1632_v23 = vsub.f32 %v1450_v7, %v118_v12  ;;  %v160_v32 = vmul.f32 %v1639_v24, %v1639_v24 }
  0x7f   :  { %182 = vadd.xlane.f32.xlu0 %v158_v2  ;;  %v150_v7 = vmul.f32 %v1632_v23, %v1632_v23 }
  0x80   :  { %v98_v4 = vpop.xlane.xlu0 %97  ;;  %v102_v11 = vpop.xlane.xlu2 %101 }
  0x81   :  { %v127_v9 = vmul.f32 %v1600_v60, %v98_v4  ;;  %v129_v15 = vmul.f32 %v1600_v60, %v102_v11 }
  0x82   :  { %v82_v10 = vpop.xlane.xlu1 %81 }
  0x83   :  { %v119_v3 = vmul.f32 %v1600_v60, %v82_v10  ;;  %v1618_v13 = vsub.f32 %v1478_v16, %v127_v9  ;;  %v1636_v16 = vsub.f32 %v1482_v18, %v129_v15 }
  0x85   :  { %v1625_v20 = vsub.f32 %v1480_v17, %v119_v3  ;;  %v159_v21 = vmul.f32 %v1618_v13, %v1618_v13  ;;  %v161_v30 = vmul.f32 %v1636_v16, %v1636_v16 }
  0x87   :  { %v151_v22 = vmul.f32 %v1625_v20, %v1625_v20  ;;  %91 = vadd.xlane.f32.xlu0 %v1620_v14  ;;  %184 = vadd.xlane.f32.xlu1 %v159_v21 }
  0x88   :  { %v84_v17 = vpop.xlane.xlu0 %83  ;;  %v104_v25 = vpop.xlane.xlu2 %103 }
  0x89   :  { %168 = vadd.xlane.f32.xlu2 %v151_v22  ;;  %v130_v31 = vmul.f32 %v1600_v60, %v104_v25  ;;  %v120_v42 = vmul.f32 %v1600_v60, %v84_v17 }
  0x8a   :  { %v86_v26 = vpop.xlane.xlu1 %85 }
  0x8b   :  { %v121_v18 = vmul.f32 %v1600_v60, %v86_v26  ;;  %v1650_v8 = vsub.f32 %v1513_v28, %v130_v31  ;;  %v1671_v48 = vsub.f32 %v1511_v27, %v120_v42 }
  0x8d   :  { %2717 = vst [vmem:[#allocation5_spill] sm:$0xff] %v1650_v8  ;;  %v1653_v33 = vsub.f32 %v1515_v29, %v121_v18  ;;  %v162_v28 = vmul.f32 %v1650_v8, %v1650_v8  ;;  %v152_v27 = vmul.f32 %v1671_v48, %v1671_v48 }
  0x8f   :  { %188 = vadd.xlane.f32.xlu0 %v161_v30  ;;  %166 = vadd.xlane.f32.xlu1 %v150_v7  ;;  %v153_v44 = vmul.f32 %v1653_v33, %v1653_v33 }
  0x90   :  { %v106_v36 = vpop.xlane.xlu0 %105  ;;  %v90_v37 = vpop.xlane.xlu2 %89 }
  0x91   :  { %186 = vadd.xlane.f32.xlu2 %v160_v32  ;;  %v123_v29 = vmul.f32 %v1600_v60, %v90_v37  ;;  %v131_v53 = vmul.f32 %v1600_v60, %v106_v36 }
  0x92   :  { %v88_v41 = vpop.xlane.xlu1 %87 }
  0x93   :  { %v122_v47 = vmul.f32 %v1600_v60, %v88_v41  ;;  %v1675_v49 = vsub.f32 %v1546_v39, %v123_v29  ;;  %v1691_v56 = vsub.f32 %v1544_v38, %v131_v53 }
  0x95   :  { %2718 = vst [vmem:[#allocation6_spill] sm:$0xff] %v1675_v49  ;;  %v1680_v51 = vsub.f32 %v1548_v40, %v122_v47  ;;  %v155_v54 = vmul.f32 %v1675_v49, %v1675_v49  ;;  %v163_v59 = vmul.f32 %v1691_v56, %v1691_v56 }
  0x97   :  { %190 = vadd.xlane.f32.xlu0 %v162_v28  ;;  %93 = vadd.xlane.f32.xlu1 %v1664_v43  ;;  %v154_v55 = vmul.f32 %v1680_v51, %v1680_v51 }
  0x98   :  { %v1677_v50 = vpop.f32.mrf.mxu0  ;;  %v110_v52 = vpop.xlane.xlu0 %109 }
  0x99   :  { %172 = vadd.xlane.f32.xlu2 %v153_v44  ;;  %v133_v39 = vmul.f32 %v1600_v60, %v110_v52  ;;  %v108_v58 = vpop.xlane.xlu2 %107  ;;  %v608_v4 = vsub.f32 0.0, %v1677_v50  ;;  %v1238_v52 = vld [vmem:[%s2704_s7 + $0x38] sm:$0xff] }
  0x9a   :  { %v132_v61 = vmul.f32 %v1600_v60, %v108_v58  ;;  %1243 = vmatpush.bf16.msra.mxu2 %v1238_v52  ;;  %1032 = vmatpush.bf16.msra.mxu1 %v1238_v52 }
  0x9b   :  { %v1696_v57 = vsub.f32 %v1566_v45, %v133_v39  ;;  %v624_v5 = vmul.f32 1.442695, %v608_v4 }
  0x9c   :  { %v1704_v38 = vsub.f32 %v1568_v46, %v132_v61  ;;  %v1237_v61 = vld [vmem:[%s2704_s7 + $0x30] sm:$0xff] }
  0x9d   :  { %2719 = vst [vmem:[#allocation7_spill] sm:$0xff] %v1696_v57  ;;  %v165_v62 = vmul.f32 %v1696_v57, %v1696_v57  ;;  %1259 = vpow2.f32 %v624_v5 }
  0x9e   :  { %2720 = vst [vmem:[#allocation8_spill] sm:$0xff] %v1704_v38  ;;  %v164_v45 = vmul.f32 %v1704_v38, %v1704_v38  ;;  %v1740_v28 = vpop.f32.mrf.mxu3  ;;  %1244 = vmatpush.bf16.msra.mxu2 %v1237_v61  ;;  %1033 = vmatpush.bf16.msra.mxu1 %v1237_v61 }
  0x9f   :  { %176 = vadd.xlane.f32.xlu0 %v155_v54  ;;  %170 = vadd.xlane.f32.xlu1 %v152_v27  ;;  %v618_v47 = vsub.f32 0.0, %v1740_v28 }
  0xa0   :  { %v1693_v40 = vpop.f32.mrf.mxu0 }
  0xa1   :  { %174 = vadd.xlane.f32.xlu2 %v154_v55  ;;  %v609_v9 = vsub.f32 0.0, %v1693_v40  ;;  %v644_v58 = vmul.f32 1.442695, %v618_v47 }
  0xa3   :  { %v626_v46 = vmul.f32 1.442695, %v609_v9  ;;  %v1260_v11 = vpop.eup %1259 }
  0xa4   :  { %v1723_v19 = vadd.f32 1.0, %v1260_v11 }
  0xa5   :  { %1261 = vpow2.f32 %v626_v46 }
  0xa6   :  { %1263 = vrcp.f32 %v1723_v19  ;;  %v1772_v11 = vpop.f32.mrf.mxu3  ;;  %vm677_vm2 = vweird.f32 %v1723_v19 }
  0xa7   :  { %192 = vadd.xlane.f32.xlu1 %v163_v59 }
  0xa8   :  { %v1706_v63 = vpop.f32.mrf.mxu0 }
  0xa9   :  { %196 = vadd.xlane.f32.xlu2 %v165_v62  ;;  %v610_v3 = vsub.f32 0.0, %v1706_v63 }
  0xab   :  { %v628_v22 = vmul.f32 1.442695, %v610_v3  ;;  %v1262_v26 = vpop.eup %1261 }
  0xac   :  { %v1729_v31 = vadd.f32 1.0, %v1262_v26  ;;  %v1731_v32 = vpop.eup %1263 }
  0xad   :  { %1265 = vpow2.f32 %v628_v22  ;;  %v673_v29 = vmul.f32 %v1731_v32, %v1723_v19  ;;  %vm678_vm3 = vweird.f32 %v1731_v32  ;;  %v683_v22 = vand.u32 2147483648, %v1723_v19 }
  0xae   :  { %vm1790_vm4 = vmor %vm677_vm2, %vm678_vm3  ;;  %vm692_vm5 = vweird.f32 %v1729_v31 }
  0xaf   :  { %194 = vadd.xlane.f32.xlu1 %v164_v45  ;;  %v674_v55 = vsub.f32 1.0, %v673_v29 }
  0xb0   :  { %v1710_v0 = vpop.f32.mrf.mxu0 }
  0xb1   :  { %v611_v12 = vsub.f32 0.0, %v1710_v0  ;;  %v675_v5 = vmul.f32 %v1731_v32, %v674_v55 }
  0xb3   :  { %v630_v17 = vmul.f32 1.442695, %v611_v12  ;;  %v1266_v18 = vpop.eup %1265  ;;  %v619_v12 = vsub.f32 0.0, %v1772_v11  ;;  %v676_v26 = vadd.f32 %v1731_v32, %v675_v5 }
  0xb4   :  { %v1736_v41 = vadd.f32 1.0, %v1266_v18 }
  0xb5   :  { %1267 = vpow2.f32 %v630_v17  ;;  %v646_v52 = vmul.f32 1.442695, %v619_v12 }
  0xb6   :  { %v711_v5 = vand.u32 2147483647, %v1736_v41  ;;  %vm707_vm10 = vweird.f32 %v1736_v41 }
  0xb8   :  { %v1712_v2 = vpop.f32.mrf.mxu0  ;;  %vm1836_vm12 = vcmp.eq.f32.partialorder %v711_v5, 8.507059e+37 }
  0xb9   :  { %v612_v15 = vsub.f32 0.0, %v1712_v2 }
  0xbb   :  { %v632_v25 = vmul.f32 1.442695, %v612_v15  ;;  %v1268_v34 = vpop.eup %1267  ;;  %v1236_v15 = vld [vmem:[%s2704_s7 + $0x28] sm:$0xff] }
  0xbc   :  { %v1738_v42 = vadd.f32 1.0, %v1268_v34  ;;  %1245 = vmatpush.bf16.msra.mxu2 %v1236_v15  ;;  %1034 = vmatpush.bf16.msra.mxu1 %v1236_v15 }
  0xbd   :  { %1269 = vpow2.f32 %v632_v25 }
  0xbe   :  { %vm722_vm13 = vweird.f32 %v1738_v42 }
  0xc0   :  { %v1715_v6 = vpop.f32.mrf.mxu0 }
  0xc1   :  { %v613_v21 = vsub.f32 0.0, %v1715_v6 }
  0xc3   :  { %v634_v30 = vmul.f32 1.442695, %v613_v21  ;;  %v1270_v36 = vpop.eup %1269 }
  0xc4   :  { %v1744_v44 = vadd.f32 1.0, %v1270_v36  ;;  %v696_v36 = vand.u32 2147483647, %v1729_v31 }
  0xc5   :  { %1271 = vpow2.f32 %v634_v30  ;;  %v681_v30 = vand.u32 2147483647, %v1723_v19 }
  0xc6   :  { %1273 = vrcp.f32 %v1729_v31  ;;  %vm1820_vm9 = vcmp.eq.f32.partialorder %v696_v36, 8.507059e+37  ;;  %v713_v36 = vand.u32 2147483648, %v1736_v41  ;;  %vm737_vm15 = vweird.f32 %v1744_v44 }
  0xc7   :  { %1275 = vrcp.f32 %v1736_v41  ;;  %vm682_vm7 = vcmp.eq.f32.partialorder %v681_v30, 8.507059e+37 }
  0xc8   :  { %v1718_v10 = vpop.f32.mrf.mxu0  ;;  %1277 = vrcp.f32 %v1738_v42 }
  0xc9   :  { %2721 = vst [vmem:[#allocation9_spill] sm:$0xff] %v1718_v10  ;;  %1279 = vrcp.f32 %v1744_v44 }
  0xcb   :  { %v1272_v37 = vpop.eup %1271 }
  0xcc   :  { %v1750_v53 = vpop.eup %1273  ;;  %v1752_v54 = vadd.f32 1.0, %v1272_v37 }
  0xcd   :  { %v688_v39 = vmul.f32 %v1750_v53, %v1729_v31  ;;  %v1767_v4 = vpop.eup %1275  ;;  %vm693_vm6 = vweird.f32 %v1750_v53 }
  0xce   :  { %1281 = vrcp.f32 %v1752_v54  ;;  %v1770_v46 = vpop.eup %1277  ;;  %v703_v17 = vmul.f32 %v1767_v4, %v1736_v41  ;;  %vm1816_vm8 = vmor %vm692_vm5, %vm693_vm6  ;;  %vm708_vm11 = vweird.f32 %v1767_v4  ;;  %vm752_vm3 = vweird.f32 %v1752_v54 }
  0xcf   :  { %v689_v9 = vsub.f32 1.0, %v688_v39  ;;  %1283 = vpow2.f32 %v644_v58  ;;  %v1774_v3 = vpop.eup %1279  ;;  %v718_v37 = vmul.f32 %v1770_v46, %v1738_v42  ;;  %v684_v39 = vor.u32 1.1754944e-38, %v683_v22  ;;  %vm1862_vm2 = vmor %vm707_vm10, %vm708_vm11 }
  0xd0   :  { %v1727_v7 = vpop.f32.mrf.mxu0  ;;  %v733_v19 = vmul.f32 %v1774_v3, %v1744_v44  ;;  %v698_v58 = vand.u32 2147483648, %v1729_v31  ;;  %v704_v61 = vsub.f32 1.0, %v703_v17  ;;  %vm723_vm14 = vweird.f32 %v1770_v46 }
  0xd1   :  { %2722 = vst [vmem:[#allocation10_spill] sm:$0xff] %v1727_v7  ;;  %v690_v18 = vmul.f32 %v1750_v53, %v689_v9  ;;  %vm738_vm1 = vweird.f32 %v1774_v3  ;;  %v1233_v9 = vld [vmem:[%s2704_s7 + $0x10] sm:$0xff]  ;;  %vm1879_vm5 = vmor %vm722_vm13, %vm723_vm14  ;;  %v756_v7 = vand.u32 2147483647, %v1752_v54 }
  0xd2   :  { %v734_v22 = vsub.f32 1.0, %v733_v19  ;;  %v699_v30 = vor.u32 1.1754944e-38, %v698_v58  ;;  %v705_v31 = vmul.f32 %v1767_v4, %v704_v61  ;;  %v1856_v58 = vpop.f32.mrf.mxu3  ;;  %vm1891_vm6 = vmor %vm737_vm15, %vm738_vm1 }
  0xd3   :  { %2731 = vst [vmem:[#allocation11_spill] sm:$0xff] %v1856_v58  ;;  %v620_v5 = vsub.f32 0.0, %v1856_v58  ;;  %vm757_vm10 = vcmp.eq.f32.partialorder %v756_v7, 8.507059e+37 }
  0xd4   :  { %v1782_v21 = vpop.eup %1281 }
  0xd5   :  { %v1284_v29 = vpop.eup %1283  ;;  %v748_v47 = vmul.f32 %v1782_v21, %v1752_v54 }
  0xd6   :  { %v1824_v15 = vadd.f32 1.0, %v1284_v29 }
  0xd7   :  { %v749_v17 = vsub.f32 1.0, %v748_v47  ;;  %v726_v47 = vand.u32 2147483647, %v1738_v42 }
  0xd8   :  { %v1734_v35 = vpop.f32.mrf.mxu0  ;;  %vm827_vm11 = vweird.f32 %v1824_v15 }
  0xd9   :  { %v616_v27 = vsub.f32 0.0, %v1734_v35 }
  0xdb   :  { %v640_v62 = vmul.f32 1.442695, %v616_v27  ;;  %v1235_v27 = vld [vmem:[%s2704_s7 + $0x20] sm:$0xff] }
  0xdc   :  { %1246 = vmatpush.bf16.msra.mxu2 %v1235_v27  ;;  %1035 = vmatpush.bf16.msra.mxu1 %v1235_v27  ;;  %v706_v27 = vadd.f32 %v1767_v4, %v705_v31  ;;  %v758_v31 = vand.u32 2147483648, %v1752_v54 }
  0xdd   :  { %1285 = vpow2.f32 %v640_v62  ;;  %v680_v62 = vsel %vm1790_vm4, %v1731_v32, %v676_v26  ;;  %v719_v32 = vsub.f32 1.0, %v718_v37  ;;  %v1234_v37 = vld [vmem:[%s2704_s7 + $0x18] sm:$0xff]  ;;  %vm753_vm4 = vweird.f32 %v1782_v21 }
  0xde   :  { %v1828_v26 = vsel %vm682_vm7, %v684_v39, %v680_v62  ;;  %vm1901_vm7 = vcmp.eq.f32.partialorder %v726_v47, 8.507059e+37  ;;  %v710_v12 = vsel %vm1862_vm2, %v1767_v4, %v706_v27  ;;  %v1999_v47 = vpop.f32.mrf.mxu3 }
  0xdf   :  { %v720_v19 = vmul.f32 %v1770_v46, %v719_v32  ;;  %v1949_v34 = vmul.f32 %v1828_v26, %v1677_v50  ;;  %v831_v50 = vand.u32 2147483647, %v1824_v15  ;;  %2749 = vst [vmem:[#allocation15_spill] sm:$0xff] %v1999_v47 }
  0xe0   :  { %v1760_v59 = vpop.f32.mrf.mxu0  ;;  %1247 = vmatpush.bf16.msra.mxu2 %v1234_v37  ;;  %1036 = vmatpush.bf16.msra.mxu1 %v1234_v37  ;;  %v714_v37 = vor.u32 1.1754944e-38, %v713_v36 }
  0xe1   :  { %v617_v45 = vsub.f32 0.0, %v1760_v59  ;;  %v721_v32 = vadd.f32 %v1770_v46, %v720_v19  ;;  %vm1993_vm13 = vcmp.eq.f32.partialorder %v831_v50, 8.507059e+37 }
  0xe3   :  { %v642_v25 = vmul.f32 1.442695, %v617_v45  ;;  %v1286_v55 = vpop.eup %1285  ;;  %v691_v45 = vadd.f32 %v1750_v53, %v690_v18  ;;  %v725_v54 = vsel %vm1879_vm5, %v1770_v46, %v721_v32  ;;  %v715_v46 = vsel %vm1836_vm12, %v714_v37, %v710_v12 }
  0xe4   :  { %1248 = vmatpush.bf16.msra.mxu2 %v1233_v9  ;;  %1037 = vmatpush.bf16.msra.mxu1 %v1233_v9 }
  0xe5   :  { %1287 = vpow2.f32 %v642_v25  ;;  %v1826_v25 = vadd.f32 1.0, %v1286_v55  ;;  %v695_v18 = vsel %vm1816_vm8, %v1750_v53, %v691_v45  ;;  %v735_v53 = vmul.f32 %v1774_v3, %v734_v22  ;;  %vm1909_vm8 = vmor %vm752_vm3, %vm753_vm4 }
  0xe6   :  { %1289 = vpow2.f32 %v646_v52  ;;  %v750_v52 = vmul.f32 %v1782_v21, %v749_v17  ;;  %v728_v55 = vand.u32 2147483648, %v1738_v42  ;;  %v741_v22 = vand.u32 2147483647, %v1744_v44 }
  0xe7   :  { %1291 = vrcp.f32 %v1824_v15  ;;  %v743_v17 = vand.u32 2147483648, %v1744_v44  ;;  %v700_v36 = vsel %vm1820_vm9, %v699_v30, %v695_v18  ;;  %v648_v18 = vmul.f32 1.442695, %v620_v5 }
  0xe8   :  { %1293 = vrcp.f32 %v1826_v25  ;;  %v751_v42 = vadd.f32 %v1782_v21, %v750_v52  ;;  %v729_v30 = vor.u32 1.1754944e-38, %v728_v55  ;;  %vm1925_vm9 = vcmp.eq.f32.partialorder %v741_v22, 8.507059e+37 }
  0xe9   :  { %v1952_v41 = vmul.f32 %v700_v36, %v1693_v40  ;;  %vm797_vm12 = vweird.f32 %v1826_v25  ;;  %v801_v44 = vand.u32 2147483647, %v1826_v25  ;;  %v803_v12 = vand.u32 2147483648, %v1826_v25 }
  0xea   :  { %v755_v4 = vsel %vm1909_vm8, %v1782_v21, %v751_v42  ;;  %v730_v32 = vsel %vm1901_vm7, %v729_v30, %v725_v54 }
  0xeb   :  { %v1288_v29 = vpop.eup %1287  ;;  %v1967_v40 = vmul.f32 %v730_v32, %v1710_v0  ;;  %vm2018_vm1 = vcmp.eq.f32.partialorder %v801_v44, 8.507059e+37 }
  0xec   :  { %v1290_v61 = vpop.eup %1289  ;;  %v1868_v45 = vadd.f32 1.0, %v1288_v29  ;;  %v736_v29 = vadd.f32 %v1774_v3, %v735_v53 }
  0xed   :  { %v1897_v10 = vpop.eup %1291  ;;  %v1914_v9 = vadd.f32 1.0, %v1290_v61  ;;  %v759_v61 = vor.u32 1.1754944e-38, %v758_v31  ;;  %v1232_v31 = vld [vmem:[%s2704_s7 + $0x8] sm:$0xff] }
  0xee   :  { %v1916_v57 = vpop.eup %1293  ;;  %1295 = vrcp.f32 %v1868_v45  ;;  %v740_v38 = vsel %vm1891_vm6, %v1774_v3, %v736_v29  ;;  %v823_v27 = vmul.f32 %v1897_v10, %v1824_v15  ;;  %v1962_v29 = vmul.f32 %v715_v46, %v1706_v63  ;;  %1249 = vmatpush.bf16.msra.mxu2 %v1232_v31  ;;  %1038 = vmatpush.bf16.msra.mxu1 %v1232_v31 }
  0xef   :  { %v793_v55 = vmul.f32 %v1916_v57, %v1826_v25  ;;  %1297 = vrcp.f32 %v1914_v9  ;;  %vm828_vm14 = vweird.f32 %v1897_v10  ;;  %v621_v46 = vsub.f32 0.0, %v1999_v47 }
  0xf0   :  { %1299 = vpow2.f32 %v648_v18  ;;  %v824_v19 = vsub.f32 1.0, %v823_v27  ;;  %vm798_vm15 = vweird.f32 %v1916_v57  ;;  %vm2031_vm2 = vmor %vm827_vm11, %vm828_vm14  ;;  %vm812_vm4 = vweird.f32 %v1868_v45 }
  0xf1   :  { %v794_v42 = vsub.f32 1.0, %v793_v55  ;;  %vm2039_vm3 = vmor %vm797_vm12, %vm798_vm15  ;;  %vm842_vm6 = vweird.f32 %v1914_v9 }
  0xf2   :  { %v183_v39 = vpop.xlane.xlu0 %182  ;;  %v825_v30 = vmul.f32 %v1897_v10, %v824_v19 }
  0xf3   :  { %v206_v52 = vmul.f32 %v183_v39, %v1600_v60  ;;  %v744_v39 = vor.u32 1.1754944e-38, %v743_v17  ;;  %v760_v17 = vsel %vm757_vm10, %v759_v61, %v755_v4 }
  0xf4   :  { %v1959_v37 = vpop.eup %1295  ;;  %v1977_v63 = vmul.f32 %v760_v17, %v1715_v6  ;;  %v826_v50 = vadd.f32 %v1897_v10, %v825_v30 }
  0xf5   :  { %v1941_v62 = vadd.f32 1e-05, %v206_v52  ;;  %v745_v22 = vsel %vm1925_vm9, %v744_v39, %v740_v38  ;;  %v1981_v0 = vpop.eup %1297  ;;  %v808_v52 = vmul.f32 %v1959_v37, %v1868_v45  ;;  %v795_v39 = vmul.f32 %v1916_v57, %v794_v42 }
  0xf6   :  { %v1974_v36 = vmul.f32 %v745_v22, %v1712_v2  ;;  %2746 = vst [vmem:[#allocation14_spill] sm:$0xff] %v1977_v63  ;;  %v1231_v2 = vld [vmem:[%s2704_s7] sm:$0xff]  ;;  %v1300_v6 = vpop.eup %1299  ;;  %v838_v55 = vmul.f32 %v1981_v0, %v1914_v9  ;;  %v830_v25 = vsel %vm2031_vm2, %v1897_v10, %v826_v50  ;;  %vm813_vm5 = vweird.f32 %v1959_v37 }
  0xf7   :  { %1301 = vrsqrt.f32 %v1941_v62  ;;  %1250 = vmatpush.bf16.msra.mxu2 %v1231_v2  ;;  %1039 = vmatpush.bf16.msra.mxu1 %v1231_v2  ;;  %v2014_v22 = vadd.f32 1.0, %v1300_v6  ;;  %v796_v42 = vadd.f32 %v1916_v57, %v795_v39  ;;  %v650_v2 = vmul.f32 1.442695, %v621_v46  ;;  %vm2083_vm7 = vmor %vm812_vm4, %vm813_vm5  ;;  %v2090_v6 = vpop.f32.mrf.mxu3 }
  0xf8   :  { %2745 = vst [vmem:[#allocation13_spill] sm:$0xff] %v1974_v36  ;;  %v839_v30 = vsub.f32 1.0, %v838_v55  ;;  %v848_v50 = vand.u32 2147483648, %v1914_v9  ;;  %vm843_vm8 = vweird.f32 %v1981_v0 }
  0xf9   :  { %2758 = vst [vmem:[#allocation16_spill] sm:$0xff] %v2090_v6  ;;  %vm2121_vm11 = vmor %vm842_vm6, %vm843_vm8 }
  0xfa   :  { %v92_v5 = vpop.xlane.xlu0 %91  ;;  %v185_v3 = vpop.xlane.xlu1 %184 }
  0xfb   :  { %v124_v7 = vmul.f32 %v1600_v60, %v92_v5  ;;  %v207_v26 = vmul.f32 %v185_v3, %v1600_v60 }
  0xfc   :  { %v169_v21 = vpop.xlane.xlu2 %168 }
  0xfd   :  { %v1971_v38 = vsub.f32 %v1620_v14, %v124_v7  ;;  %v199_v53 = vmul.f32 %v169_v21, %v1600_v60  ;;  %v833_v14 = vand.u32 2147483648, %v1824_v15  ;;  %v1997_v54 = vadd.f32 1e-05, %v207_v26  ;;  %v2012_v7 = vpop.eup %1301 }
  0xfe   :  { %v809_v21 = vsub.f32 1.0, %v808_v52  ;;  %vm317_vm12 = vweird.f32 %v2012_v7 }
  0xff   :  { %2744 = vst [vmem:[#allocation12_spill] sm:$0xff] %v1971_v38  ;;  %v156_v61 = vmul.f32 %v1971_v38, %v1971_v38  ;;  %v2009_v5 = vadd.f32 1e-05, %v199_v53  ;;  %1303 = vrsqrt.f32 %v1997_v54  ;;  %v804_v53 = vor.u32 1.1754944e-38, %v803_v12 }
 0x100   :  { %v834_v44 = vor.u32 1.1754944e-38, %v833_v14  ;;  %v311_v12 = vmul.f32 %v2012_v7, %v1941_v62  ;;  %v810_v39 = vmul.f32 %v1959_v37, %v809_v21  ;;  %v846_v21 = vand.u32 2147483647, %v1914_v9 }
 0x101   :  { %178 = vadd.xlane.f32.xlu0 %v156_v61  ;;  %1305 = vrsqrt.f32 %v2009_v5  ;;  %v816_v61 = vand.u32 2147483647, %v1868_v45  ;;  %vm246_vm14 = vweird.f32 %v2009_v5  ;;  %vm326_vm15 = vweird.f32 %v1997_v54 }
 0x102   :  { %v189_v4 = vpop.xlane.xlu0 %188  ;;  %v167_v27 = vpop.xlane.xlu1 %166  ;;  %1307 = vrcp.f32 %v2014_v22  ;;  %v312_v10 = vmul.f32 %v2012_v7, %v311_v12  ;;  %vm2107_vm10 = vcmp.eq.f32.partialorder %v846_v21, 8.507059e+37 }
 0x103   :  { %v209_v3 = vmul.f32 %v189_v4, %v1600_v60  ;;  %v198_v31 = vmul.f32 %v167_v27, %v1600_v60  ;;  %v818_v4 = vand.u32 2147483648, %v1868_v45  ;;  %v800_v27 = vsel %vm2039_vm3, %v1916_v57, %v796_v42 }
 0x104   :  { %v187_v32 = vpop.xlane.xlu2 %186  ;;  %v835_v57 = vsel %vm1993_vm13, %v834_v44, %v830_v25  ;;  %v805_v52 = vsel %vm2018_vm1, %v804_v53, %v800_v27  ;;  %vm2094_vm9 = vcmp.eq.f32.partialorder %v816_v61, 8.507059e+37  ;;  %v313_v27 = vmul.f32 0.5, %v312_v10 }
 0x105   :  { %v208_v17 = vmul.f32 %v187_v32, %v1600_v60  ;;  %v2024_v26 = vadd.f32 1e-05, %v209_v3  ;;  %v2051_v14 = vadd.f32 1e-05, %v198_v31  ;;  %v2064_v3 = vpop.eup %1303  ;;  %v840_v32 = vmul.f32 %v1981_v0, %v839_v30 }
 0x106   :  { %v811_v31 = vadd.f32 %v1959_v37, %v810_v39  ;;  %v819_v53 = vor.u32 1.1754944e-38, %v818_v4  ;;  %v321_v45 = vmul.f32 %v2064_v3, %v1997_v54  ;;  %v2104_v25 = vmul.f32 %v835_v57, %v1740_v28 }
 0x107   :  { %v2046_v15 = vadd.f32 1e-05, %v208_v17  ;;  %1309 = vrsqrt.f32 %v2024_v26  ;;  %v2075_v42 = vpop.eup %1305  ;;  %v2112_v4 = vmul.f32 %v805_v52, %v1734_v35  ;;  %v849_v10 = vor.u32 1.1754944e-38, %v848_v50 }
 0x108   :  { %1311 = vpow2.f32 %v650_v2  ;;  %v2092_v12 = vpop.eup %1307  ;;  %v322_v9 = vmul.f32 %v2064_v3, %v321_v45  ;;  %v314_v35 = vsub.f32 1.5, %v313_v27  ;;  %vm316_vm13 = vweird.f32 %v1941_v62 }
 0x109   :  { %1313 = vrsqrt.f32 %v2046_v15  ;;  %v853_v50 = vmul.f32 %v2092_v12, %v2014_v22  ;;  %vm327_vm1 = vweird.f32 %v2064_v3  ;;  %vm2202_vm2 = vmor %vm316_vm13, %vm317_vm12  ;;  %vm247_vm3 = vweird.f32 %v2075_v42 }
 0x10a   :  { %v191_v46 = vpop.xlane.xlu0 %190  ;;  %v94_v55 = vpop.xlane.xlu1 %93  ;;  %1315 = vrsqrt.f32 %v2051_v14  ;;  %vm346_vm4 = vweird.f32 %v2024_v26  ;;  %vm336_vm5 = vweird.f32 %v2046_v15  ;;  %vm236_vm6 = vweird.f32 %v2051_v14 }
 0x10b   :  { %v210_v18 = vmul.f32 %v191_v46, %v1600_v60  ;;  %v125_v30 = vmul.f32 %v1600_v60, %v94_v55  ;;  %v841_v46 = vadd.f32 %v1981_v0, %v840_v32  ;;  %v815_v55 = vsel %vm2083_vm7, %v1959_v37, %v811_v31  ;;  %vm2230_vm7 = vmor %vm326_vm15, %vm327_vm1 }
 0x10c   :  { %v173_v17 = vpop.xlane.xlu2 %172  ;;  %v241_v32 = vmul.f32 %v2075_v42, %v2009_v5  ;;  %v854_v28 = vsub.f32 1.0, %v853_v50 }
 0x10d   :  { %v201_v44 = vmul.f32 %v173_v17, %v1600_v60  ;;  %v2101_v39 = vpop.eup %1309  ;;  %v2131_v57 = vadd.f32 1e-05, %v210_v18  ;;  %v2143_v2 = vsub.f32 %v1664_v43, %v125_v30  ;;  %v820_v18 = vsel %vm2094_vm9, %v819_v53, %v815_v55  ;;  %vm2240_vm9 = vmor %vm246_vm14, %vm247_vm3 }
 0x10e   :  { %v1312_v61 = vpop.eup %1311  ;;  %v341_v52 = vmul.f32 %v2101_v39, %v2024_v26  ;;  %v242_v47 = vmul.f32 %v2075_v42, %v241_v32  ;;  %v323_v55 = vmul.f32 0.5, %v322_v9  ;;  %v2168_v32 = vmul.f32 %v820_v18, %v1760_v59 }
 0x10f   :  { %v2127_v21 = vpop.eup %1313  ;;  %v2133_v37 = vadd.f32 1e-05, %v201_v44  ;;  %2765 = vst [vmem:[#allocation17_spill] sm:$0xff] %v2143_v2  ;;  %v845_v44 = vsel %vm2121_vm11, %v1981_v0, %v841_v46  ;;  %v2155_v30 = vadd.f32 1.0, %v1312_v61  ;;  %v157_v27 = vmul.f32 %v2143_v2, %v2143_v2 }
 0x110   :  { %v2135_v31 = vpop.eup %1315  ;;  %v331_v43 = vmul.f32 %v2127_v21, %v2046_v15  ;;  %v850_v46 = vsel %vm2107_vm10, %v849_v10, %v845_v44  ;;  %v342_v61 = vmul.f32 %v2101_v39, %v341_v52  ;;  %v622_v2 = vsub.f32 0.0, %v2090_v6 }
 0x111   :  { %1317 = vrsqrt.f32 %v2133_v37  ;;  %v231_v19 = vmul.f32 %v2135_v31, %v2051_v14  ;;  %180 = vadd.xlane.f32.xlu1 %v157_v27  ;;  %v315_v59 = vmul.f32 %v2012_v7, %v314_v35  ;;  %v2183_v50 = vmul.f32 %v850_v46, %v1772_v11 }
 0x112   :  { %v177_v38 = vpop.xlane.xlu0 %176  ;;  %v171_v58 = vpop.xlane.xlu1 %170  ;;  %1319 = vrsqrt.f32 %v2131_v57  ;;  %v332_v17 = vmul.f32 %v2127_v21, %v331_v43  ;;  %v324_v44 = vsub.f32 1.5, %v323_v55  ;;  %v343_v43 = vmul.f32 0.5, %v342_v61 }
 0x113   :  { %v203_v0 = vmul.f32 %v177_v38, %v1600_v60  ;;  %v2173_v38 = vpop.f32.mrf.mxu3  ;;  %1321 = vrcp.f32 %v2155_v30  ;;  %v232_v52 = vmul.f32 %v2135_v31, %v231_v19  ;;  %v652_v11 = vmul.f32 1.442695, %v622_v2 }
 0x114   :  { %v175_v45 = vpop.xlane.xlu2 %174  ;;  %v200_v46 = vmul.f32 %v171_v58, %v1600_v60  ;;  %v319_v2 = vsel %vm2202_vm2, %v2012_v7, %v315_v59  ;;  %v325_v61 = vmul.f32 %v2064_v3, %v324_v44  ;;  %v344_v27 = vsub.f32 1.5, %v343_v43 }
 0x115   :  { %v202_v53 = vmul.f32 %v175_v45, %v1600_v60  ;;  %v243_v45 = vmul.f32 0.5, %v242_v47  ;;  %v2177_v10 = vadd.f32 1e-05, %v203_v0  ;;  %v2189_v47 = vmul.f32 %v2092_v12, %v854_v28 }
 0x116   :  { %v333_v28 = vmul.f32 0.5, %v332_v17  ;;  %v233_v58 = vmul.f32 0.5, %v232_v52  ;;  %v2221_v7 = vadd.f32 1e-05, %v200_v46  ;;  %vm347_vm8 = vweird.f32 %v2101_v39 }
 0x117   :  { %v2179_v9 = vpop.eup %1317  ;;  %v2186_v18 = vadd.f32 1e-05, %v202_v53  ;;  %v244_v55 = vsub.f32 1.5, %v243_v45  ;;  %1323 = vrsqrt.f32 %v2177_v10  ;;  %v2256_v5 = vmul.f32 %v2101_v39, %v344_v27  ;;  %vm2264_vm11 = vmor %vm346_vm4, %vm347_vm8  ;;  %v2275_v27 = vld [vmem:[%s2701_s4] ss:$0 sm:$0xff] }
 0x118   :  { %v2192_v0 = vpop.eup %1319  ;;  %v261_v35 = vmul.f32 %v2179_v9, %v2133_v37  ;;  %v334_v44 = vsub.f32 1.5, %v333_v28  ;;  %vm337_vm10 = vweird.f32 %v2127_v21  ;;  %vm237_vm12 = vweird.f32 %v2135_v31 }
 0x119   :  { %1325 = vrsqrt.f32 %v2186_v18  ;;  %v2213_v62 = vpop.eup %1321  ;;  %v351_v45 = vmul.f32 %v2192_v0, %v2131_v57  ;;  %v2224_v59 = vmul.f32 %v2075_v42, %v244_v55  ;;  %v329_v55 = vsel %vm2230_vm7, %v2064_v3, %v325_v61  ;;  %vm2289_vm13 = vmor %vm336_vm5, %vm337_vm10 }
 0x11a   :  { %v193_v19 = vpop.xlane.xlu1 %192  ;;  %v262_v17 = vmul.f32 %v2179_v9, %v261_v35  ;;  %1327 = vpow2.f32 %v652_v11  ;;  %v234_v11 = vsub.f32 1.5, %v233_v58  ;;  %v2246_v54 = vmul.f32 %v2213_v62, %v2155_v30  ;;  %vm2324_vm15 = vmor %vm236_vm6, %vm237_vm12 }
 0x11b   :  { %1329 = vrsqrt.f32 %v2221_v7  ;;  %v211_v46 = vmul.f32 %v193_v19, %v1600_v60  ;;  %v352_v28 = vmul.f32 %v2192_v0, %v351_v45  ;;  %v398_v3 = vmul.f32 %v319_v2, %v1604_v1 }
 0x11c   :  { %v263_v6 = vmul.f32 0.5, %v262_v17  ;;  %v2282_v61 = vmul.f32 %v2127_v21, %v334_v44  ;;  %v235_v2 = vmul.f32 %v2135_v31, %v234_v11  ;;  %vm266_vm14 = vweird.f32 %v2133_v37  ;;  %v197_v36 = vpop.xlane.xlu2 %196  ;;  %v2309_v11 = vld [vmem:[%s2702_s5] ss:$0 sm:$0xff] }
 0x11d   :  { %v2250_v53 = vpop.eup %1323  ;;  %v2269_v52 = vadd.f32 1e-05, %v211_v46  ;;  %v399_v44 = vmul.f32 %v329_v55, %v1618_v13  ;;  %v349_v26 = vsel %vm2264_vm11, %v2101_v39, %v2256_v5  ;;  %v2301_v63 = vmul.f32 0.5, %v352_v28 }
 0x11e   :  { %v281_v15 = vmul.f32 %v2250_v53, %v2177_v10  ;;  %v264_v55 = vsub.f32 1.5, %v263_v6  ;;  %v418_v39 = vmul.f32 %v2275_v27, %v398_v3  ;;  %v339_v5 = vsel %vm2289_vm13, %v2127_v21, %v2282_v61 }
 0x11f   :  { %v2260_v58 = vpop.eup %1325  ;;  %1331 = vrsqrt.f32 %v2269_v52  ;;  %v419_v43 = vmul.f32 %v2275_v27, %v399_v44  ;;  %v239_v1 = vsel %vm2324_vm15, %v2135_v31, %v235_v2  ;;  %vm267_vm1 = vweird.f32 %v2179_v9 }
 0x120   :  { %v271_v45 = vmul.f32 %v2260_v58, %v2186_v18  ;;  %v1328_v17 = vpop.eup %1327  ;;  %v213_v21 = vmul.f32 %v197_v36, %v1600_v60  ;;  %v282_v61 = vmul.f32 %v2250_v53, %v281_v15  ;;  %v2778_v44 = vsub.f32 0.0, %v2173_v38  ;;  %vm2351_vm3 = vmor %vm266_vm14, %vm267_vm1 }
 0x121   :  { %v2311_v13 = vpop.eup %1329  ;;  %v2328_v6 = vadd.f32 1.0, %v1328_v17  ;;  %v439_v14 = vadd.f32 %v2309_v11, %v419_v43  ;;  %v438_v49 = vadd.f32 %v2309_v11, %v418_v39  ;;  %v265_v28 = vmul.f32 %v2179_v9, %v264_v55 }
 0x122   :  { %v195_v19 = vpop.xlane.xlu1 %194  ;;  %v272_v46 = vmul.f32 %v2260_v58, %v271_v45  ;;  %v251_v3 = vmul.f32 %v2311_v13, %v2221_v7  ;;  %v654_v8 = vmul.f32 1.442695, %v2778_v44  ;;  %vm256_vm2 = vweird.f32 %v2221_v7 }
 0x123   :  { %v212_v45 = vmul.f32 %v195_v19, %v1600_v60  ;;  %v354_v19 = vsub.f32 1.5, %v2301_v63  ;;  %vm257_vm4 = vweird.f32 %v2311_v13  ;;  %v937_v39 = vmul.f32 %v2168_v32, %v439_v14 }
 0x124   :  { %v252_v17 = vmul.f32 %v2311_v13, %v251_v3  ;;  %v273_v31 = vmul.f32 0.5, %v272_v46  ;;  %vm286_vm5 = vweird.f32 %v2177_v10  ;;  %vm276_vm6 = vweird.f32 %v2186_v18  ;;  %vm2375_vm11 = vmor %vm256_vm2, %vm257_vm4 }
 0x125   :  { %v2347_v2 = vpop.eup %1331  ;;  %v2357_v43 = vadd.f32 1e-05, %v212_v45  ;;  %v2361_v46 = vadd.f32 1e-05, %v213_v21  ;;  %v390_v55 = vmul.f32 %v239_v1, %v1632_v23  ;;  %v283_v37 = vmul.f32 0.5, %v282_v61 }
 0x126   :  { %v253_v15 = vmul.f32 0.5, %v252_v17  ;;  %1333 = vpow2.f32 %v654_v8  ;;  %v936_v44 = vmul.f32 %v2112_v4, %v438_v49  ;;  %vm356_vm7 = vweird.f32 %v2131_v57 }
 0x127   :  { %v269_v32 = vsel %vm2351_vm3, %v2179_v9, %v265_v28  ;;  %vm287_vm8 = vweird.f32 %v2250_v53  ;;  %vm277_vm10 = vweird.f32 %v2260_v58  ;;  %v361_v8 = vmul.f32 %v2347_v2, %v2269_v52 }
 0x128   :  { %v254_v3 = vsub.f32 1.5, %v253_v15  ;;  %v274_v49 = vsub.f32 1.5, %v273_v31  ;;  %v948_v45 = vpack.c.bf16 %v937_v39, %v936_v44  ;;  %1335 = vrsqrt.f32 %v2357_v43  ;;  %vm2412_vm2 = vmor %vm276_vm6, %vm277_vm10 }
 0x129   :  { %vm872_vm12 = vweird.f32 %v2155_v30  ;;  %vm873_vm13 = vweird.f32 %v2213_v62  ;;  %1337 = vrsqrt.f32 %v2361_v46  ;;  %v362_v9 = vmul.f32 %v2347_v2, %v361_v8  ;;  %vm2434_vm4 = vmor %vm286_vm5, %vm287_vm8 }
 0x12a   :  { %v255_v4 = vmul.f32 %v2311_v13, %v254_v3  ;;  %v2783_v7 = vsel %vm2240_vm9, %v2075_v42, %v2224_v59  ;;  %v410_v21 = vmul.f32 %v2275_v27, %v390_v55  ;;  %v284_v14 = vsub.f32 1.5, %v283_v37  ;;  %1060 = vmatmul.bf16.vlgmr.msra.gmra.mxu2 %v948_v45 }
 0x12b   :  { %v391_v1 = vmul.f32 %v2783_v7, %v1625_v20  ;;  %v400_v17 = vmul.f32 %v339_v5, %v1639_v24  ;;  %v401_v28 = vmul.f32 %v349_v26, %v1636_v16  ;;  %vm857_vm14 = vweird.f32 %v2014_v22 }
 0x12c   :  { %v259_v61 = vsel %vm2375_vm11, %v2311_v13, %v255_v4  ;;  %vm858_vm15 = vweird.f32 %v2092_v12  ;;  %v363_v35 = vmul.f32 0.5, %v362_v9  ;;  %vm366_vm9 = vweird.f32 %v2269_v52  ;;  %v1334_v59 = vpop.eup %1333 }
 0x12d   :  { %v411_v20 = vmul.f32 %v2275_v27, %v391_v1  ;;  %v430_v42 = vadd.f32 %v2309_v11, %v410_v21  ;;  %v275_v31 = vmul.f32 %v2260_v58, %v274_v49  ;;  %vm367_vm1 = vweird.f32 %v2347_v2  ;;  %vm2508_vm8 = vmor %vm857_vm14, %vm858_vm15 }
 0x12e   :  { %v420_v24 = vmul.f32 %v2275_v27, %v400_v17  ;;  %v392_v16 = vmul.f32 %v259_v61, %v1671_v48  ;;  %v364_v13 = vsub.f32 1.5, %v363_v35  ;;  %v421_v15 = vmul.f32 %v2275_v27, %v401_v28  ;;  %v2419_v39 = vpop.eup %1335  ;;  %vm2449_vm6 = vmor %vm366_vm9, %vm367_vm1 }
 0x12f   :  { %v431_v5 = vadd.f32 %v2309_v11, %v411_v20  ;;  %v928_v36 = vmul.f32 %v1949_v34, %v430_v42  ;;  %v2786_v55 = vsub.f32 1.0, %v2246_v54  ;;  %vm357_vm3 = vweird.f32 %v2192_v0  ;;  %v2427_v3 = vpop.eup %1337 }
 0x130   :  { %v285_v18 = vmul.f32 %v2250_v53, %v284_v14  ;;  %v393_v37 = vmul.f32 %v269_v32, %v1653_v33  ;;  %1339 = vrcp.f32 %v2328_v6  ;;  %v2438_v54 = vadd.f32 1.0, %v1334_v59  ;;  %vm2467_vm5 = vmor %vm356_vm7, %vm357_vm3 }
 0x131   :  { %v870_v48 = vmul.f32 %v2213_v62, %v2786_v55  ;;  %v365_v44 = vmul.f32 %v2347_v2, %v364_v13  ;;  %v929_v23 = vmul.f32 %v1952_v41, %v431_v5  ;;  %v279_v33 = vsel %vm2412_vm2, %v2260_v58, %v275_v31  ;;  %vm2488_vm7 = vmor %vm872_vm12, %vm873_vm13 }
 0x132   :  { %v440_v32 = vadd.f32 %v2309_v11, %v420_v24  ;;  %v441_v8 = vadd.f32 %v2309_v11, %v421_v15  ;;  %v412_v49 = vmul.f32 %v2275_v27, %v392_v16  ;;  %v355_v41 = vmul.f32 %v2192_v0, %v354_v19 }
 0x133   :  { %v371_v58 = vmul.f32 %v2419_v39, %v2357_v43  ;;  %v944_v4 = vpack.c.bf16 %v929_v23, %v928_v36  ;;  %v413_v52 = vmul.f32 %v2275_v27, %v393_v37  ;;  %v871_v45 = vadd.f32 %v2213_v62, %v870_v48  ;;  %v2802_v36 = vld [vmem:[#allocation5_spill] sm:$0xff] }
 0x134   :  { %v289_v63 = vsel %vm2434_vm4, %v2250_v53, %v285_v18  ;;  %v381_v19 = vmul.f32 %v2427_v3, %v2361_v46  ;;  %v432_v7 = vadd.f32 %v2309_v11, %v412_v49  ;;  %1341 = vrcp.f32 %v2438_v54  ;;  %v2805_v49 = vld [vmem:[#allocation14_spill] sm:$0xff] }
 0x135   :  { %v369_v1 = vsel %vm2449_vm6, %v2347_v2, %v365_v44  ;;  %1040 = vmatmul.bf16.vlgmr.msra.gmra.mxu1 %v944_v4  ;;  %v433_v57 = vadd.f32 %v2309_v11, %v413_v52  ;;  %v394_v21 = vmul.f32 %v279_v33, %v1680_v51  ;;  %v863_v14 = vand.u32 2147483648, %v2014_v22  ;;  %v2804_v33 = vld [vmem:[#allocation13_spill] sm:$0xff]  ;;  %v2806_v52 = vld [vmem:[#allocation15_spill] sm:$0xff] }
 0x136   :  { %v938_v61 = vmul.f32 %v2104_v25, %v440_v32  ;;  %v939_v17 = vmul.f32 %v2183_v50, %v441_v8  ;;  %v930_v2 = vmul.f32 %v1962_v29, %v432_v7  ;;  %v2495_v28 = vpop.eup %1339  ;;  %v856_v51 = vadd.f32 %v2092_v12, %v2189_v47 }
 0x137   :  { %v359_v35 = vsel %vm2467_vm5, %v2192_v0, %v355_v41  ;;  %v372_v20 = vmul.f32 %v2419_v39, %v371_v58  ;;  %v931_v42 = vmul.f32 %v1967_v40, %v433_v57  ;;  %v2797_v29 = vand.u32 2147483647, %v2155_v30  ;;  %v2800_v0 = vld [vmem:[#allocation6_spill] sm:$0xff] }
 0x138   :  { %v403_v47 = vmul.f32 %v369_v1, %v1691_v56  ;;  %v395_v59 = vmul.f32 %v289_v63, %v2800_v0  ;;  %v414_v40 = vmul.f32 %v2275_v27, %v394_v21  ;;  %v875_v31 = vsel %vm2488_vm7, %v2213_v62, %v871_v45  ;;  %v2807_v1 = vld [vmem:[#allocation11_spill] sm:$0xff] }
 0x139   :  { %vm2514_vm10 = vcmp.eq.f32.partialorder %v2797_v29, 8.507059e+37  ;;  %v2801_v24 = vand.u32 2147483648, %v2155_v30  ;;  %v382_v26 = vmul.f32 %v2427_v3, %v381_v19  ;;  %v945_v13 = vpack.c.bf16 %v931_v42, %v930_v2 }
 0x13a   :  { %v949_v5 = vpack.c.bf16 %v939_v17, %v938_v61  ;;  %v402_v15 = vmul.f32 %v359_v35, %v2802_v36  ;;  %v415_v55 = vmul.f32 %v2275_v27, %v395_v59  ;;  %v434_v56 = vadd.f32 %v2309_v11, %v414_v40  ;;  %v2530_v48 = vpop.eup %1341  ;;  %v2814_v40 = vld [vmem:[#allocation8_spill] sm:$0xff] }
 0x13b   :  { %v879_v16 = vor.u32 1.1754944e-38, %v2801_v24  ;;  %v860_v18 = vsel %vm2508_vm8, %v2092_v12, %v856_v51  ;;  %v2803_v62 = vand.u32 2147483647, %v2014_v22  ;;  %v864_v30 = vor.u32 1.1754944e-38, %v863_v14  ;;  %v956_v51 = vld [vmem:[%s2700_s3 + $0x20] sm:$0xff] }
 0x13c   :  { %v373_v37 = vmul.f32 0.5, %v372_v20  ;;  %v883_v34 = vmul.f32 %v2495_v28, %v2328_v6  ;;  %1065 = vmatmul.bf16.gmra.mxu2 %v949_v5  ;;  %v423_v44 = vmul.f32 %v2275_v27, %v403_v47  ;;  %v435_v23 = vadd.f32 %v2309_v11, %v415_v55 }
 0x13d   :  { %vm862_vm11 = vcmp.eq.f32.partialorder %v2803_v62, 8.507059e+37  ;;  %v932_v10 = vmul.f32 %v2804_v33, %v434_v56  ;;  %v880_v32 = vsel %vm2514_vm10, %v879_v16, %v875_v31  ;;  %v383_v8 = vmul.f32 0.5, %v382_v26  ;;  %v2815_v26 = vld [vmem:[#allocation7_spill] sm:$0xff]  ;;  %v2816_v56 = vld [vmem:[#allocation16_spill] sm:$0xff]  ;;  %v2818_v33 = vld [vmem:[#allocation10_spill] sm:$0xff] }
 0x13e   :  { %v898_v22 = vmul.f32 %v2530_v48, %v2438_v54  ;;  %v422_v12 = vmul.f32 %v2275_v27, %v402_v15  ;;  %v933_v41 = vmul.f32 %v2805_v49, %v435_v23  ;;  %v865_v58 = vsel %vm862_vm11, %v864_v30, %v860_v18 }
 0x13f   :  { %v374_v4 = vsub.f32 1.5, %v373_v37  ;;  %v925_v45 = vmul.f32 %v880_v32, %v2806_v52  ;;  %v884_v9 = vsub.f32 1.0, %v883_v34  ;;  %v443_v63 = vadd.f32 %v2309_v11, %v423_v44 }
 0x140   :  { %v946_v19 = vpack.c.bf16 %v933_v41, %v932_v10  ;;  %v384_v7 = vsub.f32 1.5, %v383_v8  ;;  %vm376_vm12 = vweird.f32 %v2357_v43  ;;  %vm377_vm13 = vweird.f32 %v2419_v39 }
 0x141   :  { %v924_v57 = vmul.f32 %v865_v58, %v2807_v1  ;;  %v899_v21 = vsub.f32 1.0, %v898_v22  ;;  %v442_v14 = vadd.f32 %v2309_v11, %v422_v12  ;;  %vm386_vm14 = vweird.f32 %v2361_v46  ;;  %vm2558_vm9 = vmor %vm376_vm12, %vm377_vm13 }
 0x142   :  { %vm387_vm15 = vweird.f32 %v2427_v3  ;;  %v375_v53 = vmul.f32 %v2419_v39, %v374_v4  ;;  %v885_v61 = vmul.f32 %v2495_v28, %v884_v9  ;;  %v941_v43 = vmul.f32 %v925_v45, %v443_v63 }
 0x143   :  { %v385_v2 = vmul.f32 %v2427_v3, %v384_v7  ;;  %vm887_vm1 = vweird.f32 %v2328_v6  ;;  %vm888_vm2 = vweird.f32 %v2495_v28  ;;  %v900_v46 = vmul.f32 %v2530_v48, %v899_v21  ;;  %vm2566_vm3 = vmor %vm386_vm14, %vm387_vm15 }
 0x144   :  { %v940_v35 = vmul.f32 %v924_v57, %v442_v14  ;;  %v891_v20 = vand.u32 2147483647, %v2328_v6  ;;  %v893_v42 = vand.u32 2147483648, %v2328_v6  ;;  %v379_v25 = vsel %vm2558_vm9, %v2419_v39, %v375_v53  ;;  %vm2578_vm5 = vmor %vm887_vm1, %vm888_vm2 }
 0x145   :  { %1045 = vmatmul.bf16.gmra.mxu1 %v945_v13  ;;  %v886_v29 = vadd.f32 %v2495_v28, %v885_v61  ;;  %vm902_vm4 = vweird.f32 %v2438_v54  ;;  %vm903_vm6 = vweird.f32 %v2530_v48  ;;  %v908_v0 = vand.u32 2147483648, %v2438_v54 }
 0x146   :  { %v950_v50 = vpack.c.bf16 %v941_v43, %v940_v35  ;;  %v389_v6 = vsel %vm2566_vm3, %v2427_v3, %v385_v2  ;;  %v901_v59 = vadd.f32 %v2530_v48, %v900_v46  ;;  %v906_v39 = vand.u32 2147483647, %v2438_v54  ;;  %vm904_vm7 = vmor %vm902_vm4, %vm903_vm6 }
 0x147   :  { %v404_v31 = vmul.f32 %v379_v25, %v2814_v40  ;;  %v894_v24 = vor.u32 1.1754944e-38, %v893_v42  ;;  %v890_v16 = vsel %vm2578_vm5, %v2495_v28, %v886_v29  ;;  %vm892_vm8 = vcmp.eq.f32.partialorder %v891_v20, 8.507059e+37 }
 0x148   :  { %v405_v13 = vmul.f32 %v389_v6, %v2815_v26  ;;  %v909_v5 = vor.u32 1.1754944e-38, %v908_v0  ;;  %v905_v36 = vsel %vm904_vm7, %v2530_v48, %v901_v59  ;;  %vm907_vm10 = vcmp.eq.f32.partialorder %v906_v39, 8.507059e+37  ;;  %v2817_v48 = vld [vmem:[#allocation9_spill] sm:$0xff] }
 0x149   :  { %v424_v3 = vmul.f32 %v2275_v27, %v404_v31  ;;  %v895_v15 = vsel %vm892_vm8, %v894_v24, %v890_v16  ;;  %v614_v23 = vsub.f32 0.0, %v2817_v48  ;;  %v615_v10 = vsub.f32 0.0, %v2818_v33  ;;  %v2823_v31 = vld [vmem:[#allocation12_spill] sm:$0xff] }
 0x14a   :  { %v425_v54 = vmul.f32 %v2275_v27, %v405_v13  ;;  %v910_v55 = vsel %vm907_vm10, %v909_v5, %v905_v36  ;;  %v926_v18 = vmul.f32 %v895_v15, %v2816_v56  ;;  %v2826_v56 = vld [vmem:[#allocation17_spill] sm:$0xff] }
 0x14b   :  { %v444_v62 = vadd.f32 %v2309_v11, %v424_v3  ;;  %v927_v28 = vmul.f32 %v910_v55, %v2173_v38  ;;  %v636_v32 = vmul.f32 1.442695, %v614_v23  ;;  %v638_v8 = vmul.f32 1.442695, %v615_v10 }
 0x14c   :  { %1070 = vmatmul.bf16.gmra.mxu2 %v950_v50  ;;  %v445_v30 = vadd.f32 %v2309_v11, %v425_v54 }
 0x14d   :  { %v942_v37 = vmul.f32 %v926_v18, %v444_v62  ;;  %1343 = vpow2.f32 %v636_v32 }
 0x14e   :  { %v943_v34 = vmul.f32 %v927_v28, %v445_v30  ;;  %1345 = vpow2.f32 %v638_v8 }
 0x150   :  { %v951_v44 = vpack.c.bf16 %v943_v34, %v942_v37 }
 0x153   :  { %v1344_v38 = vpop.eup %1343 }
 0x154   :  { %v1346_v41 = vpop.eup %1345  ;;  %v662_v58 = vadd.f32 1.0, %v1344_v38 }
 0x155   :  { %1050 = vmatmul.bf16.gmra.mxu1 %v946_v19  ;;  %v663_v4 = vadd.f32 1.0, %v1346_v41 }
 0x156   :  { %vm767_vm14 = vweird.f32 %v662_v58  ;;  %v771_v29 = vand.u32 2147483647, %v662_v58  ;;  %v773_v50 = vand.u32 2147483648, %v662_v58 }
 0x157   :  { %vm782_vm9 = vweird.f32 %v663_v4  ;;  %v788_v47 = vand.u32 2147483648, %v663_v4  ;;  %v786_v40 = vand.u32 2147483647, %v663_v4 }
 0x158   :  { %vm772_vm6 = vcmp.eq.f32.partialorder %v771_v29, 8.507059e+37  ;;  %v774_v13 = vor.u32 1.1754944e-38, %v773_v50  ;;  %v957_v29 = vld [vmem:[%s2700_s3 + $0x28] sm:$0xff] }
 0x159   :  { %v789_v5 = vor.u32 1.1754944e-38, %v788_v47  ;;  %vm787_vm7 = vcmp.eq.f32.partialorder %v786_v40, 8.507059e+37 }
 0x15c   :  { %1075 = vmatmul.bf16.gmra.mxu2 %v951_v44 }
 0x174   :  { %v179_v22 = vpop.xlane.xlu0 %178 }
 0x175   :  { %v204_v12 = vmul.f32 %v179_v22, %v1600_v60  ;;  %v960_v22 = vld [vmem:[%s2700_s3 + $0x40] sm:$0xff] }
 0x177   :  { %v220_v49 = vadd.f32 1e-05, %v204_v12 }
 0x179   :  { %1347 = vrsqrt.f32 %v220_v49  ;;  %vm296_vm11 = vweird.f32 %v220_v49 }
 0x17a   :  { %1349 = vrcp.f32 %v662_v58 }
 0x17b   :  { %1351 = vrcp.f32 %v663_v4 }
 0x17f   :  { %v1348_v52 = vpop.eup %1347 }
 0x180   :  { %v291_v45 = vmul.f32 %v1348_v52, %v220_v49  ;;  %v1350_v19 = vpop.eup %1349  ;;  %vm297_vm12 = vweird.f32 %v1348_v52 }
 0x181   :  { %v1352_v1 = vpop.eup %1351  ;;  %v763_v14 = vmul.f32 %v1350_v19, %v662_v58  ;;  %vm2604_vm13 = vmor %vm296_vm11, %vm297_vm12  ;;  %vm768_vm15 = vweird.f32 %v1350_v19  ;;  %v953_v58 = vld [vmem:[%s2700_s3 + $0x8] sm:$0xff] }
 0x182   :  { %v292_v9 = vmul.f32 %v1348_v52, %v291_v45  ;;  %v778_v53 = vmul.f32 %v1352_v1, %v663_v4  ;;  %vm783_vm1 = vweird.f32 %v1352_v1  ;;  %vm2610_vm2 = vmor %vm767_vm14, %vm768_vm15  ;;  %v962_v45 = vld [vmem:[%s2700_s3 + $0x50] sm:$0xff] }
 0x183   :  { %v764_v17 = vsub.f32 1.0, %v763_v14  ;;  %vm2615_vm3 = vmor %vm782_vm9, %vm783_vm1 }
 0x184   :  { %v181_v63 = vpop.xlane.xlu1 %180  ;;  %v293_v57 = vmul.f32 0.5, %v292_v9  ;;  %v779_v43 = vsub.f32 1.0, %v778_v53  ;;  %v955_v53 = vld [vmem:[%s2700_s3 + $0x18] sm:$0xff] }
 0x185   :  { %v205_v7 = vmul.f32 %v181_v63, %v1600_v60  ;;  %v765_v20 = vmul.f32 %v1350_v19, %v764_v17 }
 0x186   :  { %v294_v61 = vsub.f32 1.5, %v293_v57  ;;  %v780_v60 = vmul.f32 %v1352_v1, %v779_v43  ;;  %v963_v57 = vld [vmem:[%s2700_s3 + $0x58] sm:$0xff]  ;;  %v964_v43 = vld [vmem:[%s2700_s3 + $0x60] sm:$0xff] }
 0x187   :  { %v221_v21 = vadd.f32 1e-05, %v205_v7  ;;  %v766_v6 = vadd.f32 %v1350_v19, %v765_v20 }
 0x188   :  { %v295_v2 = vmul.f32 %v1348_v52, %v294_v61  ;;  %v781_v39 = vadd.f32 %v1352_v1, %v780_v60  ;;  %v965_v60 = vld [vmem:[%s2700_s3 + $0x68] sm:$0xff] }
 0x189   :  { %1353 = vrsqrt.f32 %v221_v21  ;;  %vm306_vm5 = vweird.f32 %v221_v21  ;;  %v770_v3 = vsel %vm2610_vm2, %v1350_v19, %v766_v6  ;;  %v954_v19 = vld [vmem:[%s2700_s3 + $0x10] sm:$0xff] }
 0x18a   :  { %v299_v42 = vsel %vm2604_vm13, %v1348_v52, %v295_v2  ;;  %v785_v15 = vsel %vm2615_vm3, %v1352_v1, %v781_v39  ;;  %v775_v62 = vsel %vm772_vm6, %v774_v13, %v770_v3  ;;  %v967_v39 = vld [vmem:[%s2700_s3 + $0x78] sm:$0xff] }
 0x18b   :  { %v396_v24 = vmul.f32 %v299_v42, %v2823_v31  ;;  %v790_v28 = vsel %vm787_vm7, %v789_v5, %v785_v15  ;;  %v918_v34 = vmul.f32 %v775_v62, %v2817_v48  ;;  %v959_v13 = vld [vmem:[%s2700_s3 + $0x38] sm:$0xff] }
 0x18c   :  { %v919_v44 = vmul.f32 %v790_v28, %v2818_v33 }
 0x18d   :  { %v416_v54 = vmul.f32 %v2275_v27, %v396_v24  ;;  %v958_v24 = vld [vmem:[%s2700_s3 + $0x30] sm:$0xff] }
 0x18f   :  { %v1354_v46 = vpop.eup %1353  ;;  %v436_v37 = vadd.f32 %v2309_v11, %v416_v54 }
 0x190   :  { %v301_v35 = vmul.f32 %v1354_v46, %v221_v21  ;;  %vm307_vm4 = vweird.f32 %v1354_v46 }
 0x191   :  { %vm308_vm8 = vmor %vm306_vm5, %vm307_vm4  ;;  %v934_v10 = vmul.f32 %v918_v34, %v436_v37 }
 0x192   :  { %v302_v25 = vmul.f32 %v1354_v46, %v301_v35 }
 0x194   :  { %v303_v0 = vmul.f32 0.5, %v302_v25 }
 0x196   :  { %v304_v26 = vsub.f32 1.5, %v303_v0  ;;  %v966_v0 = vld [vmem:[%s2700_s3 + $0x70] sm:$0xff] }
 0x198   :  { %v305_v36 = vmul.f32 %v1354_v46, %v304_v26 }
 0x19a   :  { %v309_v55 = vsel %vm308_vm8, %v1354_v46, %v305_v36 }
 0x19b   :  { %v397_v18 = vmul.f32 %v309_v55, %v2826_v56 }
 0x19d   :  { %v417_v30 = vmul.f32 %v2275_v27, %v397_v18  ;;  %v952_v27 = vld [vmem:[%s2700_s3] sm:$0xff] }
 0x19f   :  { %v437_v23 = vadd.f32 %v2309_v11, %v417_v30  ;;  %v961_v11 = vld [vmem:[%s2700_s3 + $0x48] sm:$0xff] }
 0x1a1   :  { %v935_v32 = vmul.f32 %v919_v44, %v437_v23 }
 0x1a3   :  { %v947_v8 = vpack.c.bf16 %v935_v32, %v934_v10 }
 0x1a5   :  { %1055 = vmatmul.bf16.gmra.mxu1 %v947_v8 }
 0x1ad   :  { %v1061_v12 = vpop.f32.mrf.mxu2 }
 0x1ae   :  { %v1089_v49 = vadd.f32 %v1061_v12, %v960_v22 }
 0x1b0   :  { %1105 = vst.msk [vmem:[#allocation2 + $0x40] sm:$0xff] %vm534_vm0, %v1089_v49 }
 0x1b2   :  { %v1041_v48 = vpop.f32.mrf.mxu1 }
 0x1b3   :  { %v1081_v33 = vadd.f32 %v1041_v48, %v952_v27 }
 0x1b5   :  { %1097 = vst.msk [vmem:[#allocation2] sm:$0xff] %vm534_vm0, %v1081_v33  ;;  %v1063_v38 = vpop.f32.mrf.mxu2 }
 0x1b6   :  { %v1090_v41 = vadd.f32 %v1063_v38, %v961_v11 }
 0x1b8   :  { %1106 = vst.msk [vmem:[#allocation2 + $0x48] sm:$0xff] %vm534_vm0, %v1090_v41 }
 0x1ba   :  { %v1043_v4 = vpop.f32.mrf.mxu1 }
 0x1bb   :  { %v1082_v52 = vadd.f32 %v1043_v4, %v953_v58 }
 0x1bd   :  { %1098 = vst.msk [vmem:[#allocation2 + $0x8] sm:$0xff] %vm534_vm0, %v1082_v52 }
 0x1bf   :  { %v1066_v9 = vpop.f32.mrf.mxu2 }
 0x1c0   :  { %v1091_v63 = vadd.f32 %v1066_v9, %v962_v45 }
 0x1c2   :  { %1107 = vst.msk [vmem:[#allocation2 + $0x50] sm:$0xff] %vm534_vm0, %v1091_v63  ;;  %v1046_v7 = vpop.f32.mrf.mxu1 }
 0x1c3   :  { %v1083_v1 = vadd.f32 %v1046_v7, %v954_v19 }
 0x1c5   :  { %1099 = vst.msk [vmem:[#allocation2 + $0x10] sm:$0xff] %vm534_vm0, %v1083_v1 }
 0x1c7   :  { %v1068_v21 = vpop.f32.mrf.mxu2 }
 0x1c8   :  { %v1092_v14 = vadd.f32 %v1068_v21, %v963_v57 }
 0x1ca   :  { %1108 = vst.msk [vmem:[#allocation2 + $0x58] sm:$0xff] %vm534_vm0, %v1092_v14  ;;  %v1048_v61 = vpop.f32.mrf.mxu1 }
 0x1cb   :  { %v1084_v17 = vadd.f32 %v1048_v61, %v955_v53 }
 0x1cd   :  { %1100 = vst.msk [vmem:[#allocation2 + $0x18] sm:$0xff] %vm534_vm0, %v1084_v17 }
 0x1cf   :  { %v1071_v2 = vpop.f32.mrf.mxu2 }
 0x1d0   :  { %v1093_v46 = vadd.f32 %v1071_v2, %v964_v43 }
 0x1d2   :  { %1109 = vst.msk [vmem:[#allocation2 + $0x60] sm:$0xff] %vm534_vm0, %v1093_v46  ;;  %v1051_v35 = vpop.f32.mrf.mxu1 }
 0x1d3   :  { %v1085_v20 = vadd.f32 %v1051_v35, %v956_v51 }
 0x1d5   :  { %1101 = vst.msk [vmem:[#allocation2 + $0x20] sm:$0xff] %vm534_vm0, %v1085_v20 }
 0x1d7   :  { %v1073_v42 = vpop.f32.mrf.mxu2 }
 0x1d8   :  { %v1094_v25 = vadd.f32 %v1073_v42, %v965_v60 }
 0x1da   :  { %1110 = vst.msk [vmem:[#allocation2 + $0x68] sm:$0xff] %vm534_vm0, %v1094_v25  ;;  %v1053_v50 = vpop.f32.mrf.mxu1 }
 0x1db   :  { %v1086_v47 = vadd.f32 %v1053_v50, %v957_v29 }
 0x1dd   :  { %1102 = vst.msk [vmem:[#allocation2 + $0x28] sm:$0xff] %vm534_vm0, %v1086_v47 }
 0x1df   :  { %v1076_v6 = vpop.f32.mrf.mxu2 }
 0x1e0   :  { %v1095_v59 = vadd.f32 %v1076_v6, %v966_v0 }
 0x1e2   :  { %1111 = vst.msk [vmem:[#allocation2 + $0x70] sm:$0xff] %vm534_vm0, %v1095_v59 }
 0x1e7   :  { %v1078_v40 = vpop.f32.mrf.mxu2 }
 0x1e8   :  { %v1096_v31 = vadd.f32 %v1078_v40, %v967_v39 }
 0x1ea   :  { %1112 = vst.msk [vmem:[#allocation2 + $0x78] sm:$0xff] %vm534_vm0, %v1096_v31 }
 0x222   :  { %v1056_v16 = vpop.f32.mrf.mxu1 }
 0x223   :  { %v1087_v26 = vadd.f32 %v1056_v16, %v958_v24 }
 0x225   :  { %1103 = vst.msk [vmem:[#allocation2 + $0x30] sm:$0xff] %vm534_vm0, %v1087_v26 }
 0x22a   :  { %v1058_v5 = vpop.f32.mrf.mxu1 }
 0x22b   :  { %v1088_v36 = vadd.f32 %v1058_v5, %v959_v13 }
 0x22d   :  { %1104 = vst.msk [vmem:[#allocation2 + $0x38] sm:$0xff] %vm534_vm0, %v1088_v36 }
 0x22e   :  { %1125 = dma.vmem_to_hbm [thread:$0]  %s1118_s17, 2048, %s1120_s20, [#allocation3], %s1383_s23, %s1383_s23, %s1384_s0  }
 0x22f   :  { %1379 = dma.done.wait [#allocation3], 2048  }
 0x230   :  { %1380 = vsyncadd [#allocation3], 4294965248 }
 0x231   :  { %1130 = vsyncpa [#allocation3], 1 }

// kernel: vss_block_forward.6
= control target key start
LH: loop header
LB: loop body
LE: loop exit
PB: predicated region body
PF: predicated region fallthrough
CT: control target
= control target key end

     0   :  { %s2686_s21 = smov 0   ;;  %s2688_s22 = smov 0   ;;  %s3595_s0 = inlined_call_operand.vmem [shape: bf16[2,2,64,128], index: 0, kind: input, shape index: {}]   ;;  %s3596_s1 = inlined_call_operand.vmem [shape: bf16[2,2,128,128], index: 1, kind: input, shape index: {}]   ;;  %s3597_s2 = inlined_call_operand.vmem [shape: bf16[2,2,128,32], index: 2, kind: input, shape index: {}]   ;;  %s3598_s3 = inlined_call_operand.vmem [shape: f32[2,2,1,128], index: 3, kind: input, shape index: {}]   ;;  %s3599_s4 = inlined_call_operand.vmem [shape: f32[2,2,16,128], index: 4, kind: input, shape index: {}]   ;;  %s3600_s5 = inlined_call_operand.vmem [shape: f32[2,2,1,128], index: 5, kind: input, shape index: {}]   ;;  %s3601_s6 = inlined_call_operand.vmem [shape: f32[2,2,64,128], index: 6, kind: output, shape index: {}]  }
   0x1   :  { %s2690_s23 = smov 0   ;;  %s2692_s24 = smov 0  }
   0x2   :  { %s2694_s25 = smov 0  }
   0x3 LB: > { %s25_s26 = sadd.s32 1, %s2617_s23  ;;  %s28_s27 = sadd.s32 1, %s2621_s24  ;;  %s2625_s25 = sphi %s2694_s25, %s16_s25   ;;  %s2621_s24 = sphi %s2692_s24, %s3698_s24   ;;  %s2617_s23 = sphi %s2690_s23, %s3697_s23   ;;  %s2613_s22 = sphi %s2688_s22, %s3696_s22   ;;  %s2609_s21 = sphi %s2686_s21, %s3695_s21  }
   0x4   : > { %p26_p0 = scmp.ge.s32.totalorder %s25_s26, 2  ;;  %p2137_p1 = scmp.ge.s32.totalorder %s2625_s25, 1 }
   0x5   : > { %p280_p2 = scmp.lt.s32.totalorder %s2625_s25, 5 }
   0x6   : > { %s3700_s26 = smov (%p26_p0, %s25_s26), 0  ;;  %s3702_s27 = smov (!%p26_p0, %s28_s27), %s2621_s24 }
   0x7   : > { %p281_p3 = pnand %p2137_p1, %p280_p2  ;;  %p30_p4 = scmp.ge.s32.totalorder %s3702_s27, 2 }
   0x9   : > { %s3704_s27 = smov (%p30_p4, %s3702_s27), 0  ;;  %284 = sbr.rel (%p281_p3) target bundleno = 933 (0x3a5), region = 44 }
   0xe   : > { %p341_p5 = scmp.lt.s32.totalorder %s2609_s21, 1  ;;  %p343_p6 = scmp.lt.s32.totalorder %s2613_s22, 1  ;;  %v2870_v36 = vmov 0.0   ;;  %v2872_v37 = vmov 0.0  }
  0x10   : > { %s3706_s21 = smov (!%p341_p5, %s2609_s21), 1  ;;  %s3708_s22 = smov (!%p343_p6, %s2613_s22), 1 }
  0x11   : > { %s2139_s28 = sshll.u32 %s3706_s21, 4  ;;  %s2322_s29 = sshll.u32 %s3706_s21, 7 }
  0x12   : > { %s2138_s30 = sshll.u32 %s3708_s22, 3  ;;  %s2726_s9 = scalar_lea.vmem %s3596_s1, %s2322_s29 }
  0x13   : > { %s347_s10 = sadd.s32 %s2139_s28, %s2138_s30  ;;  %v2729_v0 = vld [vmem:[%s2726_s9] sm:$0xf]  ;;  %v2732_v1 = vld [vmem:[%s2726_s9] sm:$0xf0]  ;;  %v2735_v2 = vld [vmem:[%s2726_s9 + $0x8] sm:$0xf]  ;;  %s2751_s17 = scalar_lea.vmem %s3597_s2, %s2322_s29 }
  0x14   : > { %3606 = vst [vmem:[#allocation5_spill] sm:$0xff] %v2729_v0  ;;  %s2140_s11 = sshll.u32 %s347_s10, 2  ;;  %v2738_v3 = vld [vmem:[%s2726_s9 + $0x8] sm:$0xf0]  ;;  %v2741_v4 = vld [vmem:[%s2726_s9 + $0x10] sm:$0xf] }
  0x15   : > { %3607 = vst [vmem:[#allocation6_spill] sm:$0xff] %v2732_v1  ;;  %s2746_s14 = scalar_lea.vmem %s3595_s0, %s2140_s11  ;;  %v2754_v5 = vld [vmem:[%s2726_s9 + $0x10] sm:$0xf0]  ;;  %v2757_v6 = vld [vmem:[%s2726_s9 + $0x18] sm:$0xf]  ;;  %s2145_s18 = sshll.u32 %s3706_s21, 1 }
  0x16   : > { %3608 = vst [vmem:[#allocation7_spill] sm:$0xff] %v2735_v2  ;;  %v2760_v7 = vld [vmem:[%s2726_s9 + $0x18] sm:$0xf0]  ;;  %s2324_s19 = sshll.u32 %s3706_s21, 5  ;;  %v2765_v8 = vld [vmem:[%s2726_s9 + $0x20] sm:$0xf]  ;;  %s2827_s15 = scalar_lea.vmem %s3598_s3, %s2145_s18 }
  0x17   : > { %3609 = vst [vmem:[#allocation8_spill] sm:$0xff] %v2738_v3  ;;  %v2768_v9 = vld [vmem:[%s2726_s9 + $0x20] sm:$0xf0]  ;;  %s2773_s29 = scalar_lea.vmem %s3599_s4, %s2324_s19  ;;  %s2149_s30 = sshll.u32 %s3706_s21, 3  ;;  %v2777_v10 = vld [vmem:[%s2726_s9 + $0x28] sm:$0xf] }
  0x18   : > { %3610 = vst [vmem:[#allocation9_spill] sm:$0xff] %v2741_v4  ;;  %v2780_v11 = vld [vmem:[%s2726_s9 + $0x28] sm:$0xf0]  ;;  %s2150_s7 = sshll.u32 %s3708_s22, 4  ;;  %v2784_v12 = vld [vmem:[%s2726_s9 + $0x30] sm:$0xf]  ;;  %s2832_s20 = scalar_lea.vmem %s3600_s5, %s2145_s18 }
  0x19   : > { %3611 = vst [vmem:[#allocation10_spill] sm:$0xff] %v2754_v5  ;;  %v2787_v13 = vld [vmem:[%s2726_s9 + $0x30] sm:$0xf0]  ;;  %v2790_v14 = vld [vmem:[%s2773_s29] sm:$0xff]  ;;  %s379_s8 = sadd.s32 %s2150_s7, %s2149_s30  ;;  %v2793_v15 = vld [vmem:[%s2726_s9 + $0x38] sm:$0xf] }
  0x1a   : > { %3612 = vst [vmem:[#allocation11_spill] sm:$0xff] %v2757_v6  ;;  %v2796_v16 = vld [vmem:[%s2726_s9 + $0x38] sm:$0xf0]  ;;  %v2799_v17 = vld [vmem:[%s2751_s17] sm:$0xf]  ;;  %s2151_s21 = sshll.u32 %s379_s8, 3 }
  0x1b   : > { %3613 = vst [vmem:[#allocation12_spill] sm:$0xff] %v2760_v7  ;;  %v2802_v18 = vld [vmem:[%s2751_s17] sm:$0xf0]  ;;  %v2805_v19 = vld [vmem:[%s2751_s17 + $0x8] sm:$0xf]  ;;  %s2813_s11 = scalar_lea.vmem %s3601_s6, %s2151_s21  ;;  %s2874_s18 = smov 0  }
  0x1c   : > { %3614 = vst [vmem:[#allocation13_spill] sm:$0xff] %v2765_v8  ;;  %v2808_v20 = vld [vmem:[%s2773_s29 + $0x8] sm:$0xff]  ;;  %v2819_v22 = vld [vmem:[%s2751_s17 + $0x10] sm:$0xf]  ;;  %v2822_v23 = vld [vmem:[%s2751_s17 + $0x10] sm:$0xf0] }
  0x1d   : > { %3615 = vst [vmem:[#allocation14_spill] sm:$0xff] %v2768_v9  ;;  %v2816_v21 = vld [vmem:[%s2751_s17 + $0x8] sm:$0xf0]  ;;  %v2835_v24 = vld [vmem:[%s2751_s17 + $0x18] sm:$0xf] }
  0x1e   : > { %3616 = vst [vmem:[#allocation15_spill] sm:$0xff] %v2777_v10  ;;  %v2838_v25 = vld [vmem:[%s2751_s17 + $0x18] sm:$0xf0]  ;;  %v2841_v26 = vld [vmem:[%s2751_s17 + $0x20] sm:$0xf] }
  0x1f   : > { %3617 = vst [vmem:[#allocation16_spill] sm:$0xff] %v2780_v11  ;;  %v2844_v27 = vld [vmem:[%s2751_s17 + $0x20] sm:$0xf0]  ;;  %v2847_v28 = vld [vmem:[%s2751_s17 + $0x28] sm:$0xf] }
  0x20   : > { %3618 = vst [vmem:[#allocation17_spill] sm:$0xff] %v2784_v12  ;;  %v2850_v29 = vld [vmem:[%s2751_s17 + $0x28] sm:$0xf0]  ;;  %v2853_v30 = vld [vmem:[%s2751_s17 + $0x30] sm:$0xf] }
  0x21   : > { %3619 = vst [vmem:[#allocation18_spill] sm:$0xff] %v2787_v13  ;;  %v2856_v31 = vld [vmem:[%s2751_s17 + $0x30] sm:$0xf0]  ;;  %v2859_v32 = vld [vmem:[%s2751_s17 + $0x38] sm:$0xf] }
  0x22   : > { %3620 = vst [vmem:[#allocation19_spill] sm:$0xff] %v2790_v14  ;;  %v2862_v33 = vld [vmem:[%s2751_s17 + $0x38] sm:$0xf0]  ;;  %v2865_v34 = vld [vmem:[%s2827_s15] sm:$0x1] }
  0x23   : > { %3621 = vst [vmem:[#allocation20_spill] sm:$0xff] %v2793_v15  ;;  %v2868_v35 = vld [vmem:[%s2832_s20] sm:$0x1] }
  0x24   : > { %3622 = vst [vmem:[#allocation21_spill] sm:$0xff] %v2796_v16 }
  0x25   : > { %3623 = vst [vmem:[#allocation22_spill] sm:$0xff] %v2799_v17 }
  0x26 LB: >> { %v2217_v38 = vor.u32 %v2862_v33, %v2859_v32  ;;  %v2213_v39 = vor.u32 %v2856_v31, %v2853_v30  ;;  %v656_v42 = vlaneseq  ;;  %v2209_v43 = vor.u32 %v2850_v29, %v2847_v28  ;;  %v3629_v10 = vld [vmem:[#allocation15_spill] sm:$0xff]  ;;  %v3630_v11 = vld [vmem:[#allocation16_spill] sm:$0xff]  ;;  %v3631_v8 = vld [vmem:[#allocation13_spill] sm:$0xff]  ;;  %s2152_s28 = sshll.u32 %s2637_s18, 3  ;;  %s423_s18 = sadd.s32 1, %s2637_s18   ;;  %v2629_v36 = vphi %v2870_v36, %v3138_v36   ;;  %s2637_s18 = sphi %s2874_s18, %s423_s18   ;;  %v2633_v37 = vphi %v2872_v37, %v3643_v37  }
  0x27   : >> { %v3627_v12 = vld [vmem:[#allocation17_spill] sm:$0xff]  ;;  %v2177_v45 = vor.u32 %v3630_v11, %v3629_v10  ;;  %v2205_v46 = vor.u32 %v2844_v27, %v2841_v26  ;;  %v3632_v9 = vld [vmem:[#allocation14_spill] sm:$0xff]  ;;  %v2201_v48 = vor.u32 %v2838_v25, %v2835_v24  ;;  %v3633_v6 = vld [vmem:[#allocation11_spill] sm:$0xff]  ;;  %v2197_v50 = vor.u32 %v2822_v23, %v2819_v22  ;;  %s427_s30 = sshra.s32 %s2152_s28, 3  ;;  %s1159_s21 = scalar_lea.vmem %s2813_s11, %s2152_s28 }
  0x28   : >> { %554 = vmatpush.bf16.msra.mxu1 %v2217_v38  ;;  %v3628_v13 = vld [vmem:[#allocation18_spill] sm:$0xff]  ;;  %v2895_v44 = vshrl.u32 %v656_v42, 7  ;;  %v2173_v47 = vor.u32 %v3632_v9, %v3631_v8  ;;  %v3634_v7 = vld [vmem:[#allocation12_spill] sm:$0xff]  ;;  %v3635_v4 = vld [vmem:[#allocation9_spill] sm:$0xff]  ;;  %v2193_v52 = vor.u32 %v2816_v21, %v2805_v19  ;;  %s2153_s7 = sshll.u32 %s427_s30, 2  ;;  %v434_v38 = vperm.slane %v2865_v34, 0 }
  0x29   : >> { %v3624_v14 = vld [vmem:[#allocation19_spill] sm:$0xff]  ;;  %v2181_v41 = vor.u32 %v3628_v13, %v3627_v12  ;;  %v2169_v49 = vor.u32 %v3634_v7, %v3633_v6  ;;  %v3636_v5 = vld [vmem:[#allocation10_spill] sm:$0xff]  ;;  %v3638_v3 = vld [vmem:[#allocation8_spill] sm:$0xff]  ;;  %s430_s8 = scalar_lea.vmem %s2746_s14, %s2153_s7  ;;  %vm1138_vm0 = vcmask 1041409   ;;  %vm1141_vm1 = vcmask 1042434   ;;  %p420_p7 = scmp.ge.s32.totalorder %s423_s18, 8  }
  0x2a   : >> { %v3625_v15 = vld [vmem:[#allocation20_spill] sm:$0xff]  ;;  %2449 = vset.pattern.permute.xlu2 %v2895_v44  ;;  %2447 = vset.pattern.permute.xlu1 %v2895_v44  ;;  %v2165_v51 = vor.u32 %v3636_v5, %v3635_v4  ;;  %v3637_v2 = vld [vmem:[#allocation7_spill] sm:$0xff]  ;;  %v3640_v0 = vld [vmem:[#allocation5_spill] sm:$0xff]  ;;  %v2945_v61 = vadd.s32 8, %v2895_v44  ;;  %vm1144_vm2 = vcmask 1043459   ;;  %vm1147_vm3 = vcmask 1044484  }
  0x2b   : >> { %v3626_v16 = vld [vmem:[#allocation21_spill] sm:$0xff]  ;;  %2445 = vset.pattern.permute.xlu0 %v2895_v44  ;;  %v2161_v53 = vor.u32 %v3638_v3, %v3637_v2  ;;  %v3641_v1 = vld [vmem:[#allocation6_spill] sm:$0xff]  ;;  %v2926_v56 = vld [vmem:[%s430_s8] sm:$0xf]  ;;  %vm1150_vm4 = vcmask 1045509   ;;  %vm1153_vm5 = vcmask 1046534  }
  0x2c   : >> { %v2185_v40 = vor.u32 %v3626_v16, %v3625_v15  ;;  %555 = vmatpush.bf16.msra.mxu1 %v2213_v39  ;;  %v3639_v17 = vld [vmem:[#allocation22_spill] sm:$0xff]  ;;  %v2157_v55 = vor.u32 %v3641_v1, %v3640_v0  ;;  %vm1156_vm6 = vcmask 1047559   ;;  %v3199_v19 = vld [vmem:[%s2726_s9 + $0x48] sm:$0xf0] (%p420_p7)  ;;  %v3208_v22 = vld [vmem:[%s2726_s9 + $0x58] sm:$0xf] (%p420_p7) }
  0x2d   : >> { %v2189_v54 = vor.u32 %v2802_v18, %v3639_v17  ;;  %v3196_v18 = vld [vmem:[%s2726_s9 + $0x48] sm:$0xf] (%p420_p7)  ;;  %3645 = vst [vmem:[#allocation24_spill] sm:$0xff] (%p420_p7), %v3199_v19  ;;  %v3205_v21 = vld [vmem:[%s2726_s9 + $0x50] sm:$0xf0] (%p420_p7) }
  0x2e   : >> { %484 = vmatpush.bf16.msra.mxu0 %v2185_v40  ;;  %3644 = vst [vmem:[#allocation23_spill] sm:$0xff] (%p420_p7), %v3196_v18  ;;  %v3211_v23 = vld [vmem:[%s2726_s9 + $0x58] sm:$0xf0] (%p420_p7)  ;;  %v3214_v24 = vld [vmem:[%s2726_s9 + $0x60] sm:$0xf] (%p420_p7) }
  0x2f   : > { %3647 = vst [vmem:[#allocation26_spill] sm:$0xff] (%p420_p7), %v3205_v21  ;;  %v3217_v25 = vld [vmem:[%s2726_s9 + $0x60] sm:$0xf0] (%p420_p7)  ;;  %v3220_v26 = vld [vmem:[%s2726_s9 + $0x68] sm:$0xf] (%p420_p7) }
  0x30   : >> { %556 = vmatpush.bf16.msra.mxu1 %v2209_v43  ;;  %3648 = vst [vmem:[#allocation27_spill] sm:$0xff] (%p420_p7), %v3208_v22  ;;  %v3223_v27 = vld [vmem:[%s2726_s9 + $0x68] sm:$0xf0] (%p420_p7)  ;;  %v3226_v28 = vld [vmem:[%s2726_s9 + $0x70] sm:$0xf] (%p420_p7) }
  0x31   : > { %3649 = vst [vmem:[#allocation28_spill] sm:$0xff] (%p420_p7), %v3211_v23  ;;  %v3229_v29 = vld [vmem:[%s2726_s9 + $0x70] sm:$0xf0] (%p420_p7)  ;;  %v3232_v30 = vld [vmem:[%s2726_s9 + $0x78] sm:$0xf] (%p420_p7) }
  0x32   : >> { %485 = vmatpush.bf16.msra.mxu0 %v2181_v41  ;;  %3650 = vst [vmem:[#allocation29_spill] sm:$0xff] (%p420_p7), %v3214_v24  ;;  %v3235_v31 = vld [vmem:[%s2726_s9 + $0x78] sm:$0xf0] (%p420_p7)  ;;  %v3238_v32 = vld [vmem:[%s2751_s17 + $0x40] sm:$0xf] (%p420_p7) }
  0x33   : > { %3651 = vst [vmem:[#allocation30_spill] sm:$0xff] (%p420_p7), %v3217_v25  ;;  %v3241_v33 = vld [vmem:[%s2751_s17 + $0x40] sm:$0xf0] (%p420_p7)  ;;  %v3244_v34 = vld [vmem:[%s2751_s17 + $0x48] sm:$0xf] (%p420_p7) }
  0x34   : >> { %557 = vmatpush.bf16.msra.mxu1 %v2205_v46  ;;  %3652 = vst [vmem:[#allocation31_spill] sm:$0xff] (%p420_p7), %v3220_v26 }
  0x35   : > { %3653 = vst [vmem:[#allocation32_spill] sm:$0xff] (%p420_p7), %v3223_v27 }
  0x36   : >> { %486 = vmatpush.bf16.msra.mxu0 %v2177_v45  ;;  %3654 = vst [vmem:[#allocation33_spill] sm:$0xff] (%p420_p7), %v3226_v28 }
  0x37   : > { %3655 = vst [vmem:[#allocation34_spill] sm:$0xff] (%p420_p7), %v3229_v29 }
  0x38   : >> { %558 = vmatpush.bf16.msra.mxu1 %v2201_v48  ;;  %3656 = vst [vmem:[#allocation35_spill] sm:$0xff] (%p420_p7), %v3232_v30 }
  0x39   : > { %3657 = vst [vmem:[#allocation36_spill] sm:$0xff] (%p420_p7), %v3235_v31 }
  0x3a   : >> { %487 = vmatpush.bf16.msra.mxu0 %v2173_v47  ;;  %3658 = vst [vmem:[#allocation37_spill] sm:$0xff] (%p420_p7), %v3238_v32 }
  0x3b   : > { %3659 = vst [vmem:[#allocation38_spill] sm:$0xff] (%p420_p7), %v3241_v33 }
  0x3c   : >> { %559 = vmatpush.bf16.msra.mxu1 %v2197_v50  ;;  %3660 = vst [vmem:[#allocation39_spill] sm:$0xff] (%p420_p7), %v3244_v34 }
  0x3e   : >> { %488 = vmatpush.bf16.msra.mxu0 %v2169_v49 }
  0x40   : >> { %560 = vmatpush.bf16.msra.mxu1 %v2193_v52 }
  0x42   : >> { %489 = vmatpush.bf16.msra.mxu0 %v2165_v51 }
  0x44   : >> { %561 = vmatpush.bf16.msra.mxu1 %v2189_v54 }
  0x46   : >> { %490 = vmatpush.bf16.msra.mxu0 %v2161_v53 }
  0x47   : >> { %562 = vmatmul.bf16.vlgmr.msra.gmra.mxu1 %v2926_v56 }
  0x4a   : >> { %491 = vmatpush.bf16.msra.mxu0 %v2157_v55  ;;  %v2981_v55 = vadd.s32 16, %v2895_v44 }
  0x4d   : >> { %492 = vmatmul.bf16.vlgmr.msra.gmra.mxu0 %v2926_v56 }
  0xc4   : >> { %v2930_v57 = vpop.f32.mrf.mxu1 }
  0xc5   : >> { %v2933_v58 = vperm.slane %v2930_v57, 2  ;;  %v2936_v59 = vperm.slane %v2930_v57, 1  ;;  %v2939_v60 = vperm.slane %v2930_v57, 0  ;;  %v2954_v63 = vperm.slane %v2930_v57, 3 }
  0xc6   : >> { %v2961_v43 = vperm.slane %v2930_v57, 4  ;;  %v2967_v47 = vperm.slane %v2930_v57, 5  ;;  %v2973_v50 = vperm.slane %v2930_v57, 6 }
  0xc7   : >> { %686 = vperm.xlu2 %2449, %v2933_v58   ;;  %673 = vperm.xlu1 %2447, %v2936_v59  }
  0xc8   : >> { %660 = vperm.xlu0 %2445, %v2939_v60  }
  0xca   : >> { %v493_v39 = vpop.f32.mrf.mxu0 }
  0xcb   : >> { %v494_v40 = vadd.f32 %v493_v39, %v434_v38 }
  0xcc   : >> { %v565_v62 = vpop.f32.mrf.mxu1 }
  0xcd   : >> { %v498_v41 = vand.u32 2147483647, %v494_v40  ;;  %v497_v51 = vmax.f32 %v494_v40, 0.0 }
  0xcf   : >> { %2450 = vset.pattern.permute.xlu2 %v2945_v61  ;;  %2448 = vset.pattern.permute.xlu1 %v2945_v61  ;;  %v499_v42 = vsub.f32 0.0, %v498_v41 }
  0xd0   : >> { %2446 = vset.pattern.permute.xlu0 %v2945_v61 }
  0xd1   : >> { %v500_v45 = vmul.f32 1.442695, %v499_v42 }
  0xd2   : >> { %v495_v46 = vpop.f32.mrf.mxu0 }
  0xd3   : >> { %2470 = vpow2.f32 %v500_v45 }
  0xd7   : >> { %692 = vperm.xlu2 %2450, %v2933_v58   ;;  %679 = vperm.xlu1 %2448, %v2936_v59  }
  0xd8   : >> { %666 = vperm.xlu0 %2446, %v2939_v60  }
  0xd9   : >> { %v2471_v48 = vpop.eup %2470 }
  0xda   : >> { %v502_v49 = vadd.f32 1.0, %v2471_v48 }
  0xdc   : >> { %2472 = vlog2.f32 %v502_v49 }
  0xdf   : >> { %705 = vperm.xlu2 %2450, %v2954_v63   ;;  %2451 = vset.pattern.permute.xlu1 %v2895_v44 }
  0xe0   : >> { %2452 = vset.pattern.permute.xlu0 %v2895_v44 }
  0xe2   : >> { %v2473_v52 = vpop.eup %2472 }
  0xe3   : >> { %v504_v53 = vmul.f32 0.6931472, %v2473_v52 }
  0xe5   : >> { %v2978_v54 = vadd.f32 %v504_v53, %v497_v51 }
  0xe7   : >> { %2454 = vset.pattern.permute.xlu2 %v2895_v44  ;;  %699 = vperm.xlu1 %2451, %v2954_v63   ;;  %v568_v62 = vrot.slane %v2978_v54, 1  ;;  %v569_v38 = vrot.slane %v2978_v54, 2  ;;  %v570_v39 = vrot.slane %v2978_v54, 3  ;;  %v575_v41 = vperm.slane %v2978_v54, 0 }
  0xe8   : >> { %712 = vperm.xlu0 %2452, %v2961_v43   ;;  %v571_v40 = vrot.slane %v2978_v54, 4  ;;  %v572_v46 = vrot.slane %v2978_v54, 5  ;;  %v573_v0 = vrot.slane %v2978_v54, 6 }
  0xe9   : >> { %v576_v42 = vperm.slane %v568_v62, 0  ;;  %v577_v45 = vperm.slane %v569_v38, 0  ;;  %v578_v48 = vperm.slane %v570_v39, 0  ;;  %v591_v49 = vmul.f32 %v575_v41, %v3624_v14 }
  0xea   : >> { %v592_v51 = vmul.f32 %v575_v41, %v2808_v20  ;;  %v579_v2 = vperm.slane %v571_v40, 0  ;;  %v3000_v38 = vperm.slane %v2930_v57, 7  ;;  %v574_v39 = vrot.slane %v2978_v54, 7 }
  0xeb   : >> { %v593_v52 = vmul.f32 %v576_v42, %v3624_v14  ;;  %v594_v53 = vmul.f32 %v576_v42, %v2808_v20  ;;  %v595_v1 = vmul.f32 %v577_v45, %v3624_v14  ;;  %v596_v62 = vmul.f32 %v577_v45, %v2808_v20 }
  0xec   : >> { %v580_v3 = vperm.slane %v572_v46, 0  ;;  %v597_v4 = vmul.f32 %v578_v48, %v3624_v14  ;;  %v607_v41 = vmul.f32 1.442695, %v591_v49  ;;  %v598_v5 = vmul.f32 %v578_v48, %v2808_v20 }
  0xed   : >> { %v609_v6 = vmul.f32 1.442695, %v592_v51  ;;  %v611_v42 = vmul.f32 1.442695, %v593_v52  ;;  %v613_v7 = vmul.f32 1.442695, %v594_v53  ;;  %v599_v9 = vmul.f32 %v579_v2, %v3624_v14 }
  0xee   : >> { %v581_v8 = vperm.slane %v573_v0, 0  ;;  %2474 = vpow2.f32 %v607_v41  ;;  %v615_v40 = vmul.f32 1.442695, %v595_v1  ;;  %v600_v45 = vmul.f32 %v579_v2, %v2808_v20 }
  0xef   : >> { %725 = vperm.xlu2 %2454, %v2967_v47   ;;  %2453 = vset.pattern.permute.xlu1 %v2945_v61  ;;  %2476 = vpow2.f32 %v609_v6  ;;  %v617_v57 = vmul.f32 1.442695, %v596_v62  ;;  %v582_v46 = vperm.slane %v574_v39, 0  ;;  %v601_v49 = vmul.f32 %v580_v3, %v3624_v14 }
  0xf0   : >> { %2455 = vset.pattern.permute.xlu0 %v2945_v61  ;;  %2478 = vpow2.f32 %v611_v42  ;;  %v619_v48 = vmul.f32 1.442695, %v597_v4  ;;  %v602_v0 = vmul.f32 %v580_v3, %v2808_v20  ;;  %v621_v51 = vmul.f32 1.442695, %v598_v5 }
  0xf1   : >> { %2480 = vpow2.f32 %v613_v7  ;;  %v603_v1 = vmul.f32 %v581_v8, %v3624_v14  ;;  %v623_v2 = vmul.f32 1.442695, %v599_v9  ;;  %v604_v6 = vmul.f32 %v581_v8, %v2808_v20 }
  0xf2   : >> { %2482 = vpow2.f32 %v615_v40  ;;  %v625_v52 = vmul.f32 1.442695, %v600_v45  ;;  %v3015_v53 = vadd.s32 24, %v2895_v44  ;;  %v605_v4 = vmul.f32 %v582_v46, %v3624_v14 }
  0xf3   : >> { %2484 = vpow2.f32 %v617_v57  ;;  %v627_v39 = vmul.f32 1.442695, %v601_v49  ;;  %v606_v5 = vmul.f32 %v582_v46, %v2808_v20  ;;  %v629_v7 = vmul.f32 1.442695, %v602_v0  ;;  %v3202_v20 = vld [vmem:[%s2726_s9 + $0x50] sm:$0xf] (%p420_p7) }
  0xf4   : >> { %v3017_v62 = vpop.eup %2474  ;;  %2486 = vpow2.f32 %v619_v48  ;;  %v631_v8 = vmul.f32 1.442695, %v603_v1  ;;  %v633_v42 = vmul.f32 1.442695, %v604_v6  ;;  %v635_v45 = vmul.f32 1.442695, %v605_v4 }
  0xf5   : >> { %v3020_v3 = vpop.eup %2476  ;;  %2488 = vpow2.f32 %v621_v51  ;;  %v637_v46 = vmul.f32 1.442695, %v606_v5  ;;  %v3602_v48 = vunpack.c.l.bf16 %v2926_v56  ;;  %3646 = vst [vmem:[#allocation25_spill] sm:$0xff] (%p420_p7), %v3202_v20 }
  0xf6   : >> { %v3023_v9 = vpop.eup %2478  ;;  %2490 = vpow2.f32 %v623_v2 }
  0xf7   : >> { %738 = vperm.xlu2 %2454, %v2973_v50   ;;  %718 = vperm.xlu1 %2453, %v2961_v43   ;;  %v3025_v41 = vpop.eup %2480  ;;  %2492 = vpow2.f32 %v625_v52  ;;  %v3046_v6 = vmul.f32 %v2978_v54, %v3602_v48 }
  0xf8   : >> { %744 = vperm.xlu0 %2455, %v2973_v50   ;;  %v2483_v40 = vpop.eup %2482  ;;  %2494 = vpow2.f32 %v627_v39 }
  0xf9   : >> { %v3030_v57 = vpop.eup %2484  ;;  %2496 = vpow2.f32 %v629_v7  ;;  %v762_v7 = vrot.slane %v3046_v6, 2  ;;  %v761_v48 = vrot.slane %v3046_v6, 1  ;;  %v768_v11 = vperm.slane %v3046_v6, 0 }
  0xfa   : >> { %v3032_v49 = vpop.eup %2486  ;;  %2498 = vpow2.f32 %v631_v8 }
  0xfb   : >> { %v3035_v0 = vpop.eup %2488  ;;  %2500 = vpow2.f32 %v633_v42  ;;  %v770_v54 = vperm.slane %v762_v7, 0 }
  0xfc   : >> { %v3037_v51 = vpop.eup %2490  ;;  %2502 = vpow2.f32 %v635_v45 }
  0xfd   : >> { %v3039_v1 = vpop.eup %2492  ;;  %2504 = vpow2.f32 %v637_v46 }
  0xfe   : >> { %v3041_v2 = vpop.eup %2494 }
  0xff   : >> { %2457 = vset.pattern.permute.xlu2 %v2945_v61  ;;  %731 = vperm.xlu1 %2453, %v2967_v47   ;;  %v3048_v52 = vpop.eup %2496 }
 0x100   : >> { %2460 = vset.pattern.permute.xlu0 %v2981_v55  ;;  %v3052_v4 = vpop.eup %2498 }
 0x101   : >> { %v3055_v39 = vpop.eup %2500 }
 0x102   : >> { %v3057_v5 = vpop.eup %2502 }
 0x103   : >> { %v3060_v8 = vpop.eup %2504 }
 0x107   : >> { %757 = vperm.xlu2 %2457, %v3000_v38   ;;  %2456 = vset.pattern.permute.xlu1 %v2895_v44 }
 0x108   : >> { %933 = vperm.xlu0 %2460, %v2936_v59  }
 0x10f   : >> { %2459 = vset.pattern.permute.xlu2 %v3015_v53  ;;  %751 = vperm.xlu1 %2456, %v3000_v38  }
 0x110   : >> { %2463 = vset.pattern.permute.xlu0 %v3015_v53 }
 0x117   : >> { %2458 = vset.pattern.permute.xlu1 %v2981_v55  ;;  %927 = vperm.xlu2 %2459, %v2939_v60  }
 0x118   : >> { %963 = vperm.xlu0 %2463, %v2954_v63  }
 0x11f   : >> { %2462 = vset.pattern.permute.xlu2 %v2981_v55  ;;  %921 = vperm.xlu1 %2458, %v2939_v60   ;;  %v763_v60 = vrot.slane %v3046_v6, 3 }
 0x120   : >> { %2466 = vset.pattern.permute.xlu0 %v2981_v55 }
 0x121   : >> { %v687_v42 = vpop.permute.xlu2 %686  ;;  %v771_v10 = vperm.slane %v763_v60, 0  ;;  %v765_v60 = vrot.slane %v3046_v6, 5 }
 0x122   : >> { %v788_v45 = vmul.f32 %v770_v54, %v687_v42  ;;  %v769_v42 = vperm.slane %v761_v48, 0 }
 0x127   : >> { %945 = vperm.xlu2 %2462, %v2933_v58   ;;  %2461 = vset.pattern.permute.xlu1 %v3015_v53 }
 0x128   : >> { %993 = vperm.xlu0 %2466, %v2973_v50  }
 0x12f   : >> { %957 = vperm.xlu2 %2462, %v2954_v63   ;;  %939 = vperm.xlu1 %2461, %v2936_v59   ;;  %v818_v59 = vmul.f32 %v2633_v37, %v3017_v62 }
 0x130   : >> { %2469 = vset.pattern.permute.xlu0 %v3015_v53 }
 0x131   : >> { %v693_v46 = vpop.permute.xlu2 %692 }
 0x132   : >> { %v789_v7 = vmul.f32 %v770_v54, %v693_v46 }
 0x137   : >> { %2465 = vset.pattern.permute.xlu2 %v3015_v53  ;;  %951 = vperm.xlu1 %2461, %v2933_v58  }
 0x139   : >> { %v706_v12 = vpop.permute.xlu2 %705  ;;  %v674_v63 = vpop.permute.xlu1 %673 }
 0x13a   : >> { %v791_v13 = vmul.f32 %v771_v10, %v706_v12  ;;  %v786_v14 = vmul.f32 %v769_v42, %v674_v63  ;;  %v661_v54 = vpop.permute.xlu0 %660  ;;  %v773_v12 = vperm.slane %v765_v60, 0 }
 0x13b   : >> { %v784_v46 = vmul.f32 %v768_v11, %v661_v54 }
 0x13d   : >> { %v3078_v15 = vadd.f32 %v818_v59, %v784_v46  ;;  %v766_v46 = vrot.slane %v3046_v6, 6 }
 0x13f   : >> { %v829_v48 = vmul.f32 %v3023_v9, %v3078_v15  ;;  %975 = vperm.xlu2 %2465, %v2961_v43   ;;  %2464 = vset.pattern.permute.xlu1 %v2981_v55  ;;  %v819_v9 = vmul.f32 %v2629_v36, %v3020_v3  ;;  %v764_v3 = vrot.slane %v3046_v6, 4 }
 0x141   : >> { %v3084_v58 = vadd.f32 %v829_v48, %v786_v14 }
 0x143   : >> { %v842_v16 = vmul.f32 %v2483_v40, %v3084_v58  ;;  %v774_v40 = vperm.slane %v766_v46, 0 }
 0x145   : >> { %v3088_v37 = vadd.f32 %v842_v16, %v788_v45 }
 0x147   : >> { %987 = vperm.xlu2 %2465, %v2967_v47   ;;  %969 = vperm.xlu1 %2464, %v2961_v43  }
 0x149   : >> { %v726_v62 = vpop.permute.xlu2 %725  ;;  %v680_v63 = vpop.permute.xlu1 %679 }
 0x14a   : >> { %v794_v59 = vmul.f32 %v773_v12, %v726_v62  ;;  %v787_v54 = vmul.f32 %v769_v42, %v680_v63  ;;  %v667_v14 = vpop.permute.xlu0 %666 }
 0x14b   : >> { %v785_v48 = vmul.f32 %v768_v11, %v667_v14  ;;  %v772_v11 = vperm.slane %v764_v3, 0 }
 0x14d   : >> { %v823_v17 = vadd.f32 %v819_v9, %v785_v48  ;;  %v855_v9 = vmul.f32 %v3032_v49, %v3088_v37 }
 0x14f   : >> { %v830_v16 = vmul.f32 %v3025_v41, %v823_v17  ;;  %2468 = vset.pattern.permute.xlu2 %v2981_v55  ;;  %981 = vperm.xlu1 %2464, %v2967_v47  }
 0x151   : >> { %v3098_v43 = vadd.f32 %v830_v16, %v787_v54  ;;  %v739_v45 = vpop.permute.xlu2 %738 }
 0x152   : >> { %v796_v60 = vmul.f32 %v774_v40, %v739_v45 }
 0x153   : >> { %v843_v36 = vmul.f32 %v3030_v57, %v3098_v43  ;;  %v767_v57 = vrot.slane %v3046_v6, 7 }
 0x155   : >> { %v3103_v42 = vadd.f32 %v843_v36, %v789_v7  ;;  %v775_v48 = vperm.slane %v767_v57, 0 }
 0x157   : >> { %1005 = vperm.xlu2 %2468, %v3000_v38   ;;  %2467 = vset.pattern.permute.xlu1 %v3015_v53  ;;  %v856_v41 = vmul.f32 %v3035_v0, %v3103_v42 }
 0x159   : >> { %v700_v47 = vpop.permute.xlu1 %699  ;;  %v861_v62 = vadd.f32 %v856_v41, %v791_v13 }
 0x15a   : >> { %v790_v63 = vmul.f32 %v771_v10, %v700_v47  ;;  %v713_v54 = vpop.permute.xlu0 %712 }
 0x15b   : >> { %v792_v14 = vmul.f32 %v772_v11, %v713_v54 }
 0x15c   : >> { %v860_v7 = vadd.f32 %v855_v9, %v790_v63 }
 0x15e   : >> { %v868_v46 = vmul.f32 %v3037_v51, %v860_v7 }
 0x15f   : >> { %999 = vperm.xlu1 %2467, %v2973_v50   ;;  %v869_v50 = vmul.f32 %v3039_v1, %v861_v62 }
 0x160   : >> { %v3114_v16 = vadd.f32 %v868_v46, %v792_v14 }
 0x161   : >> { %v758_v45 = vpop.permute.xlu2 %757 }
 0x162   : >> { %v881_v13 = vmul.f32 %v3041_v2, %v3114_v16  ;;  %v799_v10 = vmul.f32 %v775_v48, %v758_v45 }
 0x164   : >> { %v3118_v0 = vadd.f32 %v881_v13, %v794_v59 }
 0x166   : >> { %v894_v49 = vmul.f32 %v3052_v4, %v3118_v0 }
 0x167   : >> { %1011 = vperm.xlu1 %2467, %v3000_v38  }
 0x168   : >> { %v3123_v6 = vadd.f32 %v894_v49, %v796_v60 }
 0x169   : >> { %v719_v51 = vpop.permute.xlu1 %718 }
 0x16a   : >> { %v793_v36 = vmul.f32 %v772_v11, %v719_v51  ;;  %v745_v3 = vpop.permute.xlu0 %744 }
 0x16b   : >> { %v797_v41 = vmul.f32 %v774_v40, %v745_v3 }
 0x16c   : >> { %v3126_v47 = vadd.f32 %v869_v50, %v793_v36 }
 0x16e   : >> { %v882_v59 = vmul.f32 %v3048_v52, %v3126_v47  ;;  %v907_v52 = vmul.f32 %v3057_v5, %v3123_v6 }
 0x171   : >> { %v732_v63 = vpop.permute.xlu1 %731  ;;  %v928_v60 = vpop.permute.xlu2 %927 }
 0x172   : >> { %v795_v2 = vmul.f32 %v773_v12, %v732_v63 }
 0x174   : >> { %v3130_v9 = vadd.f32 %v882_v59, %v795_v2 }
 0x176   : >> { %v895_v38 = vmul.f32 %v3055_v39, %v3130_v9 }
 0x178   : >> { %v3134_v4 = vadd.f32 %v895_v38, %v797_v41 }
 0x17a   : >> { %v908_v1 = vmul.f32 %v3060_v8, %v3134_v4  ;;  %v934_v54 = vpop.permute.xlu0 %933  ;;  %v1030_v8 = vmul.f32 %v928_v60, %v823_v17 }
 0x17c   : >> { %v3138_v36 = vadd.f32 %v908_v1, %v799_v10  }
 0x181   : >> { %v752_v40 = vpop.permute.xlu1 %751  ;;  %v946_v11 = vpop.permute.xlu2 %945 }
 0x182   : >> { %v798_v12 = vmul.f32 %v775_v48, %v752_v40  ;;  %v1031_v48 = vmul.f32 %v934_v54, %v3084_v58  ;;  %v1033_v17 = vmul.f32 %v946_v11, %v3088_v37 }
 0x184   : >> { %v3142_v57 = vadd.f32 %v907_v52, %v798_v12  }
 0x189   : >> { %v958_v14 = vpop.permute.xlu2 %957 }
 0x18a   : >> { %v1035_v46 = vmul.f32 %v958_v14, %v860_v7  ;;  %v964_v39 = vpop.permute.xlu0 %963  ;;  %v3642_v14 = vunpack.c.l.bf16 %v2926_v56 }
 0x18b   : >> { %v1036_v45 = vmul.f32 %v964_v39, %v861_v62  ;;  %v1102_v62 = vperm.slane %v2868_v35, 0  ;;  %v3247_v35 = vld [vmem:[%s2751_s17 + $0x48] sm:$0xf0] (%p420_p7) }
 0x18c   : > { %3661 = vst [vmem:[#allocation40_spill] sm:$0xff] (%p420_p7), %v3247_v35 }
 0x18d   : >> { %v1066_v13 = vadd.f32 %v1036_v45, %v1035_v46  ;;  %v3152_v58 = vmul.f32 %v1102_v62, %v3642_v14 }
 0x18f   : >> { %v1067_v41 = vrot.slane %v1066_v13, 4 }
 0x191   : >> { %v922_v49 = vpop.permute.xlu1 %921  ;;  %v1068_v38 = vadd.f32 %v1067_v41, %v1066_v13  ;;  %v1106_v13 = vrot.slane %v3152_v58, 1 }
 0x192   : >> { %v1029_v51 = vmul.f32 %v922_v49, %v3078_v15 }
 0x193   : >> { %v1069_v12 = vrot.slane %v1068_v38, 2 }
 0x194   : >> { %v1045_v10 = vadd.f32 %v1030_v8, %v1029_v51 }
 0x195   : >> { %v1070_v39 = vadd.f32 %v1069_v12, %v1068_v38 }
 0x196   : >> { %v1046_v50 = vrot.slane %v1045_v10, 4 }
 0x198   : >> { %v1047_v3 = vadd.f32 %v1046_v50, %v1045_v10  ;;  %v1071_v50 = vrot.slane %v1070_v39, 1 }
 0x19a   : >> { %v1048_v2 = vrot.slane %v1047_v3, 2  ;;  %v1072_v41 = vadd.f32 %v1071_v50, %v1070_v39 }
 0x19c   : >> { %v1049_v1 = vadd.f32 %v1048_v2, %v1047_v3 }
 0x1a1   : >> { %v940_v63 = vpop.permute.xlu1 %939 }
 0x1a2   : >> { %v1032_v5 = vmul.f32 %v940_v63, %v3098_v43  ;;  %v1050_v43 = vrot.slane %v1049_v1, 1  ;;  %v1108_v63 = vrot.slane %v3152_v58, 3 }
 0x1a4   : >> { %v1052_v59 = vadd.f32 %v1032_v5, %v1031_v48  ;;  %v1051_v51 = vadd.f32 %v1050_v43, %v1049_v1  ;;  %v976_v48 = vpop.permute.xlu2 %975 }
 0x1a5   : >> { %v1038_v1 = vmul.f32 %v976_v48, %v3126_v47  ;;  %v994_v48 = vpop.permute.xlu0 %993 }
 0x1a6   : >> { %v1053_v7 = vrot.slane %v1052_v59, 4 }
 0x1a8   : >> { %v1054_v40 = vadd.f32 %v1053_v7, %v1052_v59  ;;  %v1107_v59 = vrot.slane %v3152_v58, 2  ;;  %v1124_v7 = vadd.f32 %v1108_v63, %v1072_v41 }
 0x1a9   : >> { %v952_v15 = vpop.permute.xlu1 %951 }
 0x1aa   : >> { %v1055_v60 = vrot.slane %v1054_v40, 2  ;;  %v1034_v52 = vmul.f32 %v952_v15, %v3103_v42  ;;  %v1121_v42 = vadd.f32 %v3152_v58, %v1051_v51 }
 0x1ac   : >> { %v1056_v54 = vadd.f32 %v1055_v60, %v1054_v40  ;;  %v1059_v46 = vadd.f32 %v1034_v52, %v1033_v17  ;;  %v1143_v60 = vrot.slane %v1124_v7, 5  ;;  %v988_v43 = vpop.permute.xlu2 %987 }
 0x1ae   : >> { %v1057_v45 = vrot.slane %v1056_v54, 1  ;;  %v1060_v49 = vrot.slane %v1059_v46, 4 }
 0x1b0   : >> { %v1058_v8 = vadd.f32 %v1057_v45, %v1056_v54  ;;  %v1061_v10 = vadd.f32 %v1060_v49, %v1059_v46  ;;  %v1040_v45 = vmul.f32 %v988_v43, %v3130_v9  ;;  %v1110_v9 = vrot.slane %v3152_v58, 5 }
 0x1b2   : >> { %v1122_v37 = vadd.f32 %v1106_v13, %v1058_v8  ;;  %v1062_v11 = vrot.slane %v1061_v10, 2  ;;  %v1109_v8 = vrot.slane %v3152_v58, 4 }
 0x1b4   : >> { %v1137_v56 = vrot.slane %v1122_v37, 7  ;;  %v1063_v3 = vadd.f32 %v1062_v11, %v1061_v10 }
 0x1b6   : >> { %v1139_v5 = vsel %vm1138_vm0, %v1137_v56, %v1121_v42  ;;  %v1064_v2 = vrot.slane %v1063_v3, 1 }
 0x1b8   : >> { %v1065_v38 = vadd.f32 %v1064_v2, %v1063_v3  ;;  %v1041_v2 = vmul.f32 %v994_v48, %v3123_v6  ;;  %v3268_v48 = vld [vmem:[%s2751_s17 + $0x68] sm:$0xf] (%p420_p7) }
 0x1b9   : >> { %v970_v62 = vpop.permute.xlu1 %969 }
 0x1ba   : >> { %v1123_v40 = vadd.f32 %v1107_v59, %v1065_v38  ;;  %v1037_v12 = vmul.f32 %v970_v62, %v3114_v16 }
 0x1bc   : >> { %v1140_v15 = vrot.slane %v1123_v40, 6  ;;  %v1073_v17 = vadd.f32 %v1038_v1, %v1037_v12  ;;  %v1006_v12 = vpop.permute.xlu2 %1005 }
 0x1be   : >> { %v1142_v52 = vsel %vm1141_vm1, %v1140_v15, %v1139_v5  ;;  %v1074_v14 = vrot.slane %v1073_v17, 4 }
 0x1bf   : >> { %v1145_v54 = vsel %vm1144_vm2, %v1143_v60, %v1142_v52  ;;  %v1043_v60 = vmul.f32 %v1006_v12, %v3142_v57  ;;  %v3297_v12 = vmov (%p420_p7), 0.0  }
 0x1c0   : >> { %v1075_v46 = vadd.f32 %v1074_v14, %v1073_v17 }
 0x1c1   : >> { %v982_v39 = vpop.permute.xlu1 %981 }
 0x1c2   : >> { %v1076_v13 = vrot.slane %v1075_v46, 2  ;;  %v1039_v47 = vmul.f32 %v982_v39, %v3118_v0 }
 0x1c4   : >> { %v1077_v49 = vadd.f32 %v1076_v13, %v1075_v46  ;;  %v1080_v16 = vadd.f32 %v1040_v45, %v1039_v47 }
 0x1c6   : >> { %v1078_v51 = vrot.slane %v1077_v49, 1  ;;  %v1081_v10 = vrot.slane %v1080_v16, 4 }
 0x1c8   : >> { %v1079_v50 = vadd.f32 %v1078_v51, %v1077_v49  ;;  %v1082_v37 = vadd.f32 %v1081_v10, %v1080_v16  ;;  %v1112_v10 = vrot.slane %v3152_v58, 7 }
 0x1ca   : >> { %v1125_v11 = vadd.f32 %v1109_v8, %v1079_v50  ;;  %v1083_v42 = vrot.slane %v1082_v37, 2 }
 0x1cc   : >> { %v1146_v56 = vrot.slane %v1125_v11, 4  ;;  %v1084_v3 = vadd.f32 %v1083_v42, %v1082_v37 }
 0x1ce   : >> { %v1148_v41 = vsel %vm1147_vm3, %v1146_v56, %v1145_v54  ;;  %v1085_v63 = vrot.slane %v1084_v3, 1  ;;  %v3253_v56 = vld [vmem:[%s2751_s17 + $0x50] sm:$0xf0] (%p420_p7) }
 0x1d0   : >> { %v1086_v0 = vadd.f32 %v1085_v63, %v1084_v3  ;;  %v3256_v3 = vld [vmem:[%s2751_s17 + $0x58] sm:$0xf] (%p420_p7)  ;;  %v3262_v63 = vld [vmem:[%s2751_s17 + $0x60] sm:$0xf] (%p420_p7) }
 0x1d1   : >> { %v1000_v5 = vpop.permute.xlu1 %999  ;;  %3662 = vst [vmem:[#allocation41_spill] sm:$0xff] (%p420_p7), %v3256_v3 }
 0x1d2   : >> { %v1126_v59 = vadd.f32 %v1110_v9, %v1086_v0  ;;  %v1042_v38 = vmul.f32 %v1000_v5, %v3134_v4  ;;  %v1111_v4 = vrot.slane %v3152_v58, 6  ;;  %v3193_v58 = vld [vmem:[%s2726_s9 + $0x40] sm:$0xf0] (%p420_p7)  ;;  %v3271_v0 = vld [vmem:[%s2751_s17 + $0x68] sm:$0xf0] (%p420_p7) }
 0x1d3   : > { %v3265_v9 = vld [vmem:[%s2751_s17 + $0x60] sm:$0xf0] (%p420_p7)  ;;  %3664 = vst [vmem:[#allocation43_spill] sm:$0xff] (%p420_p7), %v3271_v0  ;;  %v3274_v5 = vld [vmem:[%s2751_s17 + $0x70] sm:$0xf] (%p420_p7) }
 0x1d4   : >> { %v1149_v7 = vrot.slane %v1126_v59, 3  ;;  %v1087_v62 = vadd.f32 %v1042_v38, %v1041_v2  ;;  %3663 = vst [vmem:[#allocation42_spill] sm:$0xff] (%p420_p7), %v3265_v9  ;;  %v3277_v2 = vld [vmem:[%s2751_s17 + $0x70] sm:$0xf0] (%p420_p7)  ;;  %v3280_v59 = vld [vmem:[%s2751_s17 + $0x78] sm:$0xf] (%p420_p7) }
 0x1d5   : > { %3665 = vst [vmem:[#allocation44_spill] sm:$0xff] (%p420_p7), %v3274_v5  ;;  %v3283_v38 = vld [vmem:[%s2751_s17 + $0x78] sm:$0xf0] (%p420_p7) }
 0x1d6   : >> { %v1151_v1 = vsel %vm1150_vm4, %v1149_v7, %v1148_v41  ;;  %v1088_v40 = vrot.slane %v1087_v62, 4  ;;  %v3259_v41 = vld [vmem:[%s2751_s17 + $0x58] sm:$0xf0] (%p420_p7)  ;;  %3666 = vst [vmem:[#allocation45_spill] sm:$0xff] (%p420_p7), %v3277_v2  ;;  %v3286_v7 = vld [vmem:[%s2827_s15 + $0x1] sm:$0x1] (%p420_p7) }
 0x1d7   : > { %3667 = vst [vmem:[#allocation46_spill] sm:$0xff] (%p420_p7), %v3286_v7 }
 0x1d8   : >> { %v1089_v15 = vadd.f32 %v1088_v40, %v1087_v62  ;;  %v3289_v62 = vld [vmem:[%s2773_s29 + $0x10] sm:$0xff] (%p420_p7)  ;;  %v3295_v40 = vld [vmem:[%s2832_s20 + $0x1] sm:$0x1] (%p420_p7) }
 0x1d9   : >> { %v1012_v17 = vpop.permute.xlu1 %1011 }
 0x1da   : >> { %v1090_v52 = vrot.slane %v1089_v15, 2  ;;  %v1044_v14 = vmul.f32 %v1012_v17, %v3138_v36  ;;  %v3250_v36 = vld [vmem:[%s2751_s17 + $0x50] sm:$0xf] (%p420_p7) }
 0x1dc   : >> { %v1091_v43 = vadd.f32 %v1090_v52, %v1089_v15  ;;  %v1094_v54 = vadd.f32 %v1044_v14, %v1043_v60  ;;  %v3299_v15 = vmov (%p420_p7), 0.0  }
 0x1de   : >> { %v1092_v6 = vrot.slane %v1091_v43, 1  ;;  %v1095_v46 = vrot.slane %v1094_v54, 4 }
 0x1e0   : >> { %v1093_v39 = vadd.f32 %v1092_v6, %v1091_v43  ;;  %v1096_v45 = vadd.f32 %v1095_v46, %v1094_v54 }
 0x1e2   : >> { %v1127_v13 = vadd.f32 %v1111_v4, %v1093_v39  ;;  %v1097_v47 = vrot.slane %v1096_v45, 2 }
 0x1e4   : >> { %v1152_v49 = vrot.slane %v1127_v13, 2  ;;  %v1098_v16 = vadd.f32 %v1097_v47, %v1096_v45 }
 0x1e6   : >> { %v1154_v51 = vsel %vm1153_vm5, %v1152_v49, %v1151_v1  ;;  %v1099_v8 = vrot.slane %v1098_v16, 1  ;;  %v3292_v1 = vld [vmem:[%s2773_s29 + $0x18] sm:$0xff] (%p420_p7) }
 0x1e7   : > { %3668 = vst [vmem:[#allocation47_spill] sm:$0xff] (%p420_p7), %v3292_v1 }
 0x1e8   : >> { %v1100_v50 = vadd.f32 %v1099_v8, %v1098_v16 }
 0x1ea   : >> { %v1128_v37 = vadd.f32 %v1112_v10, %v1100_v50 }
 0x1eb   : > { %422 = sbr.rel (!%p420_p7) target bundleno = 38 (0x26), region = 154 }
 0x1ec   : >> { %v1155_v11 = vrot.slane %v1128_v37, 1  ;;  %v3643_v37 = vmov %v3142_v57  ;;  %v3190_v57 = vld [vmem:[%s2726_s9 + $0x40] sm:$0xf] (%p420_p7)  ;;  %s3301_s9 = smov (%p420_p7), 0  }
 0x1ee   : >> { %v1157_v42 = vsel %vm1156_vm6, %v1155_v11, %v1154_v51 }
 0x1ef   : >> { %1160 = vst [vmem:[%s1159_s21] sm:$0xff] %v1157_v42 }
 0x1f0 LB: >> { %v3669_v1 = vld [vmem:[#allocation47_spill] sm:$0xff]  ;;  %v2319_v17 = vor.u32 %v3283_v38, %v3280_v59  ;;  %2510 = vset.pattern.permute.xlu2 %v2895_v44  ;;  %2508 = vset.pattern.permute.xlu1 %v2895_v44  ;;  %v3670_v5 = vld [vmem:[#allocation44_spill] sm:$0xff]  ;;  %v3671_v2 = vld [vmem:[#allocation45_spill] sm:$0xff]  ;;  %s1210_s17 = ssub.s32 7, %s2649_s9  ;;  %v2299_v45 = vor.u32 %v3253_v56, %v3250_v36  ;;  %v2259_v51 = vor.u32 %v3193_v58, %v3190_v57  ;;  %s1207_s9 = sadd.s32 1, %s2649_s9   ;;  %v2641_v12 = vphi %v3297_v12, %v3538_v12   ;;  %s2649_s9 = sphi %s3301_s9, %s1207_s9   ;;  %v2645_v15 = vphi %v3299_v15, %v3522_v15  }
 0x1f1   : >> { %v2315_v60 = vor.u32 %v3671_v2, %v3670_v5  ;;  %v3672_v30 = vld [vmem:[#allocation35_spill] sm:$0xff]  ;;  %v3673_v31 = vld [vmem:[#allocation36_spill] sm:$0xff]  ;;  %2506 = vset.pattern.permute.xlu0 %v2895_v44  ;;  %v3674_v28 = vld [vmem:[#allocation33_spill] sm:$0xff]  ;;  %s3338_s29 = sshll.u32 %s1210_s17, 3  ;;  %p1204_p8 = scmp.ge.s32.totalorder %s1207_s9, 8  }
 0x1f2   : >> { %1339 = vmatpush.bf16.msra.mxu1 %v2319_v17  ;;  %v2287_v52 = vor.u32 %v3673_v31, %v3672_v30  ;;  %v3675_v29 = vld [vmem:[#allocation34_spill] sm:$0xff]  ;;  %v3676_v0 = vld [vmem:[#allocation43_spill] sm:$0xff]  ;;  %v3678_v27 = vld [vmem:[#allocation32_spill] sm:$0xff]  ;;  %s1212_s22 = sshra.s32 %s3338_s29, 3  ;;  %s1914_s13 = scalar_lea.vmem %s2813_s11, %s3338_s29 }
 0x1f3   : >> { %v2283_v14 = vor.u32 %v3675_v29, %v3674_v28  ;;  %v2311_v43 = vor.u32 %v3676_v0, %v3268_v48  ;;  %v3677_v26 = vld [vmem:[#allocation31_spill] sm:$0xff]  ;;  %v3679_v9 = vld [vmem:[#allocation42_spill] sm:$0xff]  ;;  %v3680_v24 = vld [vmem:[#allocation29_spill] sm:$0xff]  ;;  %s2255_s10 = sshll.u32 %s1212_s22, 2 }
 0x1f4   : >> { %1269 = vmatpush.bf16.msra.mxu0 %v2287_v52  ;;  %v2279_v54 = vor.u32 %v3678_v27, %v3677_v26  ;;  %v2307_v6 = vor.u32 %v3679_v9, %v3262_v63  ;;  %v3681_v25 = vld [vmem:[#allocation30_spill] sm:$0xff]  ;;  %v3682_v3 = vld [vmem:[#allocation41_spill] sm:$0xff]  ;;  %v3683_v22 = vld [vmem:[#allocation27_spill] sm:$0xff]  ;;  %s1215_s12 = scalar_lea.vmem %s2746_s14, %s2255_s10 }
 0x1f5   : >> { %v2275_v4 = vor.u32 %v3681_v25, %v3680_v24  ;;  %v2303_v46 = vor.u32 %v3259_v41, %v3682_v3  ;;  %v3684_v23 = vld [vmem:[#allocation28_spill] sm:$0xff]  ;;  %v3685_v20 = vld [vmem:[#allocation25_spill] sm:$0xff]  ;;  %v3686_v21 = vld [vmem:[#allocation26_spill] sm:$0xff] }
 0x1f6   : >> { %1340 = vmatpush.bf16.msra.mxu1 %v2315_v60  ;;  %v2271_v39 = vor.u32 %v3684_v23, %v3683_v22  ;;  %v2267_v13 = vor.u32 %v3686_v21, %v3685_v20  ;;  %v3687_v34 = vld [vmem:[#allocation39_spill] sm:$0xff]  ;;  %v3688_v35 = vld [vmem:[#allocation40_spill] sm:$0xff]  ;;  %v3691_v32 = vld [vmem:[#allocation37_spill] sm:$0xff] }
 0x1f7   : >> { %v2295_v47 = vor.u32 %v3688_v35, %v3687_v34  ;;  %v3689_v18 = vld [vmem:[#allocation23_spill] sm:$0xff]  ;;  %v3690_v19 = vld [vmem:[#allocation24_spill] sm:$0xff]  ;;  %v3692_v33 = vld [vmem:[#allocation38_spill] sm:$0xff] }
 0x1f8   : >> { %1270 = vmatpush.bf16.msra.mxu0 %v2283_v14  ;;  %v2263_v49 = vor.u32 %v3690_v19, %v3689_v18  ;;  %v2291_v16 = vor.u32 %v3692_v33, %v3691_v32  ;;  %v3352_v8 = vld [vmem:[%s1215_s12] sm:$0xf]  ;;  %v3693_v7 = vld [vmem:[#allocation46_spill] sm:$0xff] }
 0x1f9   : >> { %v1219_v60 = vperm.slane %v3693_v7, 0 }
 0x1fa   : >> { %1341 = vmatpush.bf16.msra.mxu1 %v2311_v43 }
 0x1fc   : >> { %1271 = vmatpush.bf16.msra.mxu0 %v2279_v54 }
 0x1fe   : >> { %1342 = vmatpush.bf16.msra.mxu1 %v2307_v6 }
 0x200   : >> { %1272 = vmatpush.bf16.msra.mxu0 %v2275_v4 }
 0x202   : >> { %1343 = vmatpush.bf16.msra.mxu1 %v2303_v46 }
 0x204   : >> { %1273 = vmatpush.bf16.msra.mxu0 %v2271_v39 }
 0x206   : >> { %1344 = vmatpush.bf16.msra.mxu1 %v2299_v45 }
 0x208   : >> { %1274 = vmatpush.bf16.msra.mxu0 %v2267_v13 }
 0x20a   : >> { %1345 = vmatpush.bf16.msra.mxu1 %v2295_v47 }
 0x20c   : >> { %1275 = vmatpush.bf16.msra.mxu0 %v2263_v49 }
 0x20e   : >> { %1346 = vmatpush.bf16.msra.mxu1 %v2291_v16 }
 0x210   : >> { %1276 = vmatpush.bf16.msra.mxu0 %v2259_v51 }
 0x211   : >> { %1347 = vmatmul.bf16.vlgmr.msra.gmra.mxu1 %v3352_v8 }
 0x213   : >> { %1277 = vmatmul.bf16.vlgmr.msra.gmra.mxu0 %v3352_v8 }
 0x28e   : >> { %v1348_v10 = vpop.f32.mrf.mxu1 }
 0x28f   : >> { %v3356_v50 = vperm.slane %v1348_v10, 2  ;;  %v3358_v37 = vperm.slane %v1348_v10, 1  ;;  %v3360_v11 = vperm.slane %v1348_v10, 0  ;;  %v3371_v17 = vperm.slane %v1348_v10, 3 }
 0x290   : >> { %v1278_v52 = vpop.f32.mrf.mxu0  ;;  %v3377_v6 = vperm.slane %v1348_v10, 4  ;;  %v3382_v39 = vperm.slane %v1348_v10, 5  ;;  %v3384_v45 = vperm.slane %v1348_v10, 7  ;;  %v3389_v49 = vperm.slane %v1348_v10, 6 }
 0x291   : >> { %1471 = vperm.xlu2 %2510, %v3356_v50   ;;  %1458 = vperm.xlu1 %2508, %v3358_v37   ;;  %v1279_v14 = vadd.f32 %v1278_v52, %v1219_v60 }
 0x292   : >> { %1445 = vperm.xlu0 %2506, %v3360_v11  }
 0x293   : >> { %v1283_v43 = vand.u32 2147483647, %v1279_v14  ;;  %v1282_v16 = vmax.f32 %v1279_v14, 0.0 }
 0x295   : >> { %v1284_v54 = vsub.f32 0.0, %v1283_v43 }
 0x296   : >> { %v1350_v42 = vpop.f32.mrf.mxu1 }
 0x297   : >> { %v1285_v4 = vmul.f32 1.442695, %v1284_v54 }
 0x298   : >> { %v1280_v46 = vpop.f32.mrf.mxu0 }
 0x299   : >> { %2511 = vset.pattern.permute.xlu2 %v2945_v61  ;;  %2509 = vset.pattern.permute.xlu1 %v2945_v61  ;;  %2527 = vpow2.f32 %v1285_v4 }
 0x29a   : >> { %2507 = vset.pattern.permute.xlu0 %v2945_v61 }
 0x29f   : >> { %v2528_v13 = vpop.eup %2527 }
 0x2a0   : >> { %v1287_v47 = vadd.f32 1.0, %v2528_v13 }
 0x2a1   : >> { %1477 = vperm.xlu2 %2511, %v3356_v50   ;;  %1464 = vperm.xlu1 %2509, %v3358_v37  }
 0x2a2   : >> { %1451 = vperm.xlu0 %2507, %v3360_v11   ;;  %2529 = vlog2.f32 %v1287_v47 }
 0x2a8   : >> { %v2530_v51 = vpop.eup %2529 }
 0x2a9   : >> { %1490 = vperm.xlu2 %2511, %v3371_v17   ;;  %2512 = vset.pattern.permute.xlu1 %v2895_v44  ;;  %v1289_v42 = vmul.f32 0.6931472, %v2530_v51 }
 0x2aa   : >> { %2513 = vset.pattern.permute.xlu0 %v2895_v44 }
 0x2ab   : >> { %v3394_v60 = vadd.f32 %v1289_v42, %v1282_v16 }
 0x2ad   : >> { %v1353_v52 = vrot.slane %v3394_v60, 1  ;;  %v1354_v43 = vrot.slane %v3394_v60, 2  ;;  %v1355_v54 = vrot.slane %v3394_v60, 3  ;;  %v1356_v10 = vrot.slane %v3394_v60, 4 }
 0x2ae   : >> { %v1360_v4 = vperm.slane %v3394_v60, 0  ;;  %v1357_v13 = vrot.slane %v3394_v60, 5  ;;  %v1358_v2 = vrot.slane %v3394_v60, 6 }
 0x2af   : >> { %v1361_v14 = vperm.slane %v1353_v52, 0  ;;  %v1362_v46 = vperm.slane %v1354_v43, 0  ;;  %v1363_v47 = vperm.slane %v1355_v54, 0  ;;  %v1364_v3 = vperm.slane %v1356_v10, 0 }
 0x2b0   : >> { %v1376_v16 = vmul.f32 %v3289_v62, %v1360_v4  ;;  %v1377_v51 = vmul.f32 %v3669_v1, %v1360_v4  ;;  %v1359_v43 = vrot.slane %v3394_v60, 7  ;;  %v1365_v7 = vperm.slane %v1357_v13, 0 }
 0x2b1   : >> { %2515 = vset.pattern.permute.xlu2 %v2895_v44  ;;  %1484 = vperm.xlu1 %2512, %v3371_v17   ;;  %v1378_v42 = vmul.f32 %v3289_v62, %v1361_v14  ;;  %v1379_v0 = vmul.f32 %v3669_v1, %v1361_v14  ;;  %v1380_v5 = vmul.f32 %v3289_v62, %v1362_v46  ;;  %v1366_v21 = vperm.slane %v1358_v2, 0 }
 0x2b2   : >> { %1497 = vperm.xlu0 %2513, %v3377_v6   ;;  %v1381_v52 = vmul.f32 %v3669_v1, %v1362_v46  ;;  %v1382_v54 = vmul.f32 %v3289_v62, %v1363_v47  ;;  %v1392_v9 = vmul.f32 1.442695, %v1376_v16  ;;  %v1383_v18 = vmul.f32 %v3669_v1, %v1363_v47 }
 0x2b3   : >> { %v1394_v4 = vmul.f32 1.442695, %v1377_v51  ;;  %v1396_v19 = vmul.f32 1.442695, %v1378_v42  ;;  %v1398_v20 = vmul.f32 1.442695, %v1379_v0  ;;  %v1384_v14 = vmul.f32 %v3289_v62, %v1364_v3 }
 0x2b4   : >> { %2531 = vpow2.f32 %v1392_v9  ;;  %v1400_v10 = vmul.f32 1.442695, %v1380_v5  ;;  %v1385_v22 = vmul.f32 %v3669_v1, %v1364_v3  ;;  %v1402_v46 = vmul.f32 1.442695, %v1381_v52 }
 0x2b5   : >> { %2533 = vpow2.f32 %v1394_v4  ;;  %v1367_v13 = vperm.slane %v1359_v43, 0  ;;  %v1386_v16 = vmul.f32 %v3289_v62, %v1365_v7  ;;  %v1404_v47 = vmul.f32 1.442695, %v1382_v54 }
 0x2b6   : >> { %2535 = vpow2.f32 %v1396_v19  ;;  %v1387_v0 = vmul.f32 %v3669_v1, %v1365_v7  ;;  %v1406_v9 = vmul.f32 1.442695, %v1383_v18  ;;  %v1388_v5 = vmul.f32 %v3289_v62, %v1366_v21 }
 0x2b7   : >> { %2537 = vpow2.f32 %v1398_v20  ;;  %v1408_v3 = vmul.f32 1.442695, %v1384_v14  ;;  %v1389_v2 = vmul.f32 %v3669_v1, %v1366_v21  ;;  %v1410_v51 = vmul.f32 1.442695, %v1385_v22 }
 0x2b8   : >> { %2539 = vpow2.f32 %v1400_v10  ;;  %v1390_v52 = vmul.f32 %v3289_v62, %v1367_v13  ;;  %v1412_v19 = vmul.f32 1.442695, %v1386_v16  ;;  %v1391_v7 = vmul.f32 %v3669_v1, %v1367_v13 }
 0x2b9   : >> { %1510 = vperm.xlu2 %2515, %v3382_v39   ;;  %2514 = vset.pattern.permute.xlu1 %v2945_v61  ;;  %2541 = vpow2.f32 %v1402_v46  ;;  %v1414_v18 = vmul.f32 1.442695, %v1387_v0  ;;  %v1416_v54 = vmul.f32 1.442695, %v1388_v5  ;;  %v1418_v21 = vmul.f32 1.442695, %v1389_v2 }
 0x2ba   : >> { %1536 = vperm.xlu0 %2513, %v3384_v45   ;;  %v3424_v42 = vpop.eup %2531  ;;  %2543 = vpow2.f32 %v1404_v47  ;;  %v1420_v14 = vmul.f32 1.442695, %v1390_v52  ;;  %v1422_v46 = vmul.f32 1.442695, %v1391_v7  ;;  %v3604_v16 = vunpack.c.l.bf16 %v3352_v8 }
 0x2bb   : >> { %v3427_v43 = vpop.eup %2533  ;;  %2545 = vpow2.f32 %v1406_v9 }
 0x2bc   : >> { %v3430_v20 = vpop.eup %2535  ;;  %2547 = vpow2.f32 %v1408_v3  ;;  %v1544_v3 = vmul.f32 %v3394_v60, %v3604_v16 }
 0x2bd   : >> { %v3432_v4 = vpop.eup %2537  ;;  %2549 = vpow2.f32 %v1410_v51 }
 0x2be   : >> { %v3436_v22 = vpop.eup %2539  ;;  %2551 = vpow2.f32 %v1412_v19  ;;  %v1547_v7 = vrot.slane %v1544_v3, 2  ;;  %v1551_v27 = vrot.slane %v1544_v3, 6  ;;  %v1549_v29 = vrot.slane %v1544_v3, 4 }
 0x2bf   : >> { %v3439_v10 = vpop.eup %2541  ;;  %2553 = vpow2.f32 %v1414_v18 }
 0x2c0   : >> { %v3441_v13 = vpop.eup %2543  ;;  %2555 = vpow2.f32 %v1416_v54  ;;  %v1555_v54 = vperm.slane %v1547_v7, 0  ;;  %v1557_v30 = vperm.slane %v1549_v29, 0 }
 0x2c1   : >> { %1523 = vperm.xlu2 %2515, %v3389_v49   ;;  %1503 = vperm.xlu1 %2514, %v3377_v6   ;;  %v3444_v47 = vpop.eup %2545  ;;  %2557 = vpow2.f32 %v1418_v21 }
 0x2c2   : >> { %2517 = vset.pattern.permute.xlu0 %v2981_v55  ;;  %v3446_v0 = vpop.eup %2547  ;;  %2559 = vpow2.f32 %v1420_v14  ;;  %v1546_v14 = vrot.slane %v1544_v3, 1 }
 0x2c3   : >> { %v3448_v9 = vpop.eup %2549  ;;  %2561 = vpow2.f32 %v1422_v46 }
 0x2c4   : >> { %v3450_v5 = vpop.eup %2551  ;;  %v1554_v7 = vperm.slane %v1546_v14, 0 }
 0x2c5   : >> { %v3455_v2 = vpop.eup %2553 }
 0x2c6   : >> { %v3459_v51 = vpop.eup %2555 }
 0x2c7   : >> { %v3462_v52 = vpop.eup %2557 }
 0x2c8   : >> { %v2560_v19 = vpop.eup %2559 }
 0x2c9   : >> { %2516 = vset.pattern.permute.xlu2 %v2945_v61  ;;  %1516 = vperm.xlu1 %2514, %v3382_v39   ;;  %v3464_v18 = vpop.eup %2561  ;;  %v1604_v34 = vmul.f32 %v2645_v15, %v2560_v19 }
 0x2ca   : >> { %1706 = vperm.xlu0 %2517, %v3360_v11  }
 0x2d1   : >> { %1529 = vperm.xlu2 %2516, %v3389_v49   ;;  %1542 = vperm.xlu1 %2514, %v3384_v45  }
 0x2d2   : >> { %2520 = vset.pattern.permute.xlu0 %v3015_v53 }
 0x2d9   : >> { %2519 = vset.pattern.permute.xlu2 %v2981_v55  ;;  %2518 = vset.pattern.permute.xlu1 %v3015_v53 }
 0x2da   : >> { %1736 = vperm.xlu0 %2520, %v3356_v50  }
 0x2e1   : >> { %1718 = vperm.xlu2 %2519, %v3358_v37   ;;  %1712 = vperm.xlu1 %2518, %v3360_v11  }
 0x2e2   : >> { %2523 = vset.pattern.permute.xlu0 %v2981_v55 }
 0x2e9   : >> { %1730 = vperm.xlu2 %2519, %v3356_v50   ;;  %1724 = vperm.xlu1 %2518, %v3358_v37   ;;  %v1548_v37 = vrot.slane %v1544_v3, 3 }
 0x2ea   : >> { %1766 = vperm.xlu0 %2523, %v3382_v39  }
 0x2eb   : >> { %v1472_v60 = vpop.permute.xlu2 %1471  ;;  %v1556_v46 = vperm.slane %v1548_v37, 0 }
 0x2ec   : >> { %v3469_v21 = vmul.f32 %v1555_v54, %v1472_v60  ;;  %v1553_v60 = vperm.slane %v1544_v3, 0 }
 0x2f1   : >> { %2522 = vset.pattern.permute.xlu2 %v3015_v53  ;;  %2521 = vset.pattern.permute.xlu1 %v2981_v55 }
 0x2f2   : >> { %2526 = vset.pattern.permute.xlu0 %v3015_v53 }
 0x2f9   : >> { %1748 = vperm.xlu2 %2522, %v3371_v17   ;;  %1742 = vperm.xlu1 %2521, %v3371_v17  }
 0x2fa   : >> { %1796 = vperm.xlu0 %2526, %v3384_v45  }
 0x2fb   : >> { %v1478_v50 = vpop.permute.xlu2 %1477 }
 0x2fc   : >> { %v3477_v11 = vmul.f32 %v1555_v54, %v1478_v50  ;;  %v1550_v54 = vrot.slane %v1544_v3, 5 }
 0x2fe   : >> { %v1558_v50 = vperm.slane %v1550_v54, 0 }
 0x301   : >> { %1760 = vperm.xlu2 %2522, %v3377_v6   ;;  %1754 = vperm.xlu1 %2521, %v3377_v6  }
 0x303   : >> { %v1491_v16 = vpop.permute.xlu2 %1490  ;;  %v1459_v1 = vpop.permute.xlu1 %1458 }
 0x304   : >> { %v3481_v23 = vmul.f32 %v1556_v46, %v1491_v16  ;;  %v1571_v24 = vmul.f32 %v1554_v7, %v1459_v1  ;;  %v1446_v17 = vpop.permute.xlu0 %1445 }
 0x305   : >> { %v1569_v25 = vmul.f32 %v1553_v60, %v1446_v17  ;;  %v1559_v17 = vperm.slane %v1551_v27, 0 }
 0x309   : >> { %2525 = vset.pattern.permute.xlu2 %v2981_v55  ;;  %2524 = vset.pattern.permute.xlu1 %v3015_v53 }
 0x311   : >> { %1778 = vperm.xlu2 %2525, %v3389_v49   ;;  %1772 = vperm.xlu1 %2524, %v3382_v39  }
 0x313   : >> { %v1511_v37 = vpop.permute.xlu2 %1510  ;;  %v1465_v6 = vpop.permute.xlu1 %1464 }
 0x314   : >> { %v1579_v14 = vmul.f32 %v1558_v50, %v1511_v37  ;;  %v3487_v26 = vmul.f32 %v1554_v7, %v1465_v6  ;;  %v1452_v16 = vpop.permute.xlu0 %1451  ;;  %v1552_v37 = vrot.slane %v1544_v3, 7 }
 0x315   : >> { %v3489_v1 = vmul.f32 %v1553_v60, %v1452_v16 }
 0x316   : >> { %v1560_v7 = vperm.slane %v1552_v37, 0 }
 0x319   : >> { %1790 = vperm.xlu2 %2525, %v3384_v45   ;;  %1784 = vperm.xlu1 %2524, %v3389_v49  }
 0x31b   : >> { %v1524_v28 = vpop.permute.xlu2 %1523 }
 0x31c   : >> { %v1581_v54 = vmul.f32 %v1559_v17, %v1524_v28 }
 0x323   : >> { %v1485_v31 = vpop.permute.xlu1 %1484 }
 0x324   : >> { %v1575_v39 = vmul.f32 %v1556_v46, %v1485_v31  ;;  %v1498_v32 = vpop.permute.xlu0 %1497 }
 0x325   : >> { %v1577_v33 = vmul.f32 %v1557_v30, %v1498_v32 }
 0x32b   : >> { %v1530_v6 = vpop.permute.xlu2 %1529 }
 0x32c   : >> { %v1582_v60 = vmul.f32 %v1559_v17, %v1530_v6  ;;  %v1537_v16 = vpop.permute.xlu0 %1536 }
 0x32d   : >> { %v1583_v27 = vmul.f32 %v1560_v7, %v1537_v16 }
 0x32f   : >> { %v3494_v35 = vadd.f32 %v1604_v34, %v1583_v27 }
 0x331   : >> { %v1617_v45 = vmul.f32 %v3459_v51, %v3494_v35 }
 0x333   : >> { %v3498_v28 = vadd.f32 %v1617_v45, %v1581_v54  ;;  %v1504_v29 = vpop.permute.xlu1 %1503 }
 0x334   : >> { %v1578_v49 = vmul.f32 %v1557_v30, %v1504_v29  ;;  %v1605_v30 = vmul.f32 %v2641_v12, %v3464_v18 }
 0x335   : >> { %v1630_v31 = vmul.f32 %v3450_v5, %v3498_v28 }
 0x337   : >> { %v3502_v32 = vadd.f32 %v1630_v31, %v1579_v14 }
 0x339   : >> { %v1643_v15 = vmul.f32 %v3446_v0, %v3502_v32 }
 0x33b   : >> { %v3506_v3 = vadd.f32 %v1643_v15, %v1577_v33  ;;  %v1517_v19 = vpop.permute.xlu1 %1516 }
 0x33c   : >> { %v1580_v34 = vmul.f32 %v1558_v50, %v1517_v19 }
 0x33d   : >> { %v1656_v46 = vmul.f32 %v3441_v13, %v3506_v3 }
 0x33f   : >> { %v1661_v51 = vadd.f32 %v1656_v46, %v1575_v39  ;;  %v1719_v39 = vpop.permute.xlu2 %1718 }
 0x341   : >> { %v1669_v17 = vmul.f32 %v3436_v22, %v1661_v51 }
 0x343   : >> { %v1674_v5 = vadd.f32 %v1669_v17, %v3469_v21  ;;  %v1543_v14 = vpop.permute.xlu1 %1542 }
 0x344   : >> { %v1584_v54 = vmul.f32 %v1560_v7, %v1543_v14 }
 0x345   : >> { %v1682_v37 = vmul.f32 %v3430_v20, %v1674_v5 }
 0x346   : >> { %v3515_v0 = vadd.f32 %v1605_v30, %v1584_v54 }
 0x347   : >> { %v1687_v33 = vadd.f32 %v1682_v37, %v1571_v24  ;;  %v1707_v24 = vpop.permute.xlu0 %1706  ;;  %v1731_v21 = vpop.permute.xlu2 %1730 }
 0x348   : >> { %v1618_v50 = vmul.f32 %v3462_v52, %v3515_v0  ;;  %v1818_v27 = vmul.f32 %v1731_v21, %v1674_v5  ;;  %v1887_v5 = vperm.slane %v3295_v40, 0 }
 0x349   : >> { %v1694_v13 = vmul.f32 %v3424_v42, %v1687_v33  ;;  %v1816_v19 = vmul.f32 %v1719_v39, %v1687_v33 }
 0x34a   : >> { %v3520_v6 = vadd.f32 %v1618_v50, %v1582_v60  ;;  %v3694_v50 = vunpack.c.l.bf16 %v3352_v8 }
 0x34b   : >> { %v3522_v15 = vadd.f32 %v1694_v13, %v1569_v25  }
 0x34c   : >> { %v1631_v12 = vmul.f32 %v3455_v2, %v3520_v6  ;;  %v3545_v13 = vmul.f32 %v1887_v5, %v3694_v50 }
 0x34e   : >> { %v3526_v22 = vadd.f32 %v1631_v12, %v1580_v34  ;;  %v1893_v50 = vrot.slane %v3545_v13, 3 }
 0x34f   : >> { %v1737_v16 = vpop.permute.xlu0 %1736 }
 0x350   : >> { %v1644_v20 = vmul.f32 %v3448_v9, %v3526_v22 }
 0x352   : >> { %v1649_v18 = vadd.f32 %v1644_v20, %v1578_v49 }
 0x353   : >> { %v1713_v7 = vpop.permute.xlu1 %1712  ;;  %v1749_v29 = vpop.permute.xlu2 %1748 }
 0x354   : >> { %v1657_v52 = vmul.f32 %v3444_v47, %v1649_v18 }
 0x356   : >> { %v1662_v42 = vadd.f32 %v1657_v52, %v3481_v23 }
 0x358   : >> { %v1670_v60 = vmul.f32 %v3439_v10, %v1662_v42 }
 0x35a   : >> { %v1675_v25 = vadd.f32 %v1670_v60, %v3477_v11  ;;  %v1814_v11 = vmul.f32 %v1707_v24, %v3522_v15 }
 0x35b   : >> { %v1725_v49 = vpop.permute.xlu1 %1724  ;;  %v1761_v54 = vpop.permute.xlu2 %1760 }
 0x35c   : >> { %v1683_v2 = vmul.f32 %v3432_v4, %v1675_v25  ;;  %v1819_v45 = vmul.f32 %v1737_v16, %v1675_v25  ;;  %v1892_v25 = vrot.slane %v3545_v13, 2  ;;  %v1821_v16 = vmul.f32 %v1749_v29, %v1662_v42 }
 0x35e   : >> { %v1844_v31 = vadd.f32 %v1819_v45, %v1818_v27  ;;  %v1688_v9 = vadd.f32 %v1683_v2, %v3487_v26 }
 0x360   : >> { %v1845_v34 = vrot.slane %v1844_v31, 4  ;;  %v1695_v47 = vmul.f32 %v3427_v43, %v1688_v9  ;;  %v1817_v46 = vmul.f32 %v1725_v49, %v1688_v9 }
 0x362   : >> { %v1846_v23 = vadd.f32 %v1845_v34, %v1844_v31  ;;  %v3538_v12 = vadd.f32 %v1695_v47, %v3489_v1   ;;  %v1837_v10 = vadd.f32 %v1817_v46, %v1816_v19  ;;  %v1767_v46 = vpop.permute.xlu0 %1766 }
 0x364   : >> { %v1847_v17 = vrot.slane %v1846_v23, 2  ;;  %v1815_v4 = vmul.f32 %v1713_v7, %v3538_v12  ;;  %v1838_v30 = vrot.slane %v1837_v10, 4  ;;  %v1891_v7 = vrot.slane %v3545_v13, 1 }
 0x366   : >> { %v1848_v26 = vadd.f32 %v1847_v17, %v1846_v23  ;;  %v1830_v14 = vadd.f32 %v1815_v4, %v1814_v11  ;;  %v1839_v37 = vadd.f32 %v1838_v30, %v1837_v10  ;;  %v1823_v17 = vmul.f32 %v1761_v54, %v1649_v18 }
 0x368   : >> { %v1831_v33 = vrot.slane %v1830_v14, 4  ;;  %v1840_v43 = vrot.slane %v1839_v37, 2  ;;  %v1849_v1 = vrot.slane %v1848_v26, 1 }
 0x36a   : >> { %v1832_v39 = vadd.f32 %v1831_v33, %v1830_v14  ;;  %v1841_v20 = vadd.f32 %v1840_v43, %v1839_v37  ;;  %v1850_v60 = vadd.f32 %v1849_v1, %v1848_v26 }
 0x36b   : >> { %v1743_v24 = vpop.permute.xlu1 %1742  ;;  %v1779_v31 = vpop.permute.xlu2 %1778 }
 0x36c   : >> { %v1833_v21 = vrot.slane %v1832_v39, 2  ;;  %v1842_v52 = vrot.slane %v1841_v20, 1  ;;  %v1820_v27 = vmul.f32 %v1743_v24, %v1661_v51  ;;  %v1908_v19 = vadd.f32 %v1892_v25, %v1850_v60  ;;  %v1797_v1 = vpop.permute.xlu0 %1796 }
 0x36d   : >> { %v1829_v24 = vmul.f32 %v1797_v1, %v3515_v0  ;;  %v1894_v25 = vrot.slane %v3545_v13, 4 }
 0x36e   : >> { %v1834_v2 = vadd.f32 %v1833_v21, %v1832_v39  ;;  %v1843_v45 = vadd.f32 %v1842_v52, %v1841_v20  ;;  %v1851_v9 = vadd.f32 %v1821_v16, %v1820_v27  ;;  %v1927_v42 = vrot.slane %v1908_v19, 6 }
 0x370   : >> { %v1835_v8 = vrot.slane %v1834_v2, 1  ;;  %v1907_v49 = vadd.f32 %v1891_v7, %v1843_v45  ;;  %v1852_v34 = vrot.slane %v1851_v9, 4 }
 0x372   : >> { %v1836_v47 = vadd.f32 %v1835_v8, %v1834_v2  ;;  %v1853_v23 = vadd.f32 %v1852_v34, %v1851_v9  ;;  %v1924_v4 = vrot.slane %v1907_v49, 7  ;;  %v1824_v9 = vmul.f32 %v1767_v46, %v3502_v32 }
 0x373   : >> { %v1755_v10 = vpop.permute.xlu1 %1754  ;;  %v1791_v37 = vpop.permute.xlu2 %1790 }
 0x374   : >> { %v1906_v11 = vadd.f32 %v3545_v13, %v1836_v47  ;;  %v1822_v30 = vmul.f32 %v1755_v10, %v3506_v3  ;;  %v1854_v51 = vrot.slane %v1853_v23, 2  ;;  %v1828_v18 = vmul.f32 %v1791_v37, %v3494_v35 }
 0x376   : >> { %v1926_v29 = vsel %vm1138_vm0, %v1924_v4, %v1906_v11  ;;  %v1858_v5 = vadd.f32 %v1823_v17, %v1822_v30  ;;  %v1855_v26 = vadd.f32 %v1854_v51, %v1853_v23  ;;  %v1879_v7 = vadd.f32 %v1829_v24, %v1828_v18  ;;  %v1915_v24 = vld [vmem:[%s1914_s13] sm:$0xff] }
 0x377   : >> { %v1929_v14 = vsel %vm1141_vm1, %v1927_v42, %v1926_v29  ;;  %v1826_v17 = vmul.f32 %v1779_v31, %v3498_v28  ;;  %v1897_v31 = vrot.slane %v3545_v13, 7 }
 0x378   : >> { %v1859_v33 = vrot.slane %v1858_v5, 4  ;;  %v1856_v43 = vrot.slane %v1855_v26, 1  ;;  %v1880_v2 = vrot.slane %v1879_v7, 4 }
 0x37a   : >> { %v1860_v39 = vadd.f32 %v1859_v33, %v1858_v5  ;;  %v1857_v20 = vadd.f32 %v1856_v43, %v1855_v26  ;;  %v1881_v34 = vadd.f32 %v1880_v2, %v1879_v7 }
 0x37c   : >> { %v1861_v54 = vrot.slane %v1860_v39, 2  ;;  %v1909_v3 = vadd.f32 %v1893_v50, %v1857_v20  ;;  %v1882_v10 = vrot.slane %v1881_v34, 2 }
 0x37e   : >> { %v1862_v21 = vadd.f32 %v1861_v54, %v1860_v39  ;;  %v1930_v52 = vrot.slane %v1909_v3, 5  ;;  %v1883_v32 = vadd.f32 %v1882_v10, %v1881_v34  ;;  %v1896_v39 = vrot.slane %v3545_v13, 6 }
 0x380   : >> { %v1863_v60 = vrot.slane %v1862_v21, 1  ;;  %v1932_v16 = vsel %vm1144_vm2, %v1930_v52, %v1929_v14  ;;  %v1884_v14 = vrot.slane %v1883_v32, 1 }
 0x382   : >> { %v1864_v27 = vadd.f32 %v1863_v60, %v1862_v21  ;;  %v1885_v28 = vadd.f32 %v1884_v14, %v1883_v32 }
 0x383   : >> { %v1773_v45 = vpop.permute.xlu1 %1772 }
 0x384   : >> { %v1910_v8 = vadd.f32 %v1894_v25, %v1864_v27  ;;  %v1825_v35 = vmul.f32 %v1773_v45, %v3526_v22  ;;  %v1895_v22 = vrot.slane %v3545_v13, 5  ;;  %v1913_v18 = vadd.f32 %v1897_v31, %v1885_v28 }
 0x386   : >> { %v1933_v49 = vrot.slane %v1910_v8, 4  ;;  %v1865_v19 = vadd.f32 %v1825_v35, %v1824_v9  ;;  %v1942_v21 = vrot.slane %v1913_v18, 1 }
 0x388   : >> { %v1935_v0 = vsel %vm1147_vm3, %v1933_v49, %v1932_v16  ;;  %v1866_v47 = vrot.slane %v1865_v19, 4 }
 0x38a   : >> { %v1867_v23 = vadd.f32 %v1866_v47, %v1865_v19 }
 0x38b   : >> { %v1785_v11 = vpop.permute.xlu1 %1784 }
 0x38c   : >> { %v1868_v4 = vrot.slane %v1867_v23, 2  ;;  %v1827_v30 = vmul.f32 %v1785_v11, %v3520_v6 }
 0x38e   : >> { %v1869_v42 = vadd.f32 %v1868_v4, %v1867_v23  ;;  %v1872_v51 = vadd.f32 %v1827_v30, %v1826_v17 }
 0x390   : >> { %v1870_v46 = vrot.slane %v1869_v42, 1  ;;  %v1873_v29 = vrot.slane %v1872_v51, 4 }
 0x392   : >> { %v1871_v5 = vadd.f32 %v1870_v46, %v1869_v42  ;;  %v1874_v26 = vadd.f32 %v1873_v29, %v1872_v51 }
 0x394   : >> { %v1911_v37 = vadd.f32 %v1895_v22, %v1871_v5  ;;  %v1875_v33 = vrot.slane %v1874_v26, 2 }
 0x396   : >> { %v1936_v43 = vrot.slane %v1911_v37, 3  ;;  %v1876_v50 = vadd.f32 %v1875_v33, %v1874_v26 }
 0x398   : >> { %v1938_v6 = vsel %vm1150_vm4, %v1936_v43, %v1935_v0  ;;  %v1877_v1 = vrot.slane %v1876_v50, 1 }
 0x39a   : >> { %v1878_v20 = vadd.f32 %v1877_v1, %v1876_v50 }
 0x39c   : >> { %v1912_v54 = vadd.f32 %v1896_v39, %v1878_v20 }
 0x39e   : >> { %v1939_v3 = vrot.slane %v1912_v54, 2 }
 0x3a0   : >> { %v1941_v52 = vsel %vm1153_vm5, %v1939_v3, %v1938_v6  ;;  %1206 = sbr.rel (!%p1204_p8) target bundleno = 496 (0x1f0), region = 165 }
 0x3a1   : >> { %v1944_v7 = vsel %vm1156_vm6, %v1942_v21, %v1941_v52 }
 0x3a2   : >> { %v1946_v60 = vadd.f32 %v1944_v7, %v1915_v24 }
 0x3a4   : >> { %1947 = vst [vmem:[%s1914_s13] sm:$0xff] %v1946_v60 }
 0x3a5 PF: > { %s16_s25 = sadd.s32 1, %s2625_s25   ;;  %s3695_s21 = smov %s2617_s23 }
 0x3a6   : > { %p13_p9 = scmp.ge.s32.totalorder %s16_s25, 6   ;;  %s3696_s22 = smov %s2621_s24 }
 0x3a7   : > { %s3697_s23 = smov %s3700_s26  ;;  %s3698_s24 = smov %s3704_s27 }
 0x3a8   :  { %15 = sbr.rel (!%p13_p9) target bundleno = 3 (0x3), region = 176 }

</bundles_post_ra>
